<compile_context>
chip_gen: v5e
topology: v5e:2x2
jax: 0.10.0
libtpu: 0.0.40
codegen_flags: <defaults>
</compile_context>

<pallas_src>
import functools

import numpy as np
import jax
import jax.numpy as jnp
from jax import lax
from jax.experimental import pallas as pl
from jax.experimental.pallas import tpu as pltpu


EPS = 1e-5                         # PyTorch BatchNorm2d default
_ROW_TILE = 512                    # stem matmul row tile (mem-bound sweet spot)
_MAX_SINGLE_BLOCK_ROWS = 512       # <= this -> one full-extent block
_VMEM_LIMIT = 48 * 1024 * 1024     # above scoped defaults, safe on v5e/v6e/v7x


def _cparams(sem):
    return pltpu.CompilerParams(dimension_semantics=sem,
                                vmem_limit_bytes=_VMEM_LIMIT)


def _full_spec(shape):
    nd = len(shape)
    return pl.BlockSpec(shape, lambda i, _nd=nd: (0,) * _nd)


# ----------------------------------------------------------------------------
# Pallas kernels
# ----------------------------------------------------------------------------

def _mm_stats_kernel(a_ref, w_ref, o_ref, st_ref, *, true_m, tm, tiled):
    """o = a @ w (bf16 MXU, f32 acc); per-tile column sum / sum-of-squares."""
    a = a_ref[...]
    if tiled:
        rows = (lax.broadcasted_iota(jnp.int32, (tm, 1), 0)
                + pl.program_id(0) * tm)
        a = jnp.where(rows < true_m, a, jnp.zeros_like(a))
    y = jnp.dot(a, w_ref[...], preferred_element_type=jnp.float32)
    o_ref[...] = y
    cs = jnp.sum(y, axis=0, keepdims=True)
    cs2 = jnp.sum(y * y, axis=0, keepdims=True)
    st_ref[...] = jnp.concatenate([cs, cs2], axis=0)[None]


def _ssrelu_stats_kernel(x_ref, s_ref, t_ref, o_ref, st_ref):
    """y = relu(x*scale + shift); column stats of y (stem norm0/relu0)."""
    y = jnp.maximum(x_ref[...] * s_ref[...] + t_ref[...], 0.0)
    o_ref[...] = y
    st_ref[...] = jnp.concatenate(
        [jnp.sum(y, axis=0, keepdims=True),
         jnp.sum(y * y, axis=0, keepdims=True)], axis=0)


def _make_dense_layer_kernel(num_seg, spatial_w):
    """Fused dense layer: norm1+relu1 -> conv1(1x1) -> norm2+relu2 -> conv2(3x3)."""
    S = num_seg
    w = spatial_w

    def kernel(*refs):
        xs = refs[0:S]
        ss = refs[S:2 * S]
        ts = refs[2 * S:3 * S]
        w1s = refs[3 * S:4 * S]
        w2_ref = refs[4 * S]
        mask_ref = refs[4 * S + 1]
        out_ref = refs[4 * S + 2]
        st_ref = refs[4 * S + 3]
        m = xs[0].shape[0]

        # norm1 + relu1 folded into the 1x1 conv's A-prologue; K split over
        # the feature segments so the dense-block concat never materializes.
        b = None
        for j in range(S):
            a = jnp.maximum(xs[j][...] * ss[j][...] + ts[j][...], 0.0)
            c = jnp.dot(a.astype(jnp.bfloat16), w1s[j][...],
                        preferred_element_type=jnp.float32)
            b = c if b is None else b + c

        # norm2 (training-mode batch stats, gamma=1/beta=0) + relu2, resident
        # in VMEM -- no cross-kernel stats round trip.
        inv_m = 1.0 / m
        mean2 = jnp.sum(b, axis=0, keepdims=True) * inv_m
        var2 = jnp.maximum(jnp.sum(b * b, axis=0, keepdims=True) * inv_m
                           - mean2 * mean2, 0.0)
        a2 = jnp.maximum((b - mean2) * lax.rsqrt(var2 + EPS), 0.0)

        # conv2 (3x3, pad 1, stride 1) as 9 shifted+masked matmuls.  Rows are
        # (img, y, x) row-major, so tap (dy,dx) is a row shift of dy*w+dx; the
        # precomputed mask zeroes taps that fall in the padding / other rows.
        # TODO(synk): halo-tiled spatial blocking for image sizes whose
        # feature map does not fit a single VMEM block.
        acc = None
        tap = 0
        for dy in (-1, 0, 1):
            for dx in (-1, 0, 1):
                off = (dy * w + dx) % m
                if off == 0:
                    shifted = a2
                else:
                    shifted = jnp.concatenate([a2[off:], a2[:off]], axis=0)
                shifted = shifted * mask_ref[:, tap:tap + 1]
                c = jnp.dot(shifted.astype(jnp.bfloat16), w2_ref[tap],
                            preferred_element_type=jnp.float32)
                acc = c if acc is None else acc + c
                tap += 1

        out_ref[...] = acc
        st_ref[...] = jnp.concatenate(
            [jnp.sum(acc, axis=0, keepdims=True),
             jnp.sum(acc * acc, axis=0, keepdims=True)], axis=0)

    return kernel


def _make_transition_kernel(num_seg):
    """Fused transition: norm+relu -> conv(1x1) -> AvgPool2d(2,2) -> stats."""
    S = num_seg

    def kernel(*refs):
        xs = refs[0:S]
        ss = refs[S:2 * S]
        ts = refs[2 * S:3 * S]
        ws = refs[3 * S:4 * S]
        p_ref = refs[4 * S]
        out_ref = refs[4 * S + 1]
        st_ref = refs[4 * S + 2]

        y = None
        for j in range(S):
            a = jnp.maximum(xs[j][...] * ss[j][...] + ts[j][...], 0.0)
            c = jnp.dot(a.astype(jnp.bfloat16), ws[j][...],
                        preferred_element_type=jnp.float32)
            y = c if y is None else y + c
        pooled = jnp.dot(p_ref[...], y, preferred_element_type=jnp.float32)
        out_ref[...] = pooled
        st_ref[...] = jnp.concatenate(
            [jnp.sum(pooled, axis=0, keepdims=True),
             jnp.sum(pooled * pooled, axis=0, keepdims=True)], axis=0)

    return kernel


def _make_head_kernel(num_seg):
    """Fused head: norm5 + ReLU + adaptive_avg_pool2d(1,1) + Linear."""
    S = num_seg

    def kernel(*refs):
        xs = refs[0:S]
        ss = refs[S:2 * S]
        ts = refs[2 * S:3 * S]
        wf = refs[3 * S:4 * S]
        p_ref = refs[4 * S]
        b_ref = refs[4 * S + 1]
        out_ref = refs[4 * S + 2]

        z = None
        for j in range(S):
            a = jnp.maximum(xs[j][...] * ss[j][...] + ts[j][...], 0.0)
            c = jnp.dot(a, wf[j][...], preferred_element_type=jnp.float32)
            z = c if z is None else z + c
        out_ref[...] = (jnp.dot(p_ref[...], z,
                                preferred_element_type=jnp.float32)
                        + b_ref[...])

    return kernel


# ----------------------------------------------------------------------------
# Pallas wrappers
# ----------------------------------------------------------------------------

def pallas_matmul_stats(a, w):
    """(a @ w, (2, N) column sum / sum-of-squares).  a, w are bf16."""
    m, k = a.shape
    n = w.shape[1]
    if m <= _MAX_SINGLE_BLOCK_ROWS:
        tm, gm = m, 1
    else:
        tm = _ROW_TILE
        gm = -(-m // tm)
    mp = tm * gm
    kern = functools.partial(_mm_stats_kernel, true_m=m, tm=tm, tiled=(gm > 1))
    out, st = pl.pallas_call(
        kern,
        out_shape=(jax.ShapeDtypeStruct((mp, n), jnp.float32),
                   jax.ShapeDtypeStruct((gm, 2, n), jnp.float32)),
        grid=(gm,),
        in_specs=[pl.BlockSpec((tm, k), lambda i: (i, 0)),
                  pl.BlockSpec((k, n), lambda i: (0, 0))],
        out_specs=(pl.BlockSpec((tm, n), lambda i: (i, 0)),
                   pl.BlockSpec((1, 2, n), lambda i: (i, 0, 0))),
        compiler_params=_cparams(("parallel",)),
    )(a, w)
    out = out[:m] if mp != m else out
    st = jnp.sum(st, axis=0) if gm > 1 else st[0]
    return out, st


def pallas_ssrelu_stats(x2d, scale, shift):
    """y = relu(x*scale+shift) plus column stats of y (stem norm0/relu0)."""
    m, c = x2d.shape
    # TODO(synk): row-tile with per-tile partial stats for large spatial maps.
    out, st = pl.pallas_call(
        _ssrelu_stats_kernel,
        out_shape=(jax.ShapeDtypeStruct((m, c), jnp.float32),
                   jax.ShapeDtypeStruct((2, c), jnp.float32)),
        grid=(1,),
        in_specs=[_full_spec((m, c)), _full_spec((1, c)), _full_spec((1, c))],
        out_specs=(_full_spec((m, c)), _full_spec((2, c))),
        compiler_params=_cparams(("arbitrary",)),
    )(x2d, scale, shift)
    return out, st


def pallas_dense_layer(segments, scales, shifts, w1_segs, w2, masks, spatial_w):
    S = len(segments)
    m = segments[0].shape[0]
    growth = w2.shape[2]
    args, in_specs = [], []
    for group in (segments, scales, shifts, w1_segs):
        for arr in group:
            args.append(arr)
            in_specs.append(_full_spec(arr.shape))
    for arr in (w2, masks):
        args.append(arr)
        in_specs.append(_full_spec(arr.shape))
    out, st = pl.pallas_call(
        _make_dense_layer_kernel(S, spatial_w),
        out_shape=(jax.ShapeDtypeStruct((m, growth), jnp.float32),
                   jax.ShapeDtypeStruct((2, growth), jnp.float32)),
        grid=(1,),
        in_specs=in_specs,
        out_specs=(_full_spec((m, growth)), _full_spec((2, growth))),
        compiler_params=_cparams(("arbitrary",)),
    )(*args)
    return out, st


def pallas_transition(segments, scales, shifts, wt_segs, pool_mat):
    S = len(segments)
    mo = pool_mat.shape[0]
    cout = wt_segs[0].shape[1]
    args, in_specs = [], []
    for group in (segments, scales, shifts, wt_segs):
        for arr in group:
            args.append(arr)
            in_specs.append(_full_spec(arr.shape))
    args.append(pool_mat)
    in_specs.append(_full_spec(pool_mat.shape))
    out, st = pl.pallas_call(
        _make_transition_kernel(S),
        out_shape=(jax.ShapeDtypeStruct((mo, cout), jnp.float32),
                   jax.ShapeDtypeStruct((2, cout), jnp.float32)),
        grid=(1,),
        in_specs=in_specs,
        out_specs=(_full_spec((mo, cout)), _full_spec((2, cout))),
        compiler_params=_cparams(("arbitrary",)),
    )(*args)
    return out, st


def pallas_head(segments, scales, shifts, fc_segs, pool_mat, fc_b):
    S = len(segments)
    rows = pool_mat.shape[0]
    nc = fc_segs[0].shape[1]
    args, in_specs = [], []
    for group in (segments, scales, shifts, fc_segs):
        for arr in group:
            args.append(arr)
            in_specs.append(_full_spec(arr.shape))
    for arr in (pool_mat, fc_b):
        args.append(arr)
        in_specs.append(_full_spec(arr.shape))
    out = pl.pallas_call(
        _make_head_kernel(S),
        out_shape=jax.ShapeDtypeStruct((rows, nc), jnp.float32),
        grid=(1,),
        in_specs=in_specs,
        out_specs=_full_spec((rows, nc)),
        compiler_params=_cparams(("arbitrary",)),
    )(*args)
    return out


# ----------------------------------------------------------------------------
# Plain-JAX / numpy glue
# ----------------------------------------------------------------------------

def _bn_affine(st, m):
    """Training-mode batch-norm affine (gamma=1, beta=0) from (2, C) stats."""
    mean = st[0] / m
    var = jnp.maximum(st[1] / m - mean * mean, 0.0)     # biased variance
    scale = lax.rsqrt(var + EPS)
    shift = -mean * scale
    c = st.shape[1]
    return scale.reshape(1, c), shift.reshape(1, c)


def _split_rows(w, sizes):
    segs, off = [], 0
    for s in sizes:
        segs.append(w[off:off + s])
        off += s
    return segs


def _im2col(xp, kh, kw, stride):
    """xp already spatially padded. Returns (N*Ho*Wo, kh*kw*C), Ho, Wo."""
    n, hp, wp, c = xp.shape
    ho = (hp - kh) // stride + 1
    wo = (wp - kw) // stride + 1
    cols = []
    for di in range(kh):
        for dj in range(kw):
            cols.append(xp[:, di:di + stride * ho:stride,
                           dj:dj + stride * wo:stride, :])
    patches = jnp.concatenate(cols, axis=-1)
    return patches.reshape(n * ho * wo, kh * kw * c), ho, wo


def maxpool_nhwc(x, k, stride, pad):
    # PyTorch MaxPool2d effectively pads with -inf.
    return lax.reduce_window(x, -jnp.inf, lax.max,
                             (1, k, k, 1), (1, stride, stride, 1),
                             [(0, 0), (pad, pad), (pad, pad), (0, 0)])


def _tap_masks(n, h, w):
    """(n*h*w, 9) f32 validity of tap (dy,dx) per output row (zero padding)."""
    m = n * h * w
    r = np.arange(m)
    y = (r % (h * w)) // w
    x = r % w
    cols = []
    for dy in (-1, 0, 1):
        for dx in (-1, 0, 1):
            valid = ((y + dy >= 0) & (y + dy < h)
                     & (x + dx >= 0) & (x + dx < w))
            cols.append(valid.astype(np.float32))
    return jnp.asarray(np.stack(cols, axis=1))


def _avgpool_matrix(n, h, w):
    """(n*(h//2)*(w//2), n*h*w) AvgPool2d(2,2) as a matmul (MXU)."""
    ho, wo = h // 2, w // 2
    P = np.zeros((n * ho * wo, n * h * w), np.float32)
    for img in range(n):
        for yo in range(ho):
            for xo in range(wo):
                ro = (img * ho + yo) * wo + xo
                for a in (0, 1):
                    for b in (0, 1):
                        ri = (img * h + 2 * yo + a) * w + 2 * xo + b
                        P[ro, ri] = 0.25
    return jnp.asarray(P)


def _global_pool_matrix(n, h, w, rows):
    """(rows, n*h*w) adaptive_avg_pool2d((1,1)) as a matmul."""
    P = np.zeros((rows, n * h * w), np.float32)
    for img in range(n):
        P[img, img * h * w:(img + 1) * h * w] = 1.0 / (h * w)
    return jnp.asarray(P)


# ----------------------------------------------------------------------------
# DenseNet definition (small synthetic config), deterministic weights
# ----------------------------------------------------------------------------

GROWTH_RATE = 8
BLOCK_CONFIG = (2, 2)
NUM_INIT_FEATURES = 16
BN_SIZE = 2
NUM_CLASSES = 6
IN_CHANNELS = 4
# drop_rate = 0 -> F.dropout is a no-op; op_threshs = None -> sigmoid/op_norm
# branch is skipped, matching the module defaults.


def _kaiming_conv(key, kh, kw, cin, cout):
    fan_in = kh * kw * cin
    std = (2.0 / fan_in) ** 0.5
    return jax.random.normal(key, (kh, kw, cin, cout), jnp.float32) * std


def init_params(key):
    params = {}
    keys = iter(jax.random.split(key, 64))
    params['conv0'] = _kaiming_conv(next(keys), 7, 7, IN_CHANNELS,
                                    NUM_INIT_FEATURES)
    num_features = NUM_INIT_FEATURES
    for bi, num_layers in enumerate(BLOCK_CONFIG):
        for li in range(num_layers):
            cin = num_features + li * GROWTH_RATE
            mid = BN_SIZE * GROWTH_RATE
            params[f'b{bi}_l{li}_conv1'] = _kaiming_conv(next(keys), 1, 1,
                                                         cin, mid)
            params[f'b{bi}_l{li}_conv2'] = _kaiming_conv(next(keys), 3, 3,
                                                         mid, GROWTH_RATE)
        num_features = num_features + num_layers * GROWTH_RATE
        if bi != len(BLOCK_CONFIG) - 1:
            params[f'trans{bi}'] = _kaiming_conv(next(keys), 1, 1,
                                                 num_features,
                                                 num_features // 2)
            num_features = num_features // 2
    params['fc_w'] = jax.random.normal(next(keys),
                                       (num_features, NUM_CLASSES),
                                       jnp.float32) * (1.0 / num_features ** 0.5)
    params['fc_b'] = jnp.zeros((NUM_CLASSES,), jnp.float32)
    return params


# ----------------------------------------------------------------------------
# Forward pass
# ----------------------------------------------------------------------------

def densenet_forward(params, x_nchw):
    # NCHW (PyTorch) -> NHWC
    x = jnp.transpose(x_nchw.astype(jnp.float32), (0, 2, 3, 1))
    n = x.shape[0]

    # --- stem: conv0 (stats fused) -> pool0 -> deferred norm0+relu0 ---------
    w0 = params['conv0']
    kh, kw, cin, c0 = w0.shape
    xp = jnp.pad(x, ((0, 0), (3, 3), (3, 3), (0, 0)))
    cols, ho, wo = _im2col(xp, kh, kw, 2)
    y2d, st0 = pallas_matmul_stats(
        cols.astype(jnp.bfloat16),
        w0.reshape(kh * kw * cin, c0).astype(jnp.bfloat16))
    scale0, shift0 = _bn_affine(st0, n * ho * wo)   # norm0 stats are pre-pool
    y = y2d.reshape(n, ho, wo, c0)
    # BN (positive scale) + ReLU are monotone per channel, so they commute
    # with max-pooling: pool the raw conv0 output, apply norm0+relu0 once on
    # the 4x smaller pooled map (stats of the result feed the dense block).
    p = maxpool_nhwc(y, 3, 2, 1)
    cur_h, cur_w = p.shape[1], p.shape[2]
    m = n * cur_h * cur_w
    x_blk, st_blk = pallas_ssrelu_stats(p.reshape(m, c0), scale0, shift0)

    segments = [x_blk]          # dense-block features as per-layer segments
    seg_stats = [st_blk]        # per-segment (2, C) column stats
    seg_channels = [c0]

    # --- dense blocks + transitions ------------------------------------------
    for bi, num_layers in enumerate(BLOCK_CONFIG):
        masks = _tap_masks(n, cur_h, cur_w)
        for li in range(num_layers):
            w1 = params[f'b{bi}_l{li}_conv1']          # (1,1,cin,mid)
            w2 = params[f'b{bi}_l{li}_conv2']          # (3,3,mid,growth)
            mid, growth = w1.shape[3], w2.shape[3]
            scales, shifts = [], []
            for st in seg_stats:
                sc, sh = _bn_affine(st, m)
                scales.append(sc)
                shifts.append(sh)
            w1_segs = [s.astype(jnp.bfloat16) for s in _split_rows(
                w1.reshape(sum(seg_channels), mid), seg_channels)]
            w2r = w2.reshape(9, mid, growth).astype(jnp.bfloat16)
            h_new, st_new = pallas_dense_layer(
                segments, scales, shifts, w1_segs, w2r, masks, cur_w)
            segments.append(h_new)
            seg_stats.append(st_new)
            seg_channels.append(growth)

        if bi != len(BLOCK_CONFIG) - 1:
            wt = params[f'trans{bi}']                  # (1,1,Ctot,Ctot//2)
            ctot = sum(seg_channels)
            cout = ctot // 2
            scales, shifts = [], []
            for st in seg_stats:
                sc, sh = _bn_affine(st, m)
                scales.append(sc)
                shifts.append(sh)
            wt_segs = [s.astype(jnp.bfloat16) for s in _split_rows(
                wt.reshape(ctot, cout), seg_channels)]
            pool_mat = _avgpool_matrix(n, cur_h, cur_w)
            pooled, st_p = pallas_transition(segments, scales, shifts,
                                             wt_segs, pool_mat)
            cur_h //= 2
            cur_w //= 2
            m = n * cur_h * cur_w
            segments, seg_stats, seg_channels = [pooled], [st_p], [cout]

    # --- norm5 + ReLU + adaptive_avg_pool2d(1,1) + classifier (one kernel) ---
    scales, shifts = [], []
    for st in seg_stats:
        sc, sh = _bn_affine(st, m)
        scales.append(sc)
        shifts.append(sh)
    fc_segs = _split_rows(params['fc_w'], seg_channels)
    rows = max(8, n)
    pool_mat = _global_pool_matrix(n, cur_h, cur_w, rows)
    out = pallas_head(segments, scales, shifts, fc_segs, pool_mat,
                      params['fc_b'].reshape(1, -1))
    # op_threshs is None -> no sigmoid / op_norm (module default).
    return out[:n]


# ----------------------------------------------------------------------------
# Main
# ----------------------------------------------------------------------------

if __name__ == "__main__":
    key = jax.random.PRNGKey(0)
    k_params, k_input = jax.random.split(key)
    params = init_params(k_params)
    x = jax.random.normal(k_input, (2, IN_CHANNELS, 16, 16), jnp.float32)

    fwd = jax.jit(functools.partial(densenet_forward, params))
    out = fwd(x)
    out = jax.block_until_ready(out)
    assert out.shape == (2, NUM_CLASSES)
    assert bool(jnp.all(jnp.isfinite(out)))
    print("KERNEL_OK")
</pallas_src>

<mosaic_0001>
module attributes {stable_mosaic.version = 11 : i64} {
  func.func @_mm_stats_kernel(%arg0: i32, %arg1: memref<128x196xbf16, #tpu.memory_space<vmem>>, %arg2: memref<196x16xbf16, #tpu.memory_space<vmem>>, %arg3: memref<128x16xf32, #tpu.memory_space<vmem>>, %arg4: memref<1x2x16xf32, #tpu.memory_space<vmem>>) attributes {dimension_semantics = [#tpu.dimension_semantics<parallel>], iteration_bounds = array<i64: 1>, scalar_prefetch = 0 : i64, scratch_operands = 0 : i64, tpu.core_type = #tpu.core_type<tc>, window_params = [{transform_indices = @transform_0, window_bounds = array<i64: 128, 196>}, {pipeline_mode = #tpu.pipeline_mode<synchronous>, transform_indices = @transform_1, window_bounds = array<i64: 196, 16>}, {transform_indices = @transform_2, window_bounds = array<i64: 128, 16>}, {transform_indices = @transform_3, window_bounds = array<i64: 1, 2, 16>}]} {
    %c0 = arith.constant 0 : index
    %c0_0 = arith.constant 0 : index
    %0 = vector.load %arg1[%c0, %c0_0] : memref<128x196xbf16, #tpu.memory_space<vmem>>, vector<128x196xbf16>
    %c0_1 = arith.constant 0 : index
    %c0_2 = arith.constant 0 : index
    %1 = vector.load %arg2[%c0_1, %c0_2] : memref<196x16xbf16, #tpu.memory_space<vmem>>, vector<196x16xbf16>
    %cst = arith.constant dense<0.000000e+00> : vector<128x16xf32>
    %2 = tpu.matmul %0, %1, %cst {dimension_numbers = #tpu.dot_dimension_numbers<[1], [0], [0], [1], [0, 0, 1, 1], [], []>} : vector<128x196xbf16>, vector<196x16xbf16>, vector<128x16xf32> -> vector<128x16xf32>
    %c0_3 = arith.constant 0 : index
    %c0_4 = arith.constant 0 : index
    %3 = vector.load %arg3[%c0_3, %c0_4] : memref<128x16xf32, #tpu.memory_space<vmem>>, vector<128x16xf32>
    tpu.vector_store %arg3[%c0_3, %c0_4], %2 {strides = array<i32>} : memref<128x16xf32, #tpu.memory_space<vmem>>, vector<128x16xf32>,
    %cst_5 = arith.constant dense<0.000000e+00> : vector<16xf32>
    %4 = vector.multi_reduction <add>, %2, %cst_5 [0] : vector<128x16xf32> to vector<16xf32>
    %5 = vector.shape_cast %4 : vector<16xf32> to vector<1x16xf32>
    %6 = arith.mulf %2, %2 : vector<128x16xf32>
    %cst_6 = arith.constant dense<0.000000e+00> : vector<16xf32>
    %7 = vector.multi_reduction <add>, %6, %cst_6 [0] : vector<128x16xf32> to vector<16xf32>
    %8 = vector.shape_cast %7 : vector<16xf32> to vector<1x16xf32>
    %9 = tpu.concatenate %5, %8 in 0 : vector<1x16xf32>, vector<1x16xf32> -> vector<2x16xf32>
    %10 = vector.shape_cast %9 : vector<2x16xf32> to vector<1x2x16xf32>
    %c0_7 = arith.constant 0 : index
    %c0_8 = arith.constant 0 : index
    %c0_9 = arith.constant 0 : index
    %11 = vector.load %arg4[%c0_7, %c0_8, %c0_9] : memref<1x2x16xf32, #tpu.memory_space<vmem>>, vector<1x2x16xf32>
    tpu.vector_store %arg4[%c0_7, %c0_8, %c0_9], %10 {strides = array<i32>} : memref<1x2x16xf32, #tpu.memory_space<vmem>>, vector<1x2x16xf32>,
    return
  }
  func.func @transform_0(%arg0: i32) -> (i32, i32) {
    %c0_i32 = arith.constant 0 : i32
    %c0_i32_0 = arith.constant 0 : i32
    return %arg0, %c0_i32 : i32, i32
  }
  func.func @transform_1(%arg0: i32) -> (i32, i32) {
    %c0_i32 = arith.constant 0 : i32
    %c0_i32_0 = arith.constant 0 : i32
    %c0_i32_1 = arith.constant 0 : i32
    return %c0_i32, %c0_i32_0 : i32, i32
  }
  func.func @transform_2(%arg0: i32) -> (i32, i32) {
    %c0_i32 = arith.constant 0 : i32
    %c0_i32_0 = arith.constant 0 : i32
    return %arg0, %c0_i32 : i32, i32
  }
  func.func @transform_3(%arg0: i32) -> (i32, i32, i32) {
    %c0_i32 = arith.constant 0 : i32
    %c0_i32_0 = arith.constant 0 : i32
    %c0_i32_1 = arith.constant 0 : i32
    return %arg0, %c0_i32, %c0_i32_0 : i32, i32, i32
  }
}

module attributes {stable_mosaic.version = 11 : i64} {
  func.func @_ssrelu_stats_kernel(%arg0: i32, %arg1: memref<32x16xf32, #tpu.memory_space<vmem>>, %arg2: memref<1x16xf32, #tpu.memory_space<vmem>>, %arg3: memref<1x16xf32, #tpu.memory_space<vmem>>, %arg4: memref<32x16xf32, #tpu.memory_space<vmem>>, %arg5: memref<2x16xf32, #tpu.memory_space<vmem>>) attributes {dimension_semantics = [#tpu.dimension_semantics<arbitrary>], iteration_bounds = array<i64: 1>, scalar_prefetch = 0 : i64, scratch_operands = 0 : i64, tpu.core_type = #tpu.core_type<tc>, window_params = [{pipeline_mode = #tpu.pipeline_mode<synchronous>, transform_indices = @transform_0, window_bounds = array<i64: 32, 16>}, {pipeline_mode = #tpu.pipeline_mode<synchronous>, transform_indices = @transform_1, window_bounds = array<i64: 1, 16>}, {pipeline_mode = #tpu.pipeline_mode<synchronous>, transform_indices = @transform_2, window_bounds = array<i64: 1, 16>}, {pipeline_mode = #tpu.pipeline_mode<synchronous>, transform_indices = @transform_3, window_bounds = array<i64: 32, 16>}, {pipeline_mode = #tpu.pipeline_mode<synchronous>, transform_indices = @transform_4, window_bounds = array<i64: 2, 16>}]} {
    %c0 = arith.constant 0 : index
    %c0_0 = arith.constant 0 : index
    %0 = vector.load %arg1[%c0, %c0_0] : memref<32x16xf32, #tpu.memory_space<vmem>>, vector<32x16xf32>
    %c0_1 = arith.constant 0 : index
    %c0_2 = arith.constant 0 : index
    %1 = vector.load %arg2[%c0_1, %c0_2] : memref<1x16xf32, #tpu.memory_space<vmem>>, vector<1x16xf32>
    %2 = vector.broadcast %1 : vector<1x16xf32> to vector<32x16xf32>
    %3 = arith.mulf %0, %2 : vector<32x16xf32>
    %c0_3 = arith.constant 0 : index
    %c0_4 = arith.constant 0 : index
    %4 = vector.load %arg3[%c0_3, %c0_4] : memref<1x16xf32, #tpu.memory_space<vmem>>, vector<1x16xf32>
    %5 = vector.broadcast %4 : vector<1x16xf32> to vector<32x16xf32>
    %6 = arith.addf %3, %5 : vector<32x16xf32>
    %cst = arith.constant 0.000000e+00 : f32
    %7 = vector.broadcast %cst : f32 to vector<32x16xf32>
    %8 = arith.maximumf %6, %7 : vector<32x16xf32>
    %c0_5 = arith.constant 0 : index
    %c0_6 = arith.constant 0 : index
    %9 = vector.load %arg4[%c0_5, %c0_6] : memref<32x16xf32, #tpu.memory_space<vmem>>, vector<32x16xf32>
    tpu.vector_store %arg4[%c0_5, %c0_6], %8 {strides = array<i32>} : memref<32x16xf32, #tpu.memory_space<vmem>>, vector<32x16xf32>,
    %cst_7 = arith.constant dense<0.000000e+00> : vector<16xf32>
    %10 = vector.multi_reduction <add>, %8, %cst_7 [0] : vector<32x16xf32> to vector<16xf32>
    %11 = vector.shape_cast %10 : vector<16xf32> to vector<1x16xf32>
    %12 = arith.mulf %8, %8 : vector<32x16xf32>
    %cst_8 = arith.constant dense<0.000000e+00> : vector<16xf32>
    %13 = vector.multi_reduction <add>, %12, %cst_8 [0] : vector<32x16xf32> to vector<16xf32>
    %14 = vector.shape_cast %13 : vector<16xf32> to vector<1x16xf32>
    %15 = tpu.concatenate %11, %14 in 0 : vector<1x16xf32>, vector<1x16xf32> -> vector<2x16xf32>
    %c0_9 = arith.constant 0 : index
    %c0_10 = arith.constant 0 : index
    %16 = vector.load %arg5[%c0_9, %c0_10] : memref<2x16xf32, #tpu.memory_space<vmem>>, vector<2x16xf32>
    tpu.vector_store %arg5[%c0_9, %c0_10], %15 {strides = array<i32>} : memref<2x16xf32, #tpu.memory_space<vmem>>, vector<2x16xf32>,
    return
  }
  func.func @transform_0(%arg0: i32) -> (i32, i32) {
    %c0_i32 = arith.constant 0 : i32
    %c0_i32_0 = arith.constant 0 : i32
    %c0_i32_1 = arith.constant 0 : i32
    return %c0_i32, %c0_i32_0 : i32, i32
  }
  func.func @transform_1(%arg0: i32) -> (i32, i32) {
    %c0_i32 = arith.constant 0 : i32
    %c0_i32_0 = arith.constant 0 : i32
    %c0_i32_1 = arith.constant 0 : i32
    return %c0_i32, %c0_i32_0 : i32, i32
  }
  func.func @transform_2(%arg0: i32) -> (i32, i32) {
    %c0_i32 = arith.constant 0 : i32
    %c0_i32_0 = arith.constant 0 : i32
    %c0_i32_1 = arith.constant 0 : i32
    return %c0_i32, %c0_i32_0 : i32, i32
  }
  func.func @transform_3(%arg0: i32) -> (i32, i32) {
    %c0_i32 = arith.constant 0 : i32
    %c0_i32_0 = arith.constant 0 : i32
    %c0_i32_1 = arith.constant 0 : i32
    return %c0_i32, %c0_i32_0 : i32, i32
  }
  func.func @transform_4(%arg0: i32) -> (i32, i32) {
    %c0_i32 = arith.constant 0 : i32
    %c0_i32_0 = arith.constant 0 : i32
    %c0_i32_1 = arith.constant 0 : i32
    return %c0_i32, %c0_i32_0 : i32, i32
  }
}

module attributes {stable_mosaic.version = 11 : i64} {
  func.func @kernel(%arg0: i32, %arg1: memref<32x16xf32, #tpu.memory_space<vmem>>, %arg2: memref<1x16xf32, #tpu.memory_space<vmem>>, %arg3: memref<1x16xf32, #tpu.memory_space<vmem>>, %arg4: memref<16x16xbf16, #tpu.memory_space<vmem>>, %arg5: memref<9x16x8xbf16, #tpu.memory_space<vmem>>, %arg6: memref<32x9xf32, #tpu.memory_space<vmem>>, %arg7: memref<32x8xf32, #tpu.memory_space<vmem>>, %arg8: memref<2x8xf32, #tpu.memory_space<vmem>>) attributes {dimension_semantics = [#tpu.dimension_semantics<arbitrary>], iteration_bounds = array<i64: 1>, scalar_prefetch = 0 : i64, scratch_operands = 0 : i64, tpu.core_type = #tpu.core_type<tc>, window_params = [{pipeline_mode = #tpu.pipeline_mode<synchronous>, transform_indices = @transform_0, window_bounds = array<i64: 32, 16>}, {pipeline_mode = #tpu.pipeline_mode<synchronous>, transform_indices = @transform_1, window_bounds = array<i64: 1, 16>}, {pipeline_mode = #tpu.pipeline_mode<synchronous>, transform_indices = @transform_2, window_bounds = array<i64: 1, 16>}, {pipeline_mode = #tpu.pipeline_mode<synchronous>, transform_indices = @transform_3, window_bounds = array<i64: 16, 16>}, {pipeline_mode = #tpu.pipeline_mode<synchronous>, transform_indices = @transform_4, window_bounds = array<i64: 9, 16, 8>}, {pipeline_mode = #tpu.pipeline_mode<synchronous>, transform_indices = @transform_5, window_bounds = array<i64: 32, 9>}, {pipeline_mode = #tpu.pipeline_mode<synchronous>, transform_indices = @transform_6, window_bounds = array<i64: 32, 8>}, {pipeline_mode = #tpu.pipeline_mode<synchronous>, transform_indices = @transform_7, window_bounds = array<i64: 2, 8>}]} {
    %c0 = arith.constant 0 : index
    %c0_0 = arith.constant 0 : index
    %0 = vector.load %arg1[%c0, %c0_0] : memref<32x16xf32, #tpu.memory_space<vmem>>, vector<32x16xf32>
    %c0_1 = arith.constant 0 : index
    %c0_2 = arith.constant 0 : index
    %1 = vector.load %arg2[%c0_1, %c0_2] : memref<1x16xf32, #tpu.memory_space<vmem>>, vector<1x16xf32>
    %2 = vector.broadcast %1 : vector<1x16xf32> to vector<32x16xf32>
    %3 = arith.mulf %0, %2 : vector<32x16xf32>
    %c0_3 = arith.constant 0 : index
    %c0_4 = arith.constant 0 : index
    %4 = vector.load %arg3[%c0_3, %c0_4] : memref<1x16xf32, #tpu.memory_space<vmem>>, vector<1x16xf32>
    %5 = vector.broadcast %4 : vector<1x16xf32> to vector<32x16xf32>
    %6 = arith.addf %3, %5 : vector<32x16xf32>
    %cst = arith.constant 0.000000e+00 : f32
    %7 = vector.broadcast %cst : f32 to vector<32x16xf32>
    %8 = arith.maximumf %6, %7 : vector<32x16xf32>
    %9 = arith.truncf %8 : vector<32x16xf32> to vector<32x16xbf16>
    %c0_5 = arith.constant 0 : index
    %c0_6 = arith.constant 0 : index
    %10 = vector.load %arg4[%c0_5, %c0_6] : memref<16x16xbf16, #tpu.memory_space<vmem>>, vector<16x16xbf16>
    %cst_7 = arith.constant dense<0.000000e+00> : vector<32x16xf32>
    %11 = tpu.matmul %9, %10, %cst_7 {dimension_numbers = #tpu.dot_dimension_numbers<[1], [0], [0], [1], [0, 0, 1, 1], [], []>} : vector<32x16xbf16>, vector<16x16xbf16>, vector<32x16xf32> -> vector<32x16xf32>
    %cst_8 = arith.constant dense<0.000000e+00> : vector<16xf32>
    %12 = vector.multi_reduction <add>, %11, %cst_8 [0] : vector<32x16xf32> to vector<16xf32>
    %13 = vector.shape_cast %12 : vector<16xf32> to vector<1x16xf32>
    %cst_9 = arith.constant 3.125000e-02 : f32
    %14 = vector.broadcast %cst_9 : f32 to vector<1x16xf32>
    %15 = arith.mulf %13, %14 : vector<1x16xf32>
    %16 = arith.mulf %11, %11 : vector<32x16xf32>
    %cst_10 = arith.constant dense<0.000000e+00> : vector<16xf32>
    %17 = vector.multi_reduction <add>, %16, %cst_10 [0] : vector<32x16xf32> to vector<16xf32>
    %18 = vector.shape_cast %17 : vector<16xf32> to vector<1x16xf32>
    %cst_11 = arith.constant 3.125000e-02 : f32
    %19 = vector.broadcast %cst_11 : f32 to vector<1x16xf32>
    %20 = arith.mulf %18, %19 : vector<1x16xf32>
    %21 = arith.mulf %15, %15 : vector<1x16xf32>
    %22 = arith.subf %20, %21 : vector<1x16xf32>
    %cst_12 = arith.constant 0.000000e+00 : f32
    %23 = vector.broadcast %cst_12 : f32 to vector<1x16xf32>
    %24 = arith.maximumf %22, %23 : vector<1x16xf32>
    %25 = vector.broadcast %15 : vector<1x16xf32> to vector<32x16xf32>
    %26 = arith.subf %11, %25 : vector<32x16xf32>
    %cst_13 = arith.constant 9.99999974E-6 : f32
    %27 = vector.broadcast %cst_13 : f32 to vector<1x16xf32>
    %28 = arith.addf %24, %27 : vector<1x16xf32>
    %29 = math.rsqrt %28 : vector<1x16xf32>
    %30 = vector.broadcast %29 : vector<1x16xf32> to vector<32x16xf32>
    %31 = arith.mulf %26, %30 : vector<32x16xf32>
    %cst_14 = arith.constant 0.000000e+00 : f32
    %32 = vector.broadcast %cst_14 : f32 to vector<32x16xf32>
    %33 = arith.maximumf %31, %32 : vector<32x16xf32>
    %34 = vector.extract_strided_slice %33 {offsets = [27, 0], sizes = [5, 16], strides = [1, 1]} : vector<32x16xf32> to vector<5x16xf32>
    %35 = vector.extract_strided_slice %33 {offsets = [0, 0], sizes = [27, 16], strides = [1, 1]} : vector<32x16xf32> to vector<27x16xf32>
    %36 = tpu.concatenate %34, %35 in 0 : vector<5x16xf32>, vector<27x16xf32> -> vector<32x16xf32>
    %c0_15 = arith.constant 0 : index
    %c0_16 = arith.constant 0 : index
    %37 = vector.load %arg6[%c0_15, %c0_16] : memref<32x9xf32, #tpu.memory_space<vmem>>, vector<32x1xf32>
    %38 = vector.broadcast %37 : vector<32x1xf32> to vector<32x16xf32>
    %39 = arith.mulf %36, %38 : vector<32x16xf32>
    %40 = arith.truncf %39 : vector<32x16xf32> to vector<32x16xbf16>
    %c0_17 = arith.constant 0 : index
    %c0_18 = arith.constant 0 : index
    %c0_19 = arith.constant 0 : index
    %41 = vector.load %arg5[%c0_17, %c0_18, %c0_19] : memref<9x16x8xbf16, #tpu.memory_space<vmem>>, vector<1x16x8xbf16>
    %42 = vector.shape_cast %41 : vector<1x16x8xbf16> to vector<16x8xbf16>
    %cst_20 = arith.constant dense<0.000000e+00> : vector<32x8xf32>
    %43 = tpu.matmul %40, %42, %cst_20 {dimension_numbers = #tpu.dot_dimension_numbers<[1], [0], [0], [1], [0, 0, 1, 1], [], []>} : vector<32x16xbf16>, vector<16x8xbf16>, vector<32x8xf32> -> vector<32x8xf32>
    %44 = vector.extract_strided_slice %33 {offsets = [28, 0], sizes = [4, 16], strides = [1, 1]} : vector<32x16xf32> to vector<4x16xf32>
    %45 = vector.extract_strided_slice %33 {offsets = [0, 0], sizes = [28, 16], strides = [1, 1]} : vector<32x16xf32> to vector<28x16xf32>
    %46 = tpu.concatenate %44, %45 in 0 : vector<4x16xf32>, vector<28x16xf32> -> vector<32x16xf32>
    %c0_21 = arith.constant 0 : index
    %c1 = arith.constant 1 : index
    %47 = vector.load %arg6[%c0_21, %c1] : memref<32x9xf32, #tpu.memory_space<vmem>>, vector<32x1xf32>
    %48 = vector.broadcast %47 : vector<32x1xf32> to vector<32x16xf32>
    %49 = arith.mulf %46, %48 : vector<32x16xf32>
    %50 = arith.truncf %49 : vector<32x16xf32> to vector<32x16xbf16>
    %c1_22 = arith.constant 1 : index
    %c0_23 = arith.constant 0 : index
    %c0_24 = arith.constant 0 : index
    %51 = vector.load %arg5[%c1_22, %c0_23, %c0_24] : memref<9x16x8xbf16, #tpu.memory_space<vmem>>, vector<1x16x8xbf16>
    %52 = vector.shape_cast %51 : vector<1x16x8xbf16> to vector<16x8xbf16>
    %cst_25 = arith.constant dense<0.000000e+00> : vector<32x8xf32>
    %53 = tpu.matmul %50, %52, %cst_25 {dimension_numbers = #tpu.dot_dimension_numbers<[1], [0], [0], [1], [0, 0, 1, 1], [], []>} : vector<32x16xbf16>, vector<16x8xbf16>, vector<32x8xf32> -> vector<32x8xf32>
    %54 = arith.addf %43, %53 : vector<32x8xf32>
    %55 = vector.extract_strided_slice %33 {offsets = [29, 0], sizes = [3, 16], strides = [1, 1]} : vector<32x16xf32> to vector<3x16xf32>
    %56 = vector.extract_strided_slice %33 {offsets = [0, 0], sizes = [29, 16], strides = [1, 1]} : vector<32x16xf32> to vector<29x16xf32>
    %57 = tpu.concatenate %55, %56 in 0 : vector<3x16xf32>, vector<29x16xf32> -> vector<32x16xf32>
    %c0_26 = arith.constant 0 : index
    %c2 = arith.constant 2 : index
    %58 = vector.load %arg6[%c0_26, %c2] : memref<32x9xf32, #tpu.memory_space<vmem>>, vector<32x1xf32>
    %59 = vector.broadcast %58 : vector<32x1xf32> to vector<32x16xf32>
    %60 = arith.mulf %57, %59 : vector<32x16xf32>
    %61 = arith.truncf %60 : vector<32x16xf32> to vector<32x16xbf16>
    %c2_27 = arith.constant 2 : index
    %c0_28 = arith.constant 0 : index
    %c0_29 = arith.constant 0 : index
    %62 = vector.load %arg5[%c2_27, %c0_28, %c0_29] : memref<9x16x8xbf16, #tpu.memory_space<vmem>>, vector<1x16x8xbf16>
    %63 = vector.shape_cast %62 : vector<1x16x8xbf16> to vector<16x8xbf16>
    %cst_30 = arith.constant dense<0.000000e+00> : vector<32x8xf32>
    %64 = tpu.matmul %61, %63, %cst_30 {dimension_numbers = #tpu.dot_dimension_numbers<[1], [0], [0], [1], [0, 0, 1, 1], [], []>} : vector<32x16xbf16>, vector<16x8xbf16>, vector<32x8xf32> -> vector<32x8xf32>
    %65 = arith.addf %54, %64 : vector<32x8xf32>
    %66 = vector.extract_strided_slice %33 {offsets = [31, 0], sizes = [1, 16], strides = [1, 1]} : vector<32x16xf32> to vector<1x16xf32>
    %67 = vector.extract_strided_slice %33 {offsets = [0, 0], sizes = [31, 16], strides = [1, 1]} : vector<32x16xf32> to vector<31x16xf32>
    %68 = tpu.concatenate %66, %67 in 0 : vector<1x16xf32>, vector<31x16xf32> -> vector<32x16xf32>
    %c0_31 = arith.constant 0 : index
    %c3 = arith.constant 3 : index
    %69 = vector.load %arg6[%c0_31, %c3] : memref<32x9xf32, #tpu.memory_space<vmem>>, vector<32x1xf32>
    %70 = vector.broadcast %69 : vector<32x1xf32> to vector<32x16xf32>
    %71 = arith.mulf %68, %70 : vector<32x16xf32>
    %72 = arith.truncf %71 : vector<32x16xf32> to vector<32x16xbf16>
    %c3_32 = arith.constant 3 : index
    %c0_33 = arith.constant 0 : index
    %c0_34 = arith.constant 0 : index
    %73 = vector.load %arg5[%c3_32, %c0_33, %c0_34] : memref<9x16x8xbf16, #tpu.memory_space<vmem>>, vector<1x16x8xbf16>
    %74 = vector.shape_cast %73 : vector<1x16x8xbf16> to vector<16x8xbf16>
    %cst_35 = arith.constant dense<0.000000e+00> : vector<32x8xf32>
    %75 = tpu.matmul %72, %74, %cst_35 {dimension_numbers = #tpu.dot_dimension_numbers<[1], [0], [0], [1], [0, 0, 1, 1], [], []>} : vector<32x16xbf16>, vector<16x8xbf16>, vector<32x8xf32> -> vector<32x8xf32>
    %76 = arith.addf %65, %75 : vector<32x8xf32>
    %c0_36 = arith.constant 0 : index
    %c4 = arith.constant 4 : index
    %77 = vector.load %arg6[%c0_36, %c4] : memref<32x9xf32, #tpu.memory_space<vmem>>, vector<32x1xf32>
    %78 = vector.broadcast %77 : vector<32x1xf32> to vector<32x16xf32>
    %79 = arith.mulf %33, %78 : vector<32x16xf32>
    %80 = arith.truncf %79 : vector<32x16xf32> to vector<32x16xbf16>
    %c4_37 = arith.constant 4 : index
    %c0_38 = arith.constant 0 : index
    %c0_39 = arith.constant 0 : index
    %81 = vector.load %arg5[%c4_37, %c0_38, %c0_39] : memref<9x16x8xbf16, #tpu.memory_space<vmem>>, vector<1x16x8xbf16>
    %82 = vector.shape_cast %81 : vector<1x16x8xbf16> to vector<16x8xbf16>
    %cst_40 = arith.constant dense<0.000000e+00> : vector<32x8xf32>
    %83 = tpu.matmul %80, %82, %cst_40 {dimension_numbers = #tpu.dot_dimension_numbers<[1], [0], [0], [1], [0, 0, 1, 1], [], []>} : vector<32x16xbf16>, vector<16x8xbf16>, vector<32x8xf32> -> vector<32x8xf32>
    %84 = arith.addf %76, %83 : vector<32x8xf32>
    %85 = vector.extract_strided_slice %33 {offsets = [1, 0], sizes = [31, 16], strides = [1, 1]} : vector<32x16xf32> to vector<31x16xf32>
    %86 = vector.extract_strided_slice %33 {offsets = [0, 0], sizes = [1, 16], strides = [1, 1]} : vector<32x16xf32> to vector<1x16xf32>
    %87 = tpu.concatenate %85, %86 in 0 : vector<31x16xf32>, vector<1x16xf32> -> vector<32x16xf32>
    %c0_41 = arith.constant 0 : index
    %c5 = arith.constant 5 : index
    %88 = vector.load %arg6[%c0_41, %c5] : memref<32x9xf32, #tpu.memory_space<vmem>>, vector<32x1xf32>
    %89 = vector.broadcast %88 : vector<32x1xf32> to vector<32x16xf32>
    %90 = arith.mulf %87, %89 : vector<32x16xf32>
    %91 = arith.truncf %90 : vector<32x16xf32> to vector<32x16xbf16>
    %c5_42 = arith.constant 5 : index
    %c0_43 = arith.constant 0 : index
    %c0_44 = arith.constant 0 : index
    %92 = vector.load %arg5[%c5_42, %c0_43, %c0_44] : memref<9x16x8xbf16, #tpu.memory_space<vmem>>, vector<1x16x8xbf16>
    %93 = vector.shape_cast %92 : vector<1x16x8xbf16> to vector<16x8xbf16>
    %cst_45 = arith.constant dense<0.000000e+00> : vector<32x8xf32>
    %94 = tpu.matmul %91, %93, %cst_45 {dimension_numbers = #tpu.dot_dimension_numbers<[1], [0], [0], [1], [0, 0, 1, 1], [], []>} : vector<32x16xbf16>, vector<16x8xbf16>, vector<32x8xf32> -> vector<32x8xf32>
    %95 = arith.addf %84, %94 : vector<32x8xf32>
    %96 = vector.extract_strided_slice %33 {offsets = [3, 0], sizes = [29, 16], strides = [1, 1]} : vector<32x16xf32> to vector<29x16xf32>
    %97 = vector.extract_strided_slice %33 {offsets = [0, 0], sizes = [3, 16], strides = [1, 1]} : vector<32x16xf32> to vector<3x16xf32>
    %98 = tpu.concatenate %96, %97 in 0 : vector<29x16xf32>, vector<3x16xf32> -> vector<32x16xf32>
    %c0_46 = arith.constant 0 : index
    %c6 = arith.constant 6 : index
    %99 = vector.load %arg6[%c0_46, %c6] : memref<32x9xf32, #tpu.memory_space<vmem>>, vector<32x1xf32>
    %100 = vector.broadcast %99 : vector<32x1xf32> to vector<32x16xf32>
    %101 = arith.mulf %98, %100 : vector<32x16xf32>
    %102 = arith.truncf %101 : vector<32x16xf32> to vector<32x16xbf16>
    %c6_47 = arith.constant 6 : index
    %c0_48 = arith.constant 0 : index
    %c0_49 = arith.constant 0 : index
    %103 = vector.load %arg5[%c6_47, %c0_48, %c0_49] : memref<9x16x8xbf16, #tpu.memory_space<vmem>>, vector<1x16x8xbf16>
    %104 = vector.shape_cast %103 : vector<1x16x8xbf16> to vector<16x8xbf16>
    %cst_50 = arith.constant dense<0.000000e+00> : vector<32x8xf32>
    %105 = tpu.matmul %102, %104, %cst_50 {dimension_numbers = #tpu.dot_dimension_numbers<[1], [0], [0], [1], [0, 0, 1, 1], [], []>} : vector<32x16xbf16>, vector<16x8xbf16>, vector<32x8xf32> -> vector<32x8xf32>
    %106 = arith.addf %95, %105 : vector<32x8xf32>
    %107 = vector.extract_strided_slice %33 {offsets = [4, 0], sizes = [28, 16], strides = [1, 1]} : vector<32x16xf32> to vector<28x16xf32>
    %108 = vector.extract_strided_slice %33 {offsets = [0, 0], sizes = [4, 16], strides = [1, 1]} : vector<32x16xf32> to vector<4x16xf32>
    %109 = tpu.concatenate %107, %108 in 0 : vector<28x16xf32>, vector<4x16xf32> -> vector<32x16xf32>
    %c0_51 = arith.constant 0 : index
    %c7 = arith.constant 7 : index
    %110 = vector.load %arg6[%c0_51, %c7] : memref<32x9xf32, #tpu.memory_space<vmem>>, vector<32x1xf32>
    %111 = vector.broadcast %110 : vector<32x1xf32> to vector<32x16xf32>
    %112 = arith.mulf %109, %111 : vector<32x16xf32>
    %113 = arith.truncf %112 : vector<32x16xf32> to vector<32x16xbf16>
    %c7_52 = arith.constant 7 : index
    %c0_53 = arith.constant 0 : index
    %c0_54 = arith.constant 0 : index
    %114 = vector.load %arg5[%c7_52, %c0_53, %c0_54] : memref<9x16x8xbf16, #tpu.memory_space<vmem>>, vector<1x16x8xbf16>
    %115 = vector.shape_cast %114 : vector<1x16x8xbf16> to vector<16x8xbf16>
    %cst_55 = arith.constant dense<0.000000e+00> : vector<32x8xf32>
    %116 = tpu.matmul %113, %115, %cst_55 {dimension_numbers = #tpu.dot_dimension_numbers<[1], [0], [0], [1], [0, 0, 1, 1], [], []>} : vector<32x16xbf16>, vector<16x8xbf16>, vector<32x8xf32> -> vector<32x8xf32>
    %117 = arith.addf %106, %116 : vector<32x8xf32>
    %118 = vector.extract_strided_slice %33 {offsets = [5, 0], sizes = [27, 16], strides = [1, 1]} : vector<32x16xf32> to vector<27x16xf32>
    %119 = vector.extract_strided_slice %33 {offsets = [0, 0], sizes = [5, 16], strides = [1, 1]} : vector<32x16xf32> to vector<5x16xf32>
    %120 = tpu.concatenate %118, %119 in 0 : vector<27x16xf32>, vector<5x16xf32> -> vector<32x16xf32>
    %c0_56 = arith.constant 0 : index
    %c8 = arith.constant 8 : index
    %121 = vector.load %arg6[%c0_56, %c8] : memref<32x9xf32, #tpu.memory_space<vmem>>, vector<32x1xf32>
    %122 = vector.broadcast %121 : vector<32x1xf32> to vector<32x16xf32>
    %123 = arith.mulf %120, %122 : vector<32x16xf32>
    %124 = arith.truncf %123 : vector<32x16xf32> to vector<32x16xbf16>
    %c8_57 = arith.constant 8 : index
    %c0_58 = arith.constant 0 : index
    %c0_59 = arith.constant 0 : index
    %125 = vector.load %arg5[%c8_57, %c0_58, %c0_59] : memref<9x16x8xbf16, #tpu.memory_space<vmem>>, vector<1x16x8xbf16>
    %126 = vector.shape_cast %125 : vector<1x16x8xbf16> to vector<16x8xbf16>
    %cst_60 = arith.constant dense<0.000000e+00> : vector<32x8xf32>
    %127 = tpu.matmul %124, %126, %cst_60 {dimension_numbers = #tpu.dot_dimension_numbers<[1], [0], [0], [1], [0, 0, 1, 1], [], []>} : vector<32x16xbf16>, vector<16x8xbf16>, vector<32x8xf32> -> vector<32x8xf32>
    %128 = arith.addf %117, %127 : vector<32x8xf32>
    %c0_61 = arith.constant 0 : index
    %c0_62 = arith.constant 0 : index
    %129 = vector.load %arg7[%c0_61, %c0_62] : memref<32x8xf32, #tpu.memory_space<vmem>>, vector<32x8xf32>
    tpu.vector_store %arg7[%c0_61, %c0_62], %128 {strides = array<i32>} : memref<32x8xf32, #tpu.memory_space<vmem>>, vector<32x8xf32>,
    %cst_63 = arith.constant dense<0.000000e+00> : vector<8xf32>
    %130 = vector.multi_reduction <add>, %128, %cst_63 [0] : vector<32x8xf32> to vector<8xf32>
    %131 = vector.shape_cast %130 : vector<8xf32> to vector<1x8xf32>
    %132 = arith.mulf %128, %128 : vector<32x8xf32>
    %cst_64 = arith.constant dense<0.000000e+00> : vector<8xf32>
    %133 = vector.multi_reduction <add>, %132, %cst_64 [0] : vector<32x8xf32> to vector<8xf32>
    %134 = vector.shape_cast %133 : vector<8xf32> to vector<1x8xf32>
    %135 = tpu.concatenate %131, %134 in 0 : vector<1x8xf32>, vector<1x8xf32> -> vector<2x8xf32>
    %c0_65 = arith.constant 0 : index
    %c0_66 = arith.constant 0 : index
    %136 = vector.load %arg8[%c0_65, %c0_66] : memref<2x8xf32, #tpu.memory_space<vmem>>, vector<2x8xf32>
    tpu.vector_store %arg8[%c0_65, %c0_66], %135 {strides = array<i32>} : memref<2x8xf32, #tpu.memory_space<vmem>>, vector<2x8xf32>,
    return
  }
  func.func @transform_0(%arg0: i32) -> (i32, i32) {
    %c0_i32 = arith.constant 0 : i32
    %c0_i32_0 = arith.constant 0 : i32
    %c0_i32_1 = arith.constant 0 : i32
    return %c0_i32, %c0_i32_0 : i32, i32
  }
  func.func @transform_1(%arg0: i32) -> (i32, i32) {
    %c0_i32 = arith.constant 0 : i32
    %c0_i32_0 = arith.constant 0 : i32
    %c0_i32_1 = arith.constant 0 : i32
    return %c0_i32, %c0_i32_0 : i32, i32
  }
  func.func @transform_2(%arg0: i32) -> (i32, i32) {
    %c0_i32 = arith.constant 0 : i32
    %c0_i32_0 = arith.constant 0 : i32
    %c0_i32_1 = arith.constant 0 : i32
    return %c0_i32, %c0_i32_0 : i32, i32
  }
  func.func @transform_3(%arg0: i32) -> (i32, i32) {
    %c0_i32 = arith.constant 0 : i32
    %c0_i32_0 = arith.constant 0 : i32
    %c0_i32_1 = arith.constant 0 : i32
    return %c0_i32, %c0_i32_0 : i32, i32
  }
  func.func @transform_4(%arg0: i32) -> (i32, i32, i32) {
    %c0_i32 = arith.constant 0 : i32
    %c0_i32_0 = arith.constant 0 : i32
    %c0_i32_1 = arith.constant 0 : i32
    %c0_i32_2 = arith.constant 0 : i32
    return %c0_i32, %c0_i32_0, %c0_i32_1 : i32, i32, i32
  }
  func.func @transform_5(%arg0: i32) -> (i32, i32) {
    %c0_i32 = arith.constant 0 : i32
    %c0_i32_0 = arith.constant 0 : i32
    %c0_i32_1 = arith.constant 0 : i32
    return %c0_i32, %c0_i32_0 : i32, i32
  }
  func.func @transform_6(%arg0: i32) -> (i32, i32) {
    %c0_i32 = arith.constant 0 : i32
    %c0_i32_0 = arith.constant 0 : i32
    %c0_i32_1 = arith.constant 0 : i32
    return %c0_i32, %c0_i32_0 : i32, i32
  }
  func.func @transform_7(%arg0: i32) -> (i32, i32) {
    %c0_i32 = arith.constant 0 : i32
    %c0_i32_0 = arith.constant 0 : i32
    %c0_i32_1 = arith.constant 0 : i32
    return %c0_i32, %c0_i32_0 : i32, i32
  }
}

module attributes {stable_mosaic.version = 11 : i64} {
  func.func @kernel(%arg0: i32, %arg1: memref<32x16xf32, #tpu.memory_space<vmem>>, %arg2: memref<32x8xf32, #tpu.memory_space<vmem>>, %arg3: memref<1x16xf32, #tpu.memory_space<vmem>>, %arg4: memref<1x8xf32, #tpu.memory_space<vmem>>, %arg5: memref<1x16xf32, #tpu.memory_space<vmem>>, %arg6: memref<1x8xf32, #tpu.memory_space<vmem>>, %arg7: memref<16x16xbf16, #tpu.memory_space<vmem>>, %arg8: memref<8x16xbf16, #tpu.memory_space<vmem>>, %arg9: memref<9x16x8xbf16, #tpu.memory_space<vmem>>, %arg10: memref<32x9xf32, #tpu.memory_space<vmem>>, %arg11: memref<32x8xf32, #tpu.memory_space<vmem>>, %arg12: memref<2x8xf32, #tpu.memory_space<vmem>>) attributes {dimension_semantics = [#tpu.dimension_semantics<arbitrary>], iteration_bounds = array<i64: 1>, scalar_prefetch = 0 : i64, scratch_operands = 0 : i64, tpu.core_type = #tpu.core_type<tc>, window_params = [{pipeline_mode = #tpu.pipeline_mode<synchronous>, transform_indices = @transform_0, window_bounds = array<i64: 32, 16>}, {pipeline_mode = #tpu.pipeline_mode<synchronous>, transform_indices = @transform_1, window_bounds = array<i64: 32, 8>}, {pipeline_mode = #tpu.pipeline_mode<synchronous>, transform_indices = @transform_2, window_bounds = array<i64: 1, 16>}, {pipeline_mode = #tpu.pipeline_mode<synchronous>, transform_indices = @transform_3, window_bounds = array<i64: 1, 8>}, {pipeline_mode = #tpu.pipeline_mode<synchronous>, transform_indices = @transform_4, window_bounds = array<i64: 1, 16>}, {pipeline_mode = #tpu.pipeline_mode<synchronous>, transform_indices = @transform_5, window_bounds = array<i64: 1, 8>}, {pipeline_mode = #tpu.pipeline_mode<synchronous>, transform_indices = @transform_6, window_bounds = array<i64: 16, 16>}, {pipeline_mode = #tpu.pipeline_mode<synchronous>, transform_indices = @transform_7, window_bounds = array<i64: 8, 16>}, {pipeline_mode = #tpu.pipeline_mode<synchronous>, transform_indices = @transform_8, window_bounds = array<i64: 9, 16, 8>}, {pipeline_mode = #tpu.pipeline_mode<synchronous>, transform_indices = @transform_9, window_bounds = array<i64: 32, 9>}, {pipeline_mode = #tpu.pipeline_mode<synchronous>, transform_indices = @transform_10, window_bounds = array<i64: 32, 8>}, {pipeline_mode = #tpu.pipeline_mode<synchronous>, transform_indices = @transform_11, window_bounds = array<i64: 2, 8>}]} {
    %c0 = arith.constant 0 : index
    %c0_0 = arith.constant 0 : index
    %0 = vector.load %arg1[%c0, %c0_0] : memref<32x16xf32, #tpu.memory_space<vmem>>, vector<32x16xf32>
    %c0_1 = arith.constant 0 : index
    %c0_2 = arith.constant 0 : index
    %1 = vector.load %arg3[%c0_1, %c0_2] : memref<1x16xf32, #tpu.memory_space<vmem>>, vector<1x16xf32>
    %2 = vector.broadcast %1 : vector<1x16xf32> to vector<32x16xf32>
    %3 = arith.mulf %0, %2 : vector<32x16xf32>
    %c0_3 = arith.constant 0 : index
    %c0_4 = arith.constant 0 : index
    %4 = vector.load %arg5[%c0_3, %c0_4] : memref<1x16xf32, #tpu.memory_space<vmem>>, vector<1x16xf32>
    %5 = vector.broadcast %4 : vector<1x16xf32> to vector<32x16xf32>
    %6 = arith.addf %3, %5 : vector<32x16xf32>
    %cst = arith.constant 0.000000e+00 : f32
    %7 = vector.broadcast %cst : f32 to vector<32x16xf32>
    %8 = arith.maximumf %6, %7 : vector<32x16xf32>
    %9 = arith.truncf %8 : vector<32x16xf32> to vector<32x16xbf16>
    %c0_5 = arith.constant 0 : index
    %c0_6 = arith.constant 0 : index
    %10 = vector.load %arg7[%c0_5, %c0_6] : memref<16x16xbf16, #tpu.memory_space<vmem>>, vector<16x16xbf16>
    %cst_7 = arith.constant dense<0.000000e+00> : vector<32x16xf32>
    %11 = tpu.matmul %9, %10, %cst_7 {dimension_numbers = #tpu.dot_dimension_numbers<[1], [0], [0], [1], [0, 0, 1, 1], [], []>} : vector<32x16xbf16>, vector<16x16xbf16>, vector<32x16xf32> -> vector<32x16xf32>
    %c0_8 = arith.constant 0 : index
    %c0_9 = arith.constant 0 : index
    %12 = vector.load %arg2[%c0_8, %c0_9] : memref<32x8xf32, #tpu.memory_space<vmem>>, vector<32x8xf32>
    %c0_10 = arith.constant 0 : index
    %c0_11 = arith.constant 0 : index
    %13 = vector.load %arg4[%c0_10, %c0_11] : memref<1x8xf32, #tpu.memory_space<vmem>>, vector<1x8xf32>
    %14 = vector.broadcast %13 : vector<1x8xf32> to vector<32x8xf32>
    %15 = arith.mulf %12, %14 : vector<32x8xf32>
    %c0_12 = arith.constant 0 : index
    %c0_13 = arith.constant 0 : index
    %16 = vector.load %arg6[%c0_12, %c0_13] : memref<1x8xf32, #tpu.memory_space<vmem>>, vector<1x8xf32>
    %17 = vector.broadcast %16 : vector<1x8xf32> to vector<32x8xf32>
    %18 = arith.addf %15, %17 : vector<32x8xf32>
    %cst_14 = arith.constant 0.000000e+00 : f32
    %19 = vector.broadcast %cst_14 : f32 to vector<32x8xf32>
    %20 = arith.maximumf %18, %19 : vector<32x8xf32>
    %21 = arith.truncf %20 : vector<32x8xf32> to vector<32x8xbf16>
    %c0_15 = arith.constant 0 : index
    %c0_16 = arith.constant 0 : index
    %22 = vector.load %arg8[%c0_15, %c0_16] : memref<8x16xbf16, #tpu.memory_space<vmem>>, vector<8x16xbf16>
    %cst_17 = arith.constant dense<0.000000e+00> : vector<32x16xf32>
    %23 = tpu.matmul %21, %22, %cst_17 {dimension_numbers = #tpu.dot_dimension_numbers<[1], [0], [0], [1], [0, 0, 1, 1], [], []>} : vector<32x8xbf16>, vector<8x16xbf16>, vector<32x16xf32> -> vector<32x16xf32>
    %24 = arith.addf %11, %23 : vector<32x16xf32>
    %cst_18 = arith.constant dense<0.000000e+00> : vector<16xf32>
    %25 = vector.multi_reduction <add>, %24, %cst_18 [0] : vector<32x16xf32> to vector<16xf32>
    %26 = vector.shape_cast %25 : vector<16xf32> to vector<1x16xf32>
    %cst_19 = arith.constant 3.125000e-02 : f32
    %27 = vector.broadcast %cst_19 : f32 to vector<1x16xf32>
    %28 = arith.mulf %26, %27 : vector<1x16xf32>
    %29 = arith.mulf %24, %24 : vector<32x16xf32>
    %cst_20 = arith.constant dense<0.000000e+00> : vector<16xf32>
    %30 = vector.multi_reduction <add>, %29, %cst_20 [0] : vector<32x16xf32> to vector<16xf32>
    %31 = vector.shape_cast %30 : vector<16xf32> to vector<1x16xf32>
    %cst_21 = arith.constant 3.125000e-02 : f32
    %32 = vector.broadcast %cst_21 : f32 to vector<1x16xf32>
    %33 = arith.mulf %31, %32 : vector<1x16xf32>
    %34 = arith.mulf %28, %28 : vector<1x16xf32>
    %35 = arith.subf %33, %34 : vector<1x16xf32>
    %cst_22 = arith.constant 0.000000e+00 : f32
    %36 = vector.broadcast %cst_22 : f32 to vector<1x16xf32>
    %37 = arith.maximumf %35, %36 : vector<1x16xf32>
    %38 = vector.broadcast %28 : vector<1x16xf32> to vector<32x16xf32>
    %39 = arith.subf %24, %38 : vector<32x16xf32>
    %cst_23 = arith.constant 9.99999974E-6 : f32
    %40 = vector.broadcast %cst_23 : f32 to vector<1x16xf32>
    %41 = arith.addf %37, %40 : vector<1x16xf32>
    %42 = math.rsqrt %41 : vector<1x16xf32>
    %43 = vector.broadcast %42 : vector<1x16xf32> to vector<32x16xf32>
    %44 = arith.mulf %39, %43 : vector<32x16xf32>
    %cst_24 = arith.constant 0.000000e+00 : f32
    %45 = vector.broadcast %cst_24 : f32 to vector<32x16xf32>
    %46 = arith.maximumf %44, %45 : vector<32x16xf32>
    %47 = vector.extract_strided_slice %46 {offsets = [27, 0], sizes = [5, 16], strides = [1, 1]} : vector<32x16xf32> to vector<5x16xf32>
    %48 = vector.extract_strided_slice %46 {offsets = [0, 0], sizes = [27, 16], strides = [1, 1]} : vector<32x16xf32> to vector<27x16xf32>
    %49 = tpu.concatenate %47, %48 in 0 : vector<5x16xf32>, vector<27x16xf32> -> vector<32x16xf32>
    %c0_25 = arith.constant 0 : index
    %c0_26 = arith.constant 0 : index
    %50 = vector.load %arg10[%c0_25, %c0_26] : memref<32x9xf32, #tpu.memory_space<vmem>>, vector<32x1xf32>
    %51 = vector.broadcast %50 : vector<32x1xf32> to vector<32x16xf32>
    %52 = arith.mulf %49, %51 : vector<32x16xf32>
    %53 = arith.truncf %52 : vector<32x16xf32> to vector<32x16xbf16>
    %c0_27 = arith.constant 0 : index
    %c0_28 = arith.constant 0 : index
    %c0_29 = arith.constant 0 : index
    %54 = vector.load %arg9[%c0_27, %c0_28, %c0_29] : memref<9x16x8xbf16, #tpu.memory_space<vmem>>, vector<1x16x8xbf16>
    %55 = vector.shape_cast %54 : vector<1x16x8xbf16> to vector<16x8xbf16>
    %cst_30 = arith.constant dense<0.000000e+00> : vector<32x8xf32>
    %56 = tpu.matmul %53, %55, %cst_30 {dimension_numbers = #tpu.dot_dimension_numbers<[1], [0], [0], [1], [0, 0, 1, 1], [], []>} : vector<32x16xbf16>, vector<16x8xbf16>, vector<32x8xf32> -> vector<32x8xf32>
    %57 = vector.extract_strided_slice %46 {offsets = [28, 0], sizes = [4, 16], strides = [1, 1]} : vector<32x16xf32> to vector<4x16xf32>
    %58 = vector.extract_strided_slice %46 {offsets = [0, 0], sizes = [28, 16], strides = [1, 1]} : vector<32x16xf32> to vector<28x16xf32>
    %59 = tpu.concatenate %57, %58 in 0 : vector<4x16xf32>, vector<28x16xf32> -> vector<32x16xf32>
    %c0_31 = arith.constant 0 : index
    %c1 = arith.constant 1 : index
    %60 = vector.load %arg10[%c0_31, %c1] : memref<32x9xf32, #tpu.memory_space<vmem>>, vector<32x1xf32>
    %61 = vector.broadcast %60 : vector<32x1xf32> to vector<32x16xf32>
    %62 = arith.mulf %59, %61 : vector<32x16xf32>
    %63 = arith.truncf %62 : vector<32x16xf32> to vector<32x16xbf16>
    %c1_32 = arith.constant 1 : index
    %c0_33 = arith.constant 0 : index
    %c0_34 = arith.constant 0 : index
    %64 = vector.load %arg9[%c1_32, %c0_33, %c0_34] : memref<9x16x8xbf16, #tpu.memory_space<vmem>>, vector<1x16x8xbf16>
    %65 = vector.shape_cast %64 : vector<1x16x8xbf16> to vector<16x8xbf16>
    %cst_35 = arith.constant dense<0.000000e+00> : vector<32x8xf32>
    %66 = tpu.matmul %63, %65, %cst_35 {dimension_numbers = #tpu.dot_dimension_numbers<[1], [0], [0], [1], [0, 0, 1, 1], [], []>} : vector<32x16xbf16>, vector<16x8xbf16>, vector<32x8xf32> -> vector<32x8xf32>
    %67 = arith.addf %56, %66 : vector<32x8xf32>
    %68 = vector.extract_strided_slice %46 {offsets = [29, 0], sizes = [3, 16], strides = [1, 1]} : vector<32x16xf32> to vector<3x16xf32>
    %69 = vector.extract_strided_slice %46 {offsets = [0, 0], sizes = [29, 16], strides = [1, 1]} : vector<32x16xf32> to vector<29x16xf32>
    %70 = tpu.concatenate %68, %69 in 0 : vector<3x16xf32>, vector<29x16xf32> -> vector<32x16xf32>
    %c0_36 = arith.constant 0 : index
    %c2 = arith.constant 2 : index
    %71 = vector.load %arg10[%c0_36, %c2] : memref<32x9xf32, #tpu.memory_space<vmem>>, vector<32x1xf32>
    %72 = vector.broadcast %71 : vector<32x1xf32> to vector<32x16xf32>
    %73 = arith.mulf %70, %72 : vector<32x16xf32>
    %74 = arith.truncf %73 : vector<32x16xf32> to vector<32x16xbf16>
    %c2_37 = arith.constant 2 : index
    %c0_38 = arith.constant 0 : index
    %c0_39 = arith.constant 0 : index
    %75 = vector.load %arg9[%c2_37, %c0_38, %c0_39] : memref<9x16x8xbf16, #tpu.memory_space<vmem>>, vector<1x16x8xbf16>
    %76 = vector.shape_cast %75 : vector<1x16x8xbf16> to vector<16x8xbf16>
    %cst_40 = arith.constant dense<0.000000e+00> : vector<32x8xf32>
    %77 = tpu.matmul %74, %76, %cst_40 {dimension_numbers = #tpu.dot_dimension_numbers<[1], [0], [0], [1], [0, 0, 1, 1], [], []>} : vector<32x16xbf16>, vector<16x8xbf16>, vector<32x8xf32> -> vector<32x8xf32>
    %78 = arith.addf %67, %77 : vector<32x8xf32>
    %79 = vector.extract_strided_slice %46 {offsets = [31, 0], sizes = [1, 16], strides = [1, 1]} : vector<32x16xf32> to vector<1x16xf32>
    %80 = vector.extract_strided_slice %46 {offsets = [0, 0], sizes = [31, 16], strides = [1, 1]} : vector<32x16xf32> to vector<31x16xf32>
    %81 = tpu.concatenate %79, %80 in 0 : vector<1x16xf32>, vector<31x16xf32> -> vector<32x16xf32>
    %c0_41 = arith.constant 0 : index
    %c3 = arith.constant 3 : index
    %82 = vector.load %arg10[%c0_41, %c3] : memref<32x9xf32, #tpu.memory_space<vmem>>, vector<32x1xf32>
    %83 = vector.broadcast %82 : vector<32x1xf32> to vector<32x16xf32>
    %84 = arith.mulf %81, %83 : vector<32x16xf32>
    %85 = arith.truncf %84 : vector<32x16xf32> to vector<32x16xbf16>
    %c3_42 = arith.constant 3 : index
    %c0_43 = arith.constant 0 : index
    %c0_44 = arith.constant 0 : index
    %86 = vector.load %arg9[%c3_42, %c0_43, %c0_44] : memref<9x16x8xbf16, #tpu.memory_space<vmem>>, vector<1x16x8xbf16>
    %87 = vector.shape_cast %86 : vector<1x16x8xbf16> to vector<16x8xbf16>
    %cst_45 = arith.constant dense<0.000000e+00> : vector<32x8xf32>
    %88 = tpu.matmul %85, %87, %cst_45 {dimension_numbers = #tpu.dot_dimension_numbers<[1], [0], [0], [1], [0, 0, 1, 1], [], []>} : vector<32x16xbf16>, vector<16x8xbf16>, vector<32x8xf32> -> vector<32x8xf32>
    %89 = arith.addf %78, %88 : vector<32x8xf32>
    %c0_46 = arith.constant 0 : index
    %c4 = arith.constant 4 : index
    %90 = vector.load %arg10[%c0_46, %c4] : memref<32x9xf32, #tpu.memory_space<vmem>>, vector<32x1xf32>
    %91 = vector.broadcast %90 : vector<32x1xf32> to vector<32x16xf32>
    %92 = arith.mulf %46, %91 : vector<32x16xf32>
    %93 = arith.truncf %92 : vector<32x16xf32> to vector<32x16xbf16>
    %c4_47 = arith.constant 4 : index
    %c0_48 = arith.constant 0 : index
    %c0_49 = arith.constant 0 : index
    %94 = vector.load %arg9[%c4_47, %c0_48, %c0_49] : memref<9x16x8xbf16, #tpu.memory_space<vmem>>, vector<1x16x8xbf16>
    %95 = vector.shape_cast %94 : vector<1x16x8xbf16> to vector<16x8xbf16>
    %cst_50 = arith.constant dense<0.000000e+00> : vector<32x8xf32>
    %96 = tpu.matmul %93, %95, %cst_50 {dimension_numbers = #tpu.dot_dimension_numbers<[1], [0], [0], [1], [0, 0, 1, 1], [], []>} : vector<32x16xbf16>, vector<16x8xbf16>, vector<32x8xf32> -> vector<32x8xf32>
    %97 = arith.addf %89, %96 : vector<32x8xf32>
    %98 = vector.extract_strided_slice %46 {offsets = [1, 0], sizes = [31, 16], strides = [1, 1]} : vector<32x16xf32> to vector<31x16xf32>
    %99 = vector.extract_strided_slice %46 {offsets = [0, 0], sizes = [1, 16], strides = [1, 1]} : vector<32x16xf32> to vector<1x16xf32>
    %100 = tpu.concatenate %98, %99 in 0 : vector<31x16xf32>, vector<1x16xf32> -> vector<32x16xf32>
    %c0_51 = arith.constant 0 : index
    %c5 = arith.constant 5 : index
    %101 = vector.load %arg10[%c0_51, %c5] : memref<32x9xf32, #tpu.memory_space<vmem>>, vector<32x1xf32>
    %102 = vector.broadcast %101 : vector<32x1xf32> to vector<32x16xf32>
    %103 = arith.mulf %100, %102 : vector<32x16xf32>
    %104 = arith.truncf %103 : vector<32x16xf32> to vector<32x16xbf16>
    %c5_52 = arith.constant 5 : index
    %c0_53 = arith.constant 0 : index
    %c0_54 = arith.constant 0 : index
    %105 = vector.load %arg9[%c5_52, %c0_53, %c0_54] : memref<9x16x8xbf16, #tpu.memory_space<vmem>>, vector<1x16x8xbf16>
    %106 = vector.shape_cast %105 : vector<1x16x8xbf16> to vector<16x8xbf16>
    %cst_55 = arith.constant dense<0.000000e+00> : vector<32x8xf32>
    %107 = tpu.matmul %104, %106, %cst_55 {dimension_numbers = #tpu.dot_dimension_numbers<[1], [0], [0], [1], [0, 0, 1, 1], [], []>} : vector<32x16xbf16>, vector<16x8xbf16>, vector<32x8xf32> -> vector<32x8xf32>
    %108 = arith.addf %97, %107 : vector<32x8xf32>
    %109 = vector.extract_strided_slice %46 {offsets = [3, 0], sizes = [29, 16], strides = [1, 1]} : vector<32x16xf32> to vector<29x16xf32>
    %110 = vector.extract_strided_slice %46 {offsets = [0, 0], sizes = [3, 16], strides = [1, 1]} : vector<32x16xf32> to vector<3x16xf32>
    %111 = tpu.concatenate %109, %110 in 0 : vector<29x16xf32>, vector<3x16xf32> -> vector<32x16xf32>
    %c0_56 = arith.constant 0 : index
    %c6 = arith.constant 6 : index
    %112 = vector.load %arg10[%c0_56, %c6] : memref<32x9xf32, #tpu.memory_space<vmem>>, vector<32x1xf32>
    %113 = vector.broadcast %112 : vector<32x1xf32> to vector<32x16xf32>
    %114 = arith.mulf %111, %113 : vector<32x16xf32>
    %115 = arith.truncf %114 : vector<32x16xf32> to vector<32x16xbf16>
    %c6_57 = arith.constant 6 : index
    %c0_58 = arith.constant 0 : index
    %c0_59 = arith.constant 0 : index
    %116 = vector.load %arg9[%c6_57, %c0_58, %c0_59] : memref<9x16x8xbf16, #tpu.memory_space<vmem>>, vector<1x16x8xbf16>
    %117 = vector.shape_cast %116 : vector<1x16x8xbf16> to vector<16x8xbf16>
    %cst_60 = arith.constant dense<0.000000e+00> : vector<32x8xf32>
    %118 = tpu.matmul %115, %117, %cst_60 {dimension_numbers = #tpu.dot_dimension_numbers<[1], [0], [0], [1], [0, 0, 1, 1], [], []>} : vector<32x16xbf16>, vector<16x8xbf16>, vector<32x8xf32> -> vector<32x8xf32>
    %119 = arith.addf %108, %118 : vector<32x8xf32>
    %120 = vector.extract_strided_slice %46 {offsets = [4, 0], sizes = [28, 16], strides = [1, 1]} : vector<32x16xf32> to vector<28x16xf32>
    %121 = vector.extract_strided_slice %46 {offsets = [0, 0], sizes = [4, 16], strides = [1, 1]} : vector<32x16xf32> to vector<4x16xf32>
    %122 = tpu.concatenate %120, %121 in 0 : vector<28x16xf32>, vector<4x16xf32> -> vector<32x16xf32>
    %c0_61 = arith.constant 0 : index
    %c7 = arith.constant 7 : index
    %123 = vector.load %arg10[%c0_61, %c7] : memref<32x9xf32, #tpu.memory_space<vmem>>, vector<32x1xf32>
    %124 = vector.broadcast %123 : vector<32x1xf32> to vector<32x16xf32>
    %125 = arith.mulf %122, %124 : vector<32x16xf32>
    %126 = arith.truncf %125 : vector<32x16xf32> to vector<32x16xbf16>
    %c7_62 = arith.constant 7 : index
    %c0_63 = arith.constant 0 : index
    %c0_64 = arith.constant 0 : index
    %127 = vector.load %arg9[%c7_62, %c0_63, %c0_64] : memref<9x16x8xbf16, #tpu.memory_space<vmem>>, vector<1x16x8xbf16>
    %128 = vector.shape_cast %127 : vector<1x16x8xbf16> to vector<16x8xbf16>
    %cst_65 = arith.constant dense<0.000000e+00> : vector<32x8xf32>
    %129 = tpu.matmul %126, %128, %cst_65 {dimension_numbers = #tpu.dot_dimension_numbers<[1], [0], [0], [1], [0, 0, 1, 1], [], []>} : vector<32x16xbf16>, vector<16x8xbf16>, vector<32x8xf32> -> vector<32x8xf32>
    %130 = arith.addf %119, %129 : vector<32x8xf32>
    %131 = vector.extract_strided_slice %46 {offsets = [5, 0], sizes = [27, 16], strides = [1, 1]} : vector<32x16xf32> to vector<27x16xf32>
    %132 = vector.extract_strided_slice %46 {offsets = [0, 0], sizes = [5, 16], strides = [1, 1]} : vector<32x16xf32> to vector<5x16xf32>
    %133 = tpu.concatenate %131, %132 in 0 : vector<27x16xf32>, vector<5x16xf32> -> vector<32x16xf32>
    %c0_66 = arith.constant 0 : index
    %c8 = arith.constant 8 : index
    %134 = vector.load %arg10[%c0_66, %c8] : memref<32x9xf32, #tpu.memory_space<vmem>>, vector<32x1xf32>
    %135 = vector.broadcast %134 : vector<32x1xf32> to vector<32x16xf32>
    %136 = arith.mulf %133, %135 : vector<32x16xf32>
    %137 = arith.truncf %136 : vector<32x16xf32> to vector<32x16xbf16>
    %c8_67 = arith.constant 8 : index
    %c0_68 = arith.constant 0 : index
    %c0_69 = arith.constant 0 : index
    %138 = vector.load %arg9[%c8_67, %c0_68, %c0_69] : memref<9x16x8xbf16, #tpu.memory_space<vmem>>, vector<1x16x8xbf16>
    %139 = vector.shape_cast %138 : vector<1x16x8xbf16> to vector<16x8xbf16>
    %cst_70 = arith.constant dense<0.000000e+00> : vector<32x8xf32>
    %140 = tpu.matmul %137, %139, %cst_70 {dimension_numbers = #tpu.dot_dimension_numbers<[1], [0], [0], [1], [0, 0, 1, 1], [], []>} : vector<32x16xbf16>, vector<16x8xbf16>, vector<32x8xf32> -> vector<32x8xf32>
    %141 = arith.addf %130, %140 : vector<32x8xf32>
    %c0_71 = arith.constant 0 : index
    %c0_72 = arith.constant 0 : index
    %142 = vector.load %arg11[%c0_71, %c0_72] : memref<32x8xf32, #tpu.memory_space<vmem>>, vector<32x8xf32>
    tpu.vector_store %arg11[%c0_71, %c0_72], %141 {strides = array<i32>} : memref<32x8xf32, #tpu.memory_space<vmem>>, vector<32x8xf32>,
    %cst_73 = arith.constant dense<0.000000e+00> : vector<8xf32>
    %143 = vector.multi_reduction <add>, %141, %cst_73 [0] : vector<32x8xf32> to vector<8xf32>
    %144 = vector.shape_cast %143 : vector<8xf32> to vector<1x8xf32>
    %145 = arith.mulf %141, %141 : vector<32x8xf32>
    %cst_74 = arith.constant dense<0.000000e+00> : vector<8xf32>
    %146 = vector.multi_reduction <add>, %145, %cst_74 [0] : vector<32x8xf32> to vector<8xf32>
    %147 = vector.shape_cast %146 : vector<8xf32> to vector<1x8xf32>
    %148 = tpu.concatenate %144, %147 in 0 : vector<1x8xf32>, vector<1x8xf32> -> vector<2x8xf32>
    %c0_75 = arith.constant 0 : index
    %c0_76 = arith.constant 0 : index
    %149 = vector.load %arg12[%c0_75, %c0_76] : memref<2x8xf32, #tpu.memory_space<vmem>>, vector<2x8xf32>
    tpu.vector_store %arg12[%c0_75, %c0_76], %148 {strides = array<i32>} : memref<2x8xf32, #tpu.memory_space<vmem>>, vector<2x8xf32>,
    return
  }
  func.func @transform_0(%arg0: i32) -> (i32, i32) {
    %c0_i32 = arith.constant 0 : i32
    %c0_i32_0 = arith.constant 0 : i32
    %c0_i32_1 = arith.constant 0 : i32
    return %c0_i32, %c0_i32_0 : i32, i32
  }
  func.func @transform_1(%arg0: i32) -> (i32, i32) {
    %c0_i32 = arith.constant 0 : i32
    %c0_i32_0 = arith.constant 0 : i32
    %c0_i32_1 = arith.constant 0 : i32
    return %c0_i32, %c0_i32_0 : i32, i32
  }
  func.func @transform_2(%arg0: i32) -> (i32, i32) {
    %c0_i32 = arith.constant 0 : i32
    %c0_i32_0 = arith.constant 0 : i32
    %c0_i32_1 = arith.constant 0 : i32
    return %c0_i32, %c0_i32_0 : i32, i32
  }
  func.func @transform_3(%arg0: i32) -> (i32, i32) {
    %c0_i32 = arith.constant 0 : i32
    %c0_i32_0 = arith.constant 0 : i32
    %c0_i32_1 = arith.constant 0 : i32
    return %c0_i32, %c0_i32_0 : i32, i32
  }
  func.func @transform_4(%arg0: i32) -> (i32, i32) {
    %c0_i32 = arith.constant 0 : i32
    %c0_i32_0 = arith.constant 0 : i32
    %c0_i32_1 = arith.constant 0 : i32
    return %c0_i32, %c0_i32_0 : i32, i32
  }
  func.func @transform_5(%arg0: i32) -> (i32, i32) {
    %c0_i32 = arith.constant 0 : i32
    %c0_i32_0 = arith.constant 0 : i32
    %c0_i32_1 = arith.constant 0 : i32
    return %c0_i32, %c0_i32_0 : i32, i32
  }
  func.func @transform_6(%arg0: i32) -> (i32, i32) {
    %c0_i32 = arith.constant 0 : i32
    %c0_i32_0 = arith.constant 0 : i32
    %c0_i32_1 = arith.constant 0 : i32
    return %c0_i32, %c0_i32_0 : i32, i32
  }
  func.func @transform_7(%arg0: i32) -> (i32, i32) {
    %c0_i32 = arith.constant 0 : i32
    %c0_i32_0 = arith.constant 0 : i32
    %c0_i32_1 = arith.constant 0 : i32
    return %c0_i32, %c0_i32_0 : i32, i32
  }
  func.func @transform_8(%arg0: i32) -> (i32, i32, i32) {
    %c0_i32 = arith.constant 0 : i32
    %c0_i32_0 = arith.constant 0 : i32
    %c0_i32_1 = arith.constant 0 : i32
    %c0_i32_2 = arith.constant 0 : i32
    return %c0_i32, %c0_i32_0, %c0_i32_1 : i32, i32, i32
  }
  func.func @transform_9(%arg0: i32) -> (i32, i32) {
    %c0_i32 = arith.constant 0 : i32
    %c0_i32_0 = arith.constant 0 : i32
    %c0_i32_1 = arith.constant 0 : i32
    return %c0_i32, %c0_i32_0 : i32, i32
  }
  func.func @transform_10(%arg0: i32) -> (i32, i32) {
    %c0_i32 = arith.constant 0 : i32
    %c0_i32_0 = arith.constant 0 : i32
    %c0_i32_1 = arith.constant 0 : i32
    return %c0_i32, %c0_i32_0 : i32, i32
  }
  func.func @transform_11(%arg0: i32) -> (i32, i32) {
    %c0_i32 = arith.constant 0 : i32
    %c0_i32_0 = arith.constant 0 : i32
    %c0_i32_1 = arith.constant 0 : i32
    return %c0_i32, %c0_i32_0 : i32, i32
  }
}

module attributes {stable_mosaic.version = 11 : i64} {
  func.func @kernel(%arg0: i32, %arg1: memref<32x16xf32, #tpu.memory_space<vmem>>, %arg2: memref<32x8xf32, #tpu.memory_space<vmem>>, %arg3: memref<32x8xf32, #tpu.memory_space<vmem>>, %arg4: memref<1x16xf32, #tpu.memory_space<vmem>>, %arg5: memref<1x8xf32, #tpu.memory_space<vmem>>, %arg6: memref<1x8xf32, #tpu.memory_space<vmem>>, %arg7: memref<1x16xf32, #tpu.memory_space<vmem>>, %arg8: memref<1x8xf32, #tpu.memory_space<vmem>>, %arg9: memref<1x8xf32, #tpu.memory_space<vmem>>, %arg10: memref<16x16xbf16, #tpu.memory_space<vmem>>, %arg11: memref<8x16xbf16, #tpu.memory_space<vmem>>, %arg12: memref<8x16xbf16, #tpu.memory_space<vmem>>, %arg13: memref<8x32xf32, #tpu.memory_space<vmem>>, %arg14: memref<8x16xf32, #tpu.memory_space<vmem>>, %arg15: memref<2x16xf32, #tpu.memory_space<vmem>>) attributes {dimension_semantics = [#tpu.dimension_semantics<arbitrary>], iteration_bounds = array<i64: 1>, scalar_prefetch = 0 : i64, scratch_operands = 0 : i64, tpu.core_type = #tpu.core_type<tc>, window_params = [{pipeline_mode = #tpu.pipeline_mode<synchronous>, transform_indices = @transform_0, window_bounds = array<i64: 32, 16>}, {pipeline_mode = #tpu.pipeline_mode<synchronous>, transform_indices = @transform_1, window_bounds = array<i64: 32, 8>}, {pipeline_mode = #tpu.pipeline_mode<synchronous>, transform_indices = @transform_2, window_bounds = array<i64: 32, 8>}, {pipeline_mode = #tpu.pipeline_mode<synchronous>, transform_indices = @transform_3, window_bounds = array<i64: 1, 16>}, {pipeline_mode = #tpu.pipeline_mode<synchronous>, transform_indices = @transform_4, window_bounds = array<i64: 1, 8>}, {pipeline_mode = #tpu.pipeline_mode<synchronous>, transform_indices = @transform_5, window_bounds = array<i64: 1, 8>}, {pipeline_mode = #tpu.pipeline_mode<synchronous>, transform_indices = @transform_6, window_bounds = array<i64: 1, 16>}, {pipeline_mode = #tpu.pipeline_mode<synchronous>, transform_indices = @transform_7, window_bounds = array<i64: 1, 8>}, {pipeline_mode = #tpu.pipeline_mode<synchronous>, transform_indices = @transform_8, window_bounds = array<i64: 1, 8>}, {pipeline_mode = #tpu.pipeline_mode<synchronous>, transform_indices = @transform_9, window_bounds = array<i64: 16, 16>}, {pipeline_mode = #tpu.pipeline_mode<synchronous>, transform_indices = @transform_10, window_bounds = array<i64: 8, 16>}, {pipeline_mode = #tpu.pipeline_mode<synchronous>, transform_indices = @transform_11, window_bounds = array<i64: 8, 16>}, {pipeline_mode = #tpu.pipeline_mode<synchronous>, transform_indices = @transform_12, window_bounds = array<i64: 8, 32>}, {pipeline_mode = #tpu.pipeline_mode<synchronous>, transform_indices = @transform_13, window_bounds = array<i64: 8, 16>}, {pipeline_mode = #tpu.pipeline_mode<synchronous>, transform_indices = @transform_14, window_bounds = array<i64: 2, 16>}]} {
    %c0 = arith.constant 0 : index
    %c0_0 = arith.constant 0 : index
    %0 = vector.load %arg1[%c0, %c0_0] : memref<32x16xf32, #tpu.memory_space<vmem>>, vector<32x16xf32>
    %c0_1 = arith.constant 0 : index
    %c0_2 = arith.constant 0 : index
    %1 = vector.load %arg4[%c0_1, %c0_2] : memref<1x16xf32, #tpu.memory_space<vmem>>, vector<1x16xf32>
    %2 = vector.broadcast %1 : vector<1x16xf32> to vector<32x16xf32>
    %3 = arith.mulf %0, %2 : vector<32x16xf32>
    %c0_3 = arith.constant 0 : index
    %c0_4 = arith.constant 0 : index
    %4 = vector.load %arg7[%c0_3, %c0_4] : memref<1x16xf32, #tpu.memory_space<vmem>>, vector<1x16xf32>
    %5 = vector.broadcast %4 : vector<1x16xf32> to vector<32x16xf32>
    %6 = arith.addf %3, %5 : vector<32x16xf32>
    %cst = arith.constant 0.000000e+00 : f32
    %7 = vector.broadcast %cst : f32 to vector<32x16xf32>
    %8 = arith.maximumf %6, %7 : vector<32x16xf32>
    %9 = arith.truncf %8 : vector<32x16xf32> to vector<32x16xbf16>
    %c0_5 = arith.constant 0 : index
    %c0_6 = arith.constant 0 : index
    %10 = vector.load %arg10[%c0_5, %c0_6] : memref<16x16xbf16, #tpu.memory_space<vmem>>, vector<16x16xbf16>
    %cst_7 = arith.constant dense<0.000000e+00> : vector<32x16xf32>
    %11 = tpu.matmul %9, %10, %cst_7 {dimension_numbers = #tpu.dot_dimension_numbers<[1], [0], [0], [1], [0, 0, 1, 1], [], []>} : vector<32x16xbf16>, vector<16x16xbf16>, vector<32x16xf32> -> vector<32x16xf32>
    %c0_8 = arith.constant 0 : index
    %c0_9 = arith.constant 0 : index
    %12 = vector.load %arg2[%c0_8, %c0_9] : memref<32x8xf32, #tpu.memory_space<vmem>>, vector<32x8xf32>
    %c0_10 = arith.constant 0 : index
    %c0_11 = arith.constant 0 : index
    %13 = vector.load %arg5[%c0_10, %c0_11] : memref<1x8xf32, #tpu.memory_space<vmem>>, vector<1x8xf32>
    %14 = vector.broadcast %13 : vector<1x8xf32> to vector<32x8xf32>
    %15 = arith.mulf %12, %14 : vector<32x8xf32>
    %c0_12 = arith.constant 0 : index
    %c0_13 = arith.constant 0 : index
    %16 = vector.load %arg8[%c0_12, %c0_13] : memref<1x8xf32, #tpu.memory_space<vmem>>, vector<1x8xf32>
    %17 = vector.broadcast %16 : vector<1x8xf32> to vector<32x8xf32>
    %18 = arith.addf %15, %17 : vector<32x8xf32>
    %cst_14 = arith.constant 0.000000e+00 : f32
    %19 = vector.broadcast %cst_14 : f32 to vector<32x8xf32>
    %20 = arith.maximumf %18, %19 : vector<32x8xf32>
    %21 = arith.truncf %20 : vector<32x8xf32> to vector<32x8xbf16>
    %c0_15 = arith.constant 0 : index
    %c0_16 = arith.constant 0 : index
    %22 = vector.load %arg11[%c0_15, %c0_16] : memref<8x16xbf16, #tpu.memory_space<vmem>>, vector<8x16xbf16>
    %cst_17 = arith.constant dense<0.000000e+00> : vector<32x16xf32>
    %23 = tpu.matmul %21, %22, %cst_17 {dimension_numbers = #tpu.dot_dimension_numbers<[1], [0], [0], [1], [0, 0, 1, 1], [], []>} : vector<32x8xbf16>, vector<8x16xbf16>, vector<32x16xf32> -> vector<32x16xf32>
    %24 = arith.addf %11, %23 : vector<32x16xf32>
    %c0_18 = arith.constant 0 : index
    %c0_19 = arith.constant 0 : index
    %25 = vector.load %arg3[%c0_18, %c0_19] : memref<32x8xf32, #tpu.memory_space<vmem>>, vector<32x8xf32>
    %c0_20 = arith.constant 0 : index
    %c0_21 = arith.constant 0 : index
    %26 = vector.load %arg6[%c0_20, %c0_21] : memref<1x8xf32, #tpu.memory_space<vmem>>, vector<1x8xf32>
    %27 = vector.broadcast %26 : vector<1x8xf32> to vector<32x8xf32>
    %28 = arith.mulf %25, %27 : vector<32x8xf32>
    %c0_22 = arith.constant 0 : index
    %c0_23 = arith.constant 0 : index
    %29 = vector.load %arg9[%c0_22, %c0_23] : memref<1x8xf32, #tpu.memory_space<vmem>>, vector<1x8xf32>
    %30 = vector.broadcast %29 : vector<1x8xf32> to vector<32x8xf32>
    %31 = arith.addf %28, %30 : vector<32x8xf32>
    %cst_24 = arith.constant 0.000000e+00 : f32
    %32 = vector.broadcast %cst_24 : f32 to vector<32x8xf32>
    %33 = arith.maximumf %31, %32 : vector<32x8xf32>
    %34 = arith.truncf %33 : vector<32x8xf32> to vector<32x8xbf16>
    %c0_25 = arith.constant 0 : index
    %c0_26 = arith.constant 0 : index
    %35 = vector.load %arg12[%c0_25, %c0_26] : memref<8x16xbf16, #tpu.memory_space<vmem>>, vector<8x16xbf16>
    %cst_27 = arith.constant dense<0.000000e+00> : vector<32x16xf32>
    %36 = tpu.matmul %34, %35, %cst_27 {dimension_numbers = #tpu.dot_dimension_numbers<[1], [0], [0], [1], [0, 0, 1, 1], [], []>} : vector<32x8xbf16>, vector<8x16xbf16>, vector<32x16xf32> -> vector<32x16xf32>
    %37 = arith.addf %24, %36 : vector<32x16xf32>
    %c0_28 = arith.constant 0 : index
    %c0_29 = arith.constant 0 : index
    %38 = vector.load %arg13[%c0_28, %c0_29] : memref<8x32xf32, #tpu.memory_space<vmem>>, vector<8x32xf32>
    %cst_30 = arith.constant dense<0.000000e+00> : vector<8x16xf32>
    %39 = tpu.matmul %38, %37, %cst_30 {dimension_numbers = #tpu.dot_dimension_numbers<[1], [0], [0], [1], [0, 0, 1, 1], [], []>} : vector<8x32xf32>, vector<32x16xf32>, vector<8x16xf32> -> vector<8x16xf32>
    %c0_31 = arith.constant 0 : index
    %c0_32 = arith.constant 0 : index
    %40 = vector.load %arg14[%c0_31, %c0_32] : memref<8x16xf32, #tpu.memory_space<vmem>>, vector<8x16xf32>
    tpu.vector_store %arg14[%c0_31, %c0_32], %39 {strides = array<i32>} : memref<8x16xf32, #tpu.memory_space<vmem>>, vector<8x16xf32>,
    %cst_33 = arith.constant dense<0.000000e+00> : vector<16xf32>
    %41 = vector.multi_reduction <add>, %39, %cst_33 [0] : vector<8x16xf32> to vector<16xf32>
    %42 = vector.shape_cast %41 : vector<16xf32> to vector<1x16xf32>
    %43 = arith.mulf %39, %39 : vector<8x16xf32>
    %cst_34 = arith.constant dense<0.000000e+00> : vector<16xf32>
    %44 = vector.multi_reduction <add>, %43, %cst_34 [0] : vector<8x16xf32> to vector<16xf32>
    %45 = vector.shape_cast %44 : vector<16xf32> to vector<1x16xf32>
    %46 = tpu.concatenate %42, %45 in 0 : vector<1x16xf32>, vector<1x16xf32> -> vector<2x16xf32>
    %c0_35 = arith.constant 0 : index
    %c0_36 = arith.constant 0 : index
    %47 = vector.load %arg15[%c0_35, %c0_36] : memref<2x16xf32, #tpu.memory_space<vmem>>, vector<2x16xf32>
    tpu.vector_store %arg15[%c0_35, %c0_36], %46 {strides = array<i32>} : memref<2x16xf32, #tpu.memory_space<vmem>>, vector<2x16xf32>,
    return
  }
  func.func @transform_0(%arg0: i32) -> (i32, i32) {
    %c0_i32 = arith.constant 0 : i32
    %c0_i32_0 = arith.constant 0 : i32
    %c0_i32_1 = arith.constant 0 : i32
    return %c0_i32, %c0_i32_0 : i32, i32
  }
  func.func @transform_1(%arg0: i32) -> (i32, i32) {
    %c0_i32 = arith.constant 0 : i32
    %c0_i32_0 = arith.constant 0 : i32
    %c0_i32_1 = arith.constant 0 : i32
    return %c0_i32, %c0_i32_0 : i32, i32
  }
  func.func @transform_2(%arg0: i32) -> (i32, i32) {
    %c0_i32 = arith.constant 0 : i32
    %c0_i32_0 = arith.constant 0 : i32
    %c0_i32_1 = arith.constant 0 : i32
    return %c0_i32, %c0_i32_0 : i32, i32
  }
  func.func @transform_3(%arg0: i32) -> (i32, i32) {
    %c0_i32 = arith.constant 0 : i32
    %c0_i32_0 = arith.constant 0 : i32
    %c0_i32_1 = arith.constant 0 : i32
    return %c0_i32, %c0_i32_0 : i32, i32
  }
  func.func @transform_4(%arg0: i32) -> (i32, i32) {
    %c0_i32 = arith.constant 0 : i32
    %c0_i32_0 = arith.constant 0 : i32
    %c0_i32_1 = arith.constant 0 : i32
    return %c0_i32, %c0_i32_0 : i32, i32
  }
  func.func @transform_5(%arg0: i32) -> (i32, i32) {
    %c0_i32 = arith.constant 0 : i32
    %c0_i32_0 = arith.constant 0 : i32
    %c0_i32_1 = arith.constant 0 : i32
    return %c0_i32, %c0_i32_0 : i32, i32
  }
  func.func @transform_6(%arg0: i32) -> (i32, i32) {
    %c0_i32 = arith.constant 0 : i32
    %c0_i32_0 = arith.constant 0 : i32
    %c0_i32_1 = arith.constant 0 : i32
    return %c0_i32, %c0_i32_0 : i32, i32
  }
  func.func @transform_7(%arg0: i32) -> (i32, i32) {
    %c0_i32 = arith.constant 0 : i32
    %c0_i32_0 = arith.constant 0 : i32
    %c0_i32_1 = arith.constant 0 : i32
    return %c0_i32, %c0_i32_0 : i32, i32
  }
  func.func @transform_8(%arg0: i32) -> (i32, i32) {
    %c0_i32 = arith.constant 0 : i32
    %c0_i32_0 = arith.constant 0 : i32
    %c0_i32_1 = arith.constant 0 : i32
    return %c0_i32, %c0_i32_0 : i32, i32
  }
  func.func @transform_9(%arg0: i32) -> (i32, i32) {
    %c0_i32 = arith.constant 0 : i32
    %c0_i32_0 = arith.constant 0 : i32
    %c0_i32_1 = arith.constant 0 : i32
    return %c0_i32, %c0_i32_0 : i32, i32
  }
  func.func @transform_10(%arg0: i32) -> (i32, i32) {
    %c0_i32 = arith.constant 0 : i32
    %c0_i32_0 = arith.constant 0 : i32
    %c0_i32_1 = arith.constant 0 : i32
    return %c0_i32, %c0_i32_0 : i32, i32
  }
  func.func @transform_11(%arg0: i32) -> (i32, i32) {
    %c0_i32 = arith.constant 0 : i32
    %c0_i32_0 = arith.constant 0 : i32
    %c0_i32_1 = arith.constant 0 : i32
    return %c0_i32, %c0_i32_0 : i32, i32
  }
  func.func @transform_12(%arg0: i32) -> (i32, i32) {
    %c0_i32 = arith.constant 0 : i32
    %c0_i32_0 = arith.constant 0 : i32
    %c0_i32_1 = arith.constant 0 : i32
    return %c0_i32, %c0_i32_0 : i32, i32
  }
  func.func @transform_13(%arg0: i32) -> (i32, i32) {
    %c0_i32 = arith.constant 0 : i32
    %c0_i32_0 = arith.constant 0 : i32
    %c0_i32_1 = arith.constant 0 : i32
    return %c0_i32, %c0_i32_0 : i32, i32
  }
  func.func @transform_14(%arg0: i32) -> (i32, i32) {
    %c0_i32 = arith.constant 0 : i32
    %c0_i32_0 = arith.constant 0 : i32
    %c0_i32_1 = arith.constant 0 : i32
    return %c0_i32, %c0_i32_0 : i32, i32
  }
}

module attributes {stable_mosaic.version = 11 : i64} {
  func.func @kernel(%arg0: i32, %arg1: memref<8x16xf32, #tpu.memory_space<vmem>>, %arg2: memref<1x16xf32, #tpu.memory_space<vmem>>, %arg3: memref<1x16xf32, #tpu.memory_space<vmem>>, %arg4: memref<16x16xbf16, #tpu.memory_space<vmem>>, %arg5: memref<9x16x8xbf16, #tpu.memory_space<vmem>>, %arg6: memref<8x9xf32, #tpu.memory_space<vmem>>, %arg7: memref<8x8xf32, #tpu.memory_space<vmem>>, %arg8: memref<2x8xf32, #tpu.memory_space<vmem>>) attributes {dimension_semantics = [#tpu.dimension_semantics<arbitrary>], iteration_bounds = array<i64: 1>, scalar_prefetch = 0 : i64, scratch_operands = 0 : i64, tpu.core_type = #tpu.core_type<tc>, window_params = [{pipeline_mode = #tpu.pipeline_mode<synchronous>, transform_indices = @transform_0, window_bounds = array<i64: 8, 16>}, {pipeline_mode = #tpu.pipeline_mode<synchronous>, transform_indices = @transform_1, window_bounds = array<i64: 1, 16>}, {pipeline_mode = #tpu.pipeline_mode<synchronous>, transform_indices = @transform_2, window_bounds = array<i64: 1, 16>}, {pipeline_mode = #tpu.pipeline_mode<synchronous>, transform_indices = @transform_3, window_bounds = array<i64: 16, 16>}, {pipeline_mode = #tpu.pipeline_mode<synchronous>, transform_indices = @transform_4, window_bounds = array<i64: 9, 16, 8>}, {pipeline_mode = #tpu.pipeline_mode<synchronous>, transform_indices = @transform_5, window_bounds = array<i64: 8, 9>}, {pipeline_mode = #tpu.pipeline_mode<synchronous>, transform_indices = @transform_6, window_bounds = array<i64: 8, 8>}, {pipeline_mode = #tpu.pipeline_mode<synchronous>, transform_indices = @transform_7, window_bounds = array<i64: 2, 8>}]} {
    %c0 = arith.constant 0 : index
    %c0_0 = arith.constant 0 : index
    %0 = vector.load %arg1[%c0, %c0_0] : memref<8x16xf32, #tpu.memory_space<vmem>>, vector<8x16xf32>
    %c0_1 = arith.constant 0 : index
    %c0_2 = arith.constant 0 : index
    %1 = vector.load %arg2[%c0_1, %c0_2] : memref<1x16xf32, #tpu.memory_space<vmem>>, vector<1x16xf32>
    %2 = vector.broadcast %1 : vector<1x16xf32> to vector<8x16xf32>
    %3 = arith.mulf %0, %2 : vector<8x16xf32>
    %c0_3 = arith.constant 0 : index
    %c0_4 = arith.constant 0 : index
    %4 = vector.load %arg3[%c0_3, %c0_4] : memref<1x16xf32, #tpu.memory_space<vmem>>, vector<1x16xf32>
    %5 = vector.broadcast %4 : vector<1x16xf32> to vector<8x16xf32>
    %6 = arith.addf %3, %5 : vector<8x16xf32>
    %cst = arith.constant 0.000000e+00 : f32
    %7 = vector.broadcast %cst : f32 to vector<8x16xf32>
    %8 = arith.maximumf %6, %7 : vector<8x16xf32>
    %9 = arith.truncf %8 : vector<8x16xf32> to vector<8x16xbf16>
    %c0_5 = arith.constant 0 : index
    %c0_6 = arith.constant 0 : index
    %10 = vector.load %arg4[%c0_5, %c0_6] : memref<16x16xbf16, #tpu.memory_space<vmem>>, vector<16x16xbf16>
    %cst_7 = arith.constant dense<0.000000e+00> : vector<8x16xf32>
    %11 = tpu.matmul %9, %10, %cst_7 {dimension_numbers = #tpu.dot_dimension_numbers<[1], [0], [0], [1], [0, 0, 1, 1], [], []>} : vector<8x16xbf16>, vector<16x16xbf16>, vector<8x16xf32> -> vector<8x16xf32>
    %cst_8 = arith.constant dense<0.000000e+00> : vector<16xf32>
    %12 = vector.multi_reduction <add>, %11, %cst_8 [0] : vector<8x16xf32> to vector<16xf32>
    %13 = vector.shape_cast %12 : vector<16xf32> to vector<1x16xf32>
    %cst_9 = arith.constant 1.250000e-01 : f32
    %14 = vector.broadcast %cst_9 : f32 to vector<1x16xf32>
    %15 = arith.mulf %13, %14 : vector<1x16xf32>
    %16 = arith.mulf %11, %11 : vector<8x16xf32>
    %cst_10 = arith.constant dense<0.000000e+00> : vector<16xf32>
    %17 = vector.multi_reduction <add>, %16, %cst_10 [0] : vector<8x16xf32> to vector<16xf32>
    %18 = vector.shape_cast %17 : vector<16xf32> to vector<1x16xf32>
    %cst_11 = arith.constant 1.250000e-01 : f32
    %19 = vector.broadcast %cst_11 : f32 to vector<1x16xf32>
    %20 = arith.mulf %18, %19 : vector<1x16xf32>
    %21 = arith.mulf %15, %15 : vector<1x16xf32>
    %22 = arith.subf %20, %21 : vector<1x16xf32>
    %cst_12 = arith.constant 0.000000e+00 : f32
    %23 = vector.broadcast %cst_12 : f32 to vector<1x16xf32>
    %24 = arith.maximumf %22, %23 : vector<1x16xf32>
    %25 = vector.broadcast %15 : vector<1x16xf32> to vector<8x16xf32>
    %26 = arith.subf %11, %25 : vector<8x16xf32>
    %cst_13 = arith.constant 9.99999974E-6 : f32
    %27 = vector.broadcast %cst_13 : f32 to vector<1x16xf32>
    %28 = arith.addf %24, %27 : vector<1x16xf32>
    %29 = math.rsqrt %28 : vector<1x16xf32>
    %30 = vector.broadcast %29 : vector<1x16xf32> to vector<8x16xf32>
    %31 = arith.mulf %26, %30 : vector<8x16xf32>
    %cst_14 = arith.constant 0.000000e+00 : f32
    %32 = vector.broadcast %cst_14 : f32 to vector<8x16xf32>
    %33 = arith.maximumf %31, %32 : vector<8x16xf32>
    %34 = vector.extract_strided_slice %33 {offsets = [5, 0], sizes = [3, 16], strides = [1, 1]} : vector<8x16xf32> to vector<3x16xf32>
    %35 = vector.extract_strided_slice %33 {offsets = [0, 0], sizes = [5, 16], strides = [1, 1]} : vector<8x16xf32> to vector<5x16xf32>
    %36 = tpu.concatenate %34, %35 in 0 : vector<3x16xf32>, vector<5x16xf32> -> vector<8x16xf32>
    %c0_15 = arith.constant 0 : index
    %c0_16 = arith.constant 0 : index
    %37 = vector.load %arg6[%c0_15, %c0_16] : memref<8x9xf32, #tpu.memory_space<vmem>>, vector<8x1xf32>
    %38 = vector.broadcast %37 : vector<8x1xf32> to vector<8x16xf32>
    %39 = arith.mulf %36, %38 : vector<8x16xf32>
    %40 = arith.truncf %39 : vector<8x16xf32> to vector<8x16xbf16>
    %c0_17 = arith.constant 0 : index
    %c0_18 = arith.constant 0 : index
    %c0_19 = arith.constant 0 : index
    %41 = vector.load %arg5[%c0_17, %c0_18, %c0_19] : memref<9x16x8xbf16, #tpu.memory_space<vmem>>, vector<1x16x8xbf16>
    %42 = vector.shape_cast %41 : vector<1x16x8xbf16> to vector<16x8xbf16>
    %cst_20 = arith.constant dense<0.000000e+00> : vector<8x8xf32>
    %43 = tpu.matmul %40, %42, %cst_20 {dimension_numbers = #tpu.dot_dimension_numbers<[1], [0], [0], [1], [0, 0, 1, 1], [], []>} : vector<8x16xbf16>, vector<16x8xbf16>, vector<8x8xf32> -> vector<8x8xf32>
    %44 = vector.extract_strided_slice %33 {offsets = [6, 0], sizes = [2, 16], strides = [1, 1]} : vector<8x16xf32> to vector<2x16xf32>
    %45 = vector.extract_strided_slice %33 {offsets = [0, 0], sizes = [6, 16], strides = [1, 1]} : vector<8x16xf32> to vector<6x16xf32>
    %46 = tpu.concatenate %44, %45 in 0 : vector<2x16xf32>, vector<6x16xf32> -> vector<8x16xf32>
    %c0_21 = arith.constant 0 : index
    %c1 = arith.constant 1 : index
    %47 = vector.load %arg6[%c0_21, %c1] : memref<8x9xf32, #tpu.memory_space<vmem>>, vector<8x1xf32>
    %48 = vector.broadcast %47 : vector<8x1xf32> to vector<8x16xf32>
    %49 = arith.mulf %46, %48 : vector<8x16xf32>
    %50 = arith.truncf %49 : vector<8x16xf32> to vector<8x16xbf16>
    %c1_22 = arith.constant 1 : index
    %c0_23 = arith.constant 0 : index
    %c0_24 = arith.constant 0 : index
    %51 = vector.load %arg5[%c1_22, %c0_23, %c0_24] : memref<9x16x8xbf16, #tpu.memory_space<vmem>>, vector<1x16x8xbf16>
    %52 = vector.shape_cast %51 : vector<1x16x8xbf16> to vector<16x8xbf16>
    %cst_25 = arith.constant dense<0.000000e+00> : vector<8x8xf32>
    %53 = tpu.matmul %50, %52, %cst_25 {dimension_numbers = #tpu.dot_dimension_numbers<[1], [0], [0], [1], [0, 0, 1, 1], [], []>} : vector<8x16xbf16>, vector<16x8xbf16>, vector<8x8xf32> -> vector<8x8xf32>
    %54 = arith.addf %43, %53 : vector<8x8xf32>
    %55 = vector.extract_strided_slice %33 {offsets = [7, 0], sizes = [1, 16], strides = [1, 1]} : vector<8x16xf32> to vector<1x16xf32>
    %56 = vector.extract_strided_slice %33 {offsets = [0, 0], sizes = [7, 16], strides = [1, 1]} : vector<8x16xf32> to vector<7x16xf32>
    %57 = tpu.concatenate %55, %56 in 0 : vector<1x16xf32>, vector<7x16xf32> -> vector<8x16xf32>
    %c0_26 = arith.constant 0 : index
    %c2 = arith.constant 2 : index
    %58 = vector.load %arg6[%c0_26, %c2] : memref<8x9xf32, #tpu.memory_space<vmem>>, vector<8x1xf32>
    %59 = vector.broadcast %58 : vector<8x1xf32> to vector<8x16xf32>
    %60 = arith.mulf %57, %59 : vector<8x16xf32>
    %61 = arith.truncf %60 : vector<8x16xf32> to vector<8x16xbf16>
    %c2_27 = arith.constant 2 : index
    %c0_28 = arith.constant 0 : index
    %c0_29 = arith.constant 0 : index
    %62 = vector.load %arg5[%c2_27, %c0_28, %c0_29] : memref<9x16x8xbf16, #tpu.memory_space<vmem>>, vector<1x16x8xbf16>
    %63 = vector.shape_cast %62 : vector<1x16x8xbf16> to vector<16x8xbf16>
    %cst_30 = arith.constant dense<0.000000e+00> : vector<8x8xf32>
    %64 = tpu.matmul %61, %63, %cst_30 {dimension_numbers = #tpu.dot_dimension_numbers<[1], [0], [0], [1], [0, 0, 1, 1], [], []>} : vector<8x16xbf16>, vector<16x8xbf16>, vector<8x8xf32> -> vector<8x8xf32>
    %65 = arith.addf %54, %64 : vector<8x8xf32>
    %66 = vector.extract_strided_slice %33 {offsets = [7, 0], sizes = [1, 16], strides = [1, 1]} : vector<8x16xf32> to vector<1x16xf32>
    %67 = vector.extract_strided_slice %33 {offsets = [0, 0], sizes = [7, 16], strides = [1, 1]} : vector<8x16xf32> to vector<7x16xf32>
    %68 = tpu.concatenate %66, %67 in 0 : vector<1x16xf32>, vector<7x16xf32> -> vector<8x16xf32>
    %c0_31 = arith.constant 0 : index
    %c3 = arith.constant 3 : index
    %69 = vector.load %arg6[%c0_31, %c3] : memref<8x9xf32, #tpu.memory_space<vmem>>, vector<8x1xf32>
    %70 = vector.broadcast %69 : vector<8x1xf32> to vector<8x16xf32>
    %71 = arith.mulf %68, %70 : vector<8x16xf32>
    %72 = arith.truncf %71 : vector<8x16xf32> to vector<8x16xbf16>
    %c3_32 = arith.constant 3 : index
    %c0_33 = arith.constant 0 : index
    %c0_34 = arith.constant 0 : index
    %73 = vector.load %arg5[%c3_32, %c0_33, %c0_34] : memref<9x16x8xbf16, #tpu.memory_space<vmem>>, vector<1x16x8xbf16>
    %74 = vector.shape_cast %73 : vector<1x16x8xbf16> to vector<16x8xbf16>
    %cst_35 = arith.constant dense<0.000000e+00> : vector<8x8xf32>
    %75 = tpu.matmul %72, %74, %cst_35 {dimension_numbers = #tpu.dot_dimension_numbers<[1], [0], [0], [1], [0, 0, 1, 1], [], []>} : vector<8x16xbf16>, vector<16x8xbf16>, vector<8x8xf32> -> vector<8x8xf32>
    %76 = arith.addf %65, %75 : vector<8x8xf32>
    %c0_36 = arith.constant 0 : index
    %c4 = arith.constant 4 : index
    %77 = vector.load %arg6[%c0_36, %c4] : memref<8x9xf32, #tpu.memory_space<vmem>>, vector<8x1xf32>
    %78 = vector.broadcast %77 : vector<8x1xf32> to vector<8x16xf32>
    %79 = arith.mulf %33, %78 : vector<8x16xf32>
    %80 = arith.truncf %79 : vector<8x16xf32> to vector<8x16xbf16>
    %c4_37 = arith.constant 4 : index
    %c0_38 = arith.constant 0 : index
    %c0_39 = arith.constant 0 : index
    %81 = vector.load %arg5[%c4_37, %c0_38, %c0_39] : memref<9x16x8xbf16, #tpu.memory_space<vmem>>, vector<1x16x8xbf16>
    %82 = vector.shape_cast %81 : vector<1x16x8xbf16> to vector<16x8xbf16>
    %cst_40 = arith.constant dense<0.000000e+00> : vector<8x8xf32>
    %83 = tpu.matmul %80, %82, %cst_40 {dimension_numbers = #tpu.dot_dimension_numbers<[1], [0], [0], [1], [0, 0, 1, 1], [], []>} : vector<8x16xbf16>, vector<16x8xbf16>, vector<8x8xf32> -> vector<8x8xf32>
    %84 = arith.addf %76, %83 : vector<8x8xf32>
    %85 = vector.extract_strided_slice %33 {offsets = [1, 0], sizes = [7, 16], strides = [1, 1]} : vector<8x16xf32> to vector<7x16xf32>
    %86 = vector.extract_strided_slice %33 {offsets = [0, 0], sizes = [1, 16], strides = [1, 1]} : vector<8x16xf32> to vector<1x16xf32>
    %87 = tpu.concatenate %85, %86 in 0 : vector<7x16xf32>, vector<1x16xf32> -> vector<8x16xf32>
    %c0_41 = arith.constant 0 : index
    %c5 = arith.constant 5 : index
    %88 = vector.load %arg6[%c0_41, %c5] : memref<8x9xf32, #tpu.memory_space<vmem>>, vector<8x1xf32>
    %89 = vector.broadcast %88 : vector<8x1xf32> to vector<8x16xf32>
    %90 = arith.mulf %87, %89 : vector<8x16xf32>
    %91 = arith.truncf %90 : vector<8x16xf32> to vector<8x16xbf16>
    %c5_42 = arith.constant 5 : index
    %c0_43 = arith.constant 0 : index
    %c0_44 = arith.constant 0 : index
    %92 = vector.load %arg5[%c5_42, %c0_43, %c0_44] : memref<9x16x8xbf16, #tpu.memory_space<vmem>>, vector<1x16x8xbf16>
    %93 = vector.shape_cast %92 : vector<1x16x8xbf16> to vector<16x8xbf16>
    %cst_45 = arith.constant dense<0.000000e+00> : vector<8x8xf32>
    %94 = tpu.matmul %91, %93, %cst_45 {dimension_numbers = #tpu.dot_dimension_numbers<[1], [0], [0], [1], [0, 0, 1, 1], [], []>} : vector<8x16xbf16>, vector<16x8xbf16>, vector<8x8xf32> -> vector<8x8xf32>
    %95 = arith.addf %84, %94 : vector<8x8xf32>
    %96 = vector.extract_strided_slice %33 {offsets = [1, 0], sizes = [7, 16], strides = [1, 1]} : vector<8x16xf32> to vector<7x16xf32>
    %97 = vector.extract_strided_slice %33 {offsets = [0, 0], sizes = [1, 16], strides = [1, 1]} : vector<8x16xf32> to vector<1x16xf32>
    %98 = tpu.concatenate %96, %97 in 0 : vector<7x16xf32>, vector<1x16xf32> -> vector<8x16xf32>
    %c0_46 = arith.constant 0 : index
    %c6 = arith.constant 6 : index
    %99 = vector.load %arg6[%c0_46, %c6] : memref<8x9xf32, #tpu.memory_space<vmem>>, vector<8x1xf32>
    %100 = vector.broadcast %99 : vector<8x1xf32> to vector<8x16xf32>
    %101 = arith.mulf %98, %100 : vector<8x16xf32>
    %102 = arith.truncf %101 : vector<8x16xf32> to vector<8x16xbf16>
    %c6_47 = arith.constant 6 : index
    %c0_48 = arith.constant 0 : index
    %c0_49 = arith.constant 0 : index
    %103 = vector.load %arg5[%c6_47, %c0_48, %c0_49] : memref<9x16x8xbf16, #tpu.memory_space<vmem>>, vector<1x16x8xbf16>
    %104 = vector.shape_cast %103 : vector<1x16x8xbf16> to vector<16x8xbf16>
    %cst_50 = arith.constant dense<0.000000e+00> : vector<8x8xf32>
    %105 = tpu.matmul %102, %104, %cst_50 {dimension_numbers = #tpu.dot_dimension_numbers<[1], [0], [0], [1], [0, 0, 1, 1], [], []>} : vector<8x16xbf16>, vector<16x8xbf16>, vector<8x8xf32> -> vector<8x8xf32>
    %106 = arith.addf %95, %105 : vector<8x8xf32>
    %107 = vector.extract_strided_slice %33 {offsets = [2, 0], sizes = [6, 16], strides = [1, 1]} : vector<8x16xf32> to vector<6x16xf32>
    %108 = vector.extract_strided_slice %33 {offsets = [0, 0], sizes = [2, 16], strides = [1, 1]} : vector<8x16xf32> to vector<2x16xf32>
    %109 = tpu.concatenate %107, %108 in 0 : vector<6x16xf32>, vector<2x16xf32> -> vector<8x16xf32>
    %c0_51 = arith.constant 0 : index
    %c7 = arith.constant 7 : index
    %110 = vector.load %arg6[%c0_51, %c7] : memref<8x9xf32, #tpu.memory_space<vmem>>, vector<8x1xf32>
    %111 = vector.broadcast %110 : vector<8x1xf32> to vector<8x16xf32>
    %112 = arith.mulf %109, %111 : vector<8x16xf32>
    %113 = arith.truncf %112 : vector<8x16xf32> to vector<8x16xbf16>
    %c7_52 = arith.constant 7 : index
    %c0_53 = arith.constant 0 : index
    %c0_54 = arith.constant 0 : index
    %114 = vector.load %arg5[%c7_52, %c0_53, %c0_54] : memref<9x16x8xbf16, #tpu.memory_space<vmem>>, vector<1x16x8xbf16>
    %115 = vector.shape_cast %114 : vector<1x16x8xbf16> to vector<16x8xbf16>
    %cst_55 = arith.constant dense<0.000000e+00> : vector<8x8xf32>
    %116 = tpu.matmul %113, %115, %cst_55 {dimension_numbers = #tpu.dot_dimension_numbers<[1], [0], [0], [1], [0, 0, 1, 1], [], []>} : vector<8x16xbf16>, vector<16x8xbf16>, vector<8x8xf32> -> vector<8x8xf32>
    %117 = arith.addf %106, %116 : vector<8x8xf32>
    %118 = vector.extract_strided_slice %33 {offsets = [3, 0], sizes = [5, 16], strides = [1, 1]} : vector<8x16xf32> to vector<5x16xf32>
    %119 = vector.extract_strided_slice %33 {offsets = [0, 0], sizes = [3, 16], strides = [1, 1]} : vector<8x16xf32> to vector<3x16xf32>
    %120 = tpu.concatenate %118, %119 in 0 : vector<5x16xf32>, vector<3x16xf32> -> vector<8x16xf32>
    %c0_56 = arith.constant 0 : index
    %c8 = arith.constant 8 : index
    %121 = vector.load %arg6[%c0_56, %c8] : memref<8x9xf32, #tpu.memory_space<vmem>>, vector<8x1xf32>
    %122 = vector.broadcast %121 : vector<8x1xf32> to vector<8x16xf32>
    %123 = arith.mulf %120, %122 : vector<8x16xf32>
    %124 = arith.truncf %123 : vector<8x16xf32> to vector<8x16xbf16>
    %c8_57 = arith.constant 8 : index
    %c0_58 = arith.constant 0 : index
    %c0_59 = arith.constant 0 : index
    %125 = vector.load %arg5[%c8_57, %c0_58, %c0_59] : memref<9x16x8xbf16, #tpu.memory_space<vmem>>, vector<1x16x8xbf16>
    %126 = vector.shape_cast %125 : vector<1x16x8xbf16> to vector<16x8xbf16>
    %cst_60 = arith.constant dense<0.000000e+00> : vector<8x8xf32>
    %127 = tpu.matmul %124, %126, %cst_60 {dimension_numbers = #tpu.dot_dimension_numbers<[1], [0], [0], [1], [0, 0, 1, 1], [], []>} : vector<8x16xbf16>, vector<16x8xbf16>, vector<8x8xf32> -> vector<8x8xf32>
    %128 = arith.addf %117, %127 : vector<8x8xf32>
    %c0_61 = arith.constant 0 : index
    %c0_62 = arith.constant 0 : index
    %129 = vector.load %arg7[%c0_61, %c0_62] : memref<8x8xf32, #tpu.memory_space<vmem>>, vector<8x8xf32>
    tpu.vector_store %arg7[%c0_61, %c0_62], %128 {strides = array<i32>} : memref<8x8xf32, #tpu.memory_space<vmem>>, vector<8x8xf32>,
    %cst_63 = arith.constant dense<0.000000e+00> : vector<8xf32>
    %130 = vector.multi_reduction <add>, %128, %cst_63 [0] : vector<8x8xf32> to vector<8xf32>
    %131 = vector.shape_cast %130 : vector<8xf32> to vector<1x8xf32>
    %132 = arith.mulf %128, %128 : vector<8x8xf32>
    %cst_64 = arith.constant dense<0.000000e+00> : vector<8xf32>
    %133 = vector.multi_reduction <add>, %132, %cst_64 [0] : vector<8x8xf32> to vector<8xf32>
    %134 = vector.shape_cast %133 : vector<8xf32> to vector<1x8xf32>
    %135 = tpu.concatenate %131, %134 in 0 : vector<1x8xf32>, vector<1x8xf32> -> vector<2x8xf32>
    %c0_65 = arith.constant 0 : index
    %c0_66 = arith.constant 0 : index
    %136 = vector.load %arg8[%c0_65, %c0_66] : memref<2x8xf32, #tpu.memory_space<vmem>>, vector<2x8xf32>
    tpu.vector_store %arg8[%c0_65, %c0_66], %135 {strides = array<i32>} : memref<2x8xf32, #tpu.memory_space<vmem>>, vector<2x8xf32>,
    return
  }
  func.func @transform_0(%arg0: i32) -> (i32, i32) {
    %c0_i32 = arith.constant 0 : i32
    %c0_i32_0 = arith.constant 0 : i32
    %c0_i32_1 = arith.constant 0 : i32
    return %c0_i32, %c0_i32_0 : i32, i32
  }
  func.func @transform_1(%arg0: i32) -> (i32, i32) {
    %c0_i32 = arith.constant 0 : i32
    %c0_i32_0 = arith.constant 0 : i32
    %c0_i32_1 = arith.constant 0 : i32
    return %c0_i32, %c0_i32_0 : i32, i32
  }
  func.func @transform_2(%arg0: i32) -> (i32, i32) {
    %c0_i32 = arith.constant 0 : i32
    %c0_i32_0 = arith.constant 0 : i32
    %c0_i32_1 = arith.constant 0 : i32
    return %c0_i32, %c0_i32_0 : i32, i32
  }
  func.func @transform_3(%arg0: i32) -> (i32, i32) {
    %c0_i32 = arith.constant 0 : i32
    %c0_i32_0 = arith.constant 0 : i32
    %c0_i32_1 = arith.constant 0 : i32
    return %c0_i32, %c0_i32_0 : i32, i32
  }
  func.func @transform_4(%arg0: i32) -> (i32, i32, i32) {
    %c0_i32 = arith.constant 0 : i32
    %c0_i32_0 = arith.constant 0 : i32
    %c0_i32_1 = arith.constant 0 : i32
    %c0_i32_2 = arith.constant 0 : i32
    return %c0_i32, %c0_i32_0, %c0_i32_1 : i32, i32, i32
  }
  func.func @transform_5(%arg0: i32) -> (i32, i32) {
    %c0_i32 = arith.constant 0 : i32
    %c0_i32_0 = arith.constant 0 : i32
    %c0_i32_1 = arith.constant 0 : i32
    return %c0_i32, %c0_i32_0 : i32, i32
  }
  func.func @transform_6(%arg0: i32) -> (i32, i32) {
    %c0_i32 = arith.constant 0 : i32
    %c0_i32_0 = arith.constant 0 : i32
    %c0_i32_1 = arith.constant 0 : i32
    return %c0_i32, %c0_i32_0 : i32, i32
  }
  func.func @transform_7(%arg0: i32) -> (i32, i32) {
    %c0_i32 = arith.constant 0 : i32
    %c0_i32_0 = arith.constant 0 : i32
    %c0_i32_1 = arith.constant 0 : i32
    return %c0_i32, %c0_i32_0 : i32, i32
  }
}

module attributes {stable_mosaic.version = 11 : i64} {
  func.func @kernel(%arg0: i32, %arg1: memref<8x16xf32, #tpu.memory_space<vmem>>, %arg2: memref<8x8xf32, #tpu.memory_space<vmem>>, %arg3: memref<1x16xf32, #tpu.memory_space<vmem>>, %arg4: memref<1x8xf32, #tpu.memory_space<vmem>>, %arg5: memref<1x16xf32, #tpu.memory_space<vmem>>, %arg6: memref<1x8xf32, #tpu.memory_space<vmem>>, %arg7: memref<16x16xbf16, #tpu.memory_space<vmem>>, %arg8: memref<8x16xbf16, #tpu.memory_space<vmem>>, %arg9: memref<9x16x8xbf16, #tpu.memory_space<vmem>>, %arg10: memref<8x9xf32, #tpu.memory_space<vmem>>, %arg11: memref<8x8xf32, #tpu.memory_space<vmem>>, %arg12: memref<2x8xf32, #tpu.memory_space<vmem>>) attributes {dimension_semantics = [#tpu.dimension_semantics<arbitrary>], iteration_bounds = array<i64: 1>, scalar_prefetch = 0 : i64, scratch_operands = 0 : i64, tpu.core_type = #tpu.core_type<tc>, window_params = [{pipeline_mode = #tpu.pipeline_mode<synchronous>, transform_indices = @transform_0, window_bounds = array<i64: 8, 16>}, {pipeline_mode = #tpu.pipeline_mode<synchronous>, transform_indices = @transform_1, window_bounds = array<i64: 8, 8>}, {pipeline_mode = #tpu.pipeline_mode<synchronous>, transform_indices = @transform_2, window_bounds = array<i64: 1, 16>}, {pipeline_mode = #tpu.pipeline_mode<synchronous>, transform_indices = @transform_3, window_bounds = array<i64: 1, 8>}, {pipeline_mode = #tpu.pipeline_mode<synchronous>, transform_indices = @transform_4, window_bounds = array<i64: 1, 16>}, {pipeline_mode = #tpu.pipeline_mode<synchronous>, transform_indices = @transform_5, window_bounds = array<i64: 1, 8>}, {pipeline_mode = #tpu.pipeline_mode<synchronous>, transform_indices = @transform_6, window_bounds = array<i64: 16, 16>}, {pipeline_mode = #tpu.pipeline_mode<synchronous>, transform_indices = @transform_7, window_bounds = array<i64: 8, 16>}, {pipeline_mode = #tpu.pipeline_mode<synchronous>, transform_indices = @transform_8, window_bounds = array<i64: 9, 16, 8>}, {pipeline_mode = #tpu.pipeline_mode<synchronous>, transform_indices = @transform_9, window_bounds = array<i64: 8, 9>}, {pipeline_mode = #tpu.pipeline_mode<synchronous>, transform_indices = @transform_10, window_bounds = array<i64: 8, 8>}, {pipeline_mode = #tpu.pipeline_mode<synchronous>, transform_indices = @transform_11, window_bounds = array<i64: 2, 8>}]} {
    %c0 = arith.constant 0 : index
    %c0_0 = arith.constant 0 : index
    %0 = vector.load %arg1[%c0, %c0_0] : memref<8x16xf32, #tpu.memory_space<vmem>>, vector<8x16xf32>
    %c0_1 = arith.constant 0 : index
    %c0_2 = arith.constant 0 : index
    %1 = vector.load %arg3[%c0_1, %c0_2] : memref<1x16xf32, #tpu.memory_space<vmem>>, vector<1x16xf32>
    %2 = vector.broadcast %1 : vector<1x16xf32> to vector<8x16xf32>
    %3 = arith.mulf %0, %2 : vector<8x16xf32>
    %c0_3 = arith.constant 0 : index
    %c0_4 = arith.constant 0 : index
    %4 = vector.load %arg5[%c0_3, %c0_4] : memref<1x16xf32, #tpu.memory_space<vmem>>, vector<1x16xf32>
    %5 = vector.broadcast %4 : vector<1x16xf32> to vector<8x16xf32>
    %6 = arith.addf %3, %5 : vector<8x16xf32>
    %cst = arith.constant 0.000000e+00 : f32
    %7 = vector.broadcast %cst : f32 to vector<8x16xf32>
    %8 = arith.maximumf %6, %7 : vector<8x16xf32>
    %9 = arith.truncf %8 : vector<8x16xf32> to vector<8x16xbf16>
    %c0_5 = arith.constant 0 : index
    %c0_6 = arith.constant 0 : index
    %10 = vector.load %arg7[%c0_5, %c0_6] : memref<16x16xbf16, #tpu.memory_space<vmem>>, vector<16x16xbf16>
    %cst_7 = arith.constant dense<0.000000e+00> : vector<8x16xf32>
    %11 = tpu.matmul %9, %10, %cst_7 {dimension_numbers = #tpu.dot_dimension_numbers<[1], [0], [0], [1], [0, 0, 1, 1], [], []>} : vector<8x16xbf16>, vector<16x16xbf16>, vector<8x16xf32> -> vector<8x16xf32>
    %c0_8 = arith.constant 0 : index
    %c0_9 = arith.constant 0 : index
    %12 = vector.load %arg2[%c0_8, %c0_9] : memref<8x8xf32, #tpu.memory_space<vmem>>, vector<8x8xf32>
    %c0_10 = arith.constant 0 : index
    %c0_11 = arith.constant 0 : index
    %13 = vector.load %arg4[%c0_10, %c0_11] : memref<1x8xf32, #tpu.memory_space<vmem>>, vector<1x8xf32>
    %14 = vector.broadcast %13 : vector<1x8xf32> to vector<8x8xf32>
    %15 = arith.mulf %12, %14 : vector<8x8xf32>
    %c0_12 = arith.constant 0 : index
    %c0_13 = arith.constant 0 : index
    %16 = vector.load %arg6[%c0_12, %c0_13] : memref<1x8xf32, #tpu.memory_space<vmem>>, vector<1x8xf32>
    %17 = vector.broadcast %16 : vector<1x8xf32> to vector<8x8xf32>
    %18 = arith.addf %15, %17 : vector<8x8xf32>
    %cst_14 = arith.constant 0.000000e+00 : f32
    %19 = vector.broadcast %cst_14 : f32 to vector<8x8xf32>
    %20 = arith.maximumf %18, %19 : vector<8x8xf32>
    %21 = arith.truncf %20 : vector<8x8xf32> to vector<8x8xbf16>
    %c0_15 = arith.constant 0 : index
    %c0_16 = arith.constant 0 : index
    %22 = vector.load %arg8[%c0_15, %c0_16] : memref<8x16xbf16, #tpu.memory_space<vmem>>, vector<8x16xbf16>
    %cst_17 = arith.constant dense<0.000000e+00> : vector<8x16xf32>
    %23 = tpu.matmul %21, %22, %cst_17 {dimension_numbers = #tpu.dot_dimension_numbers<[1], [0], [0], [1], [0, 0, 1, 1], [], []>} : vector<8x8xbf16>, vector<8x16xbf16>, vector<8x16xf32> -> vector<8x16xf32>
    %24 = arith.addf %11, %23 : vector<8x16xf32>
    %cst_18 = arith.constant dense<0.000000e+00> : vector<16xf32>
    %25 = vector.multi_reduction <add>, %24, %cst_18 [0] : vector<8x16xf32> to vector<16xf32>
    %26 = vector.shape_cast %25 : vector<16xf32> to vector<1x16xf32>
    %cst_19 = arith.constant 1.250000e-01 : f32
    %27 = vector.broadcast %cst_19 : f32 to vector<1x16xf32>
    %28 = arith.mulf %26, %27 : vector<1x16xf32>
    %29 = arith.mulf %24, %24 : vector<8x16xf32>
    %cst_20 = arith.constant dense<0.000000e+00> : vector<16xf32>
    %30 = vector.multi_reduction <add>, %29, %cst_20 [0] : vector<8x16xf32> to vector<16xf32>
    %31 = vector.shape_cast %30 : vector<16xf32> to vector<1x16xf32>
    %cst_21 = arith.constant 1.250000e-01 : f32
    %32 = vector.broadcast %cst_21 : f32 to vector<1x16xf32>
    %33 = arith.mulf %31, %32 : vector<1x16xf32>
    %34 = arith.mulf %28, %28 : vector<1x16xf32>
    %35 = arith.subf %33, %34 : vector<1x16xf32>
    %cst_22 = arith.constant 0.000000e+00 : f32
    %36 = vector.broadcast %cst_22 : f32 to vector<1x16xf32>
    %37 = arith.maximumf %35, %36 : vector<1x16xf32>
    %38 = vector.broadcast %28 : vector<1x16xf32> to vector<8x16xf32>
    %39 = arith.subf %24, %38 : vector<8x16xf32>
    %cst_23 = arith.constant 9.99999974E-6 : f32
    %40 = vector.broadcast %cst_23 : f32 to vector<1x16xf32>
    %41 = arith.addf %37, %40 : vector<1x16xf32>
    %42 = math.rsqrt %41 : vector<1x16xf32>
    %43 = vector.broadcast %42 : vector<1x16xf32> to vector<8x16xf32>
    %44 = arith.mulf %39, %43 : vector<8x16xf32>
    %cst_24 = arith.constant 0.000000e+00 : f32
    %45 = vector.broadcast %cst_24 : f32 to vector<8x16xf32>
    %46 = arith.maximumf %44, %45 : vector<8x16xf32>
    %47 = vector.extract_strided_slice %46 {offsets = [5, 0], sizes = [3, 16], strides = [1, 1]} : vector<8x16xf32> to vector<3x16xf32>
    %48 = vector.extract_strided_slice %46 {offsets = [0, 0], sizes = [5, 16], strides = [1, 1]} : vector<8x16xf32> to vector<5x16xf32>
    %49 = tpu.concatenate %47, %48 in 0 : vector<3x16xf32>, vector<5x16xf32> -> vector<8x16xf32>
    %c0_25 = arith.constant 0 : index
    %c0_26 = arith.constant 0 : index
    %50 = vector.load %arg10[%c0_25, %c0_26] : memref<8x9xf32, #tpu.memory_space<vmem>>, vector<8x1xf32>
    %51 = vector.broadcast %50 : vector<8x1xf32> to vector<8x16xf32>
    %52 = arith.mulf %49, %51 : vector<8x16xf32>
    %53 = arith.truncf %52 : vector<8x16xf32> to vector<8x16xbf16>
    %c0_27 = arith.constant 0 : index
    %c0_28 = arith.constant 0 : index
    %c0_29 = arith.constant 0 : index
    %54 = vector.load %arg9[%c0_27, %c0_28, %c0_29] : memref<9x16x8xbf16, #tpu.memory_space<vmem>>, vector<1x16x8xbf16>
    %55 = vector.shape_cast %54 : vector<1x16x8xbf16> to vector<16x8xbf16>
    %cst_30 = arith.constant dense<0.000000e+00> : vector<8x8xf32>
    %56 = tpu.matmul %53, %55, %cst_30 {dimension_numbers = #tpu.dot_dimension_numbers<[1], [0], [0], [1], [0, 0, 1, 1], [], []>} : vector<8x16xbf16>, vector<16x8xbf16>, vector<8x8xf32> -> vector<8x8xf32>
    %57 = vector.extract_strided_slice %46 {offsets = [6, 0], sizes = [2, 16], strides = [1, 1]} : vector<8x16xf32> to vector<2x16xf32>
    %58 = vector.extract_strided_slice %46 {offsets = [0, 0], sizes = [6, 16], strides = [1, 1]} : vector<8x16xf32> to vector<6x16xf32>
    %59 = tpu.concatenate %57, %58 in 0 : vector<2x16xf32>, vector<6x16xf32> -> vector<8x16xf32>
    %c0_31 = arith.constant 0 : index
    %c1 = arith.constant 1 : index
    %60 = vector.load %arg10[%c0_31, %c1] : memref<8x9xf32, #tpu.memory_space<vmem>>, vector<8x1xf32>
    %61 = vector.broadcast %60 : vector<8x1xf32> to vector<8x16xf32>
    %62 = arith.mulf %59, %61 : vector<8x16xf32>
    %63 = arith.truncf %62 : vector<8x16xf32> to vector<8x16xbf16>
    %c1_32 = arith.constant 1 : index
    %c0_33 = arith.constant 0 : index
    %c0_34 = arith.constant 0 : index
    %64 = vector.load %arg9[%c1_32, %c0_33, %c0_34] : memref<9x16x8xbf16, #tpu.memory_space<vmem>>, vector<1x16x8xbf16>
    %65 = vector.shape_cast %64 : vector<1x16x8xbf16> to vector<16x8xbf16>
    %cst_35 = arith.constant dense<0.000000e+00> : vector<8x8xf32>
    %66 = tpu.matmul %63, %65, %cst_35 {dimension_numbers = #tpu.dot_dimension_numbers<[1], [0], [0], [1], [0, 0, 1, 1], [], []>} : vector<8x16xbf16>, vector<16x8xbf16>, vector<8x8xf32> -> vector<8x8xf32>
    %67 = arith.addf %56, %66 : vector<8x8xf32>
    %68 = vector.extract_strided_slice %46 {offsets = [7, 0], sizes = [1, 16], strides = [1, 1]} : vector<8x16xf32> to vector<1x16xf32>
    %69 = vector.extract_strided_slice %46 {offsets = [0, 0], sizes = [7, 16], strides = [1, 1]} : vector<8x16xf32> to vector<7x16xf32>
    %70 = tpu.concatenate %68, %69 in 0 : vector<1x16xf32>, vector<7x16xf32> -> vector<8x16xf32>
    %c0_36 = arith.constant 0 : index
    %c2 = arith.constant 2 : index
    %71 = vector.load %arg10[%c0_36, %c2] : memref<8x9xf32, #tpu.memory_space<vmem>>, vector<8x1xf32>
    %72 = vector.broadcast %71 : vector<8x1xf32> to vector<8x16xf32>
    %73 = arith.mulf %70, %72 : vector<8x16xf32>
    %74 = arith.truncf %73 : vector<8x16xf32> to vector<8x16xbf16>
    %c2_37 = arith.constant 2 : index
    %c0_38 = arith.constant 0 : index
    %c0_39 = arith.constant 0 : index
    %75 = vector.load %arg9[%c2_37, %c0_38, %c0_39] : memref<9x16x8xbf16, #tpu.memory_space<vmem>>, vector<1x16x8xbf16>
    %76 = vector.shape_cast %75 : vector<1x16x8xbf16> to vector<16x8xbf16>
    %cst_40 = arith.constant dense<0.000000e+00> : vector<8x8xf32>
    %77 = tpu.matmul %74, %76, %cst_40 {dimension_numbers = #tpu.dot_dimension_numbers<[1], [0], [0], [1], [0, 0, 1, 1], [], []>} : vector<8x16xbf16>, vector<16x8xbf16>, vector<8x8xf32> -> vector<8x8xf32>
    %78 = arith.addf %67, %77 : vector<8x8xf32>
    %79 = vector.extract_strided_slice %46 {offsets = [7, 0], sizes = [1, 16], strides = [1, 1]} : vector<8x16xf32> to vector<1x16xf32>
    %80 = vector.extract_strided_slice %46 {offsets = [0, 0], sizes = [7, 16], strides = [1, 1]} : vector<8x16xf32> to vector<7x16xf32>
    %81 = tpu.concatenate %79, %80 in 0 : vector<1x16xf32>, vector<7x16xf32> -> vector<8x16xf32>
    %c0_41 = arith.constant 0 : index
    %c3 = arith.constant 3 : index
    %82 = vector.load %arg10[%c0_41, %c3] : memref<8x9xf32, #tpu.memory_space<vmem>>, vector<8x1xf32>
    %83 = vector.broadcast %82 : vector<8x1xf32> to vector<8x16xf32>
    %84 = arith.mulf %81, %83 : vector<8x16xf32>
    %85 = arith.truncf %84 : vector<8x16xf32> to vector<8x16xbf16>
    %c3_42 = arith.constant 3 : index
    %c0_43 = arith.constant 0 : index
    %c0_44 = arith.constant 0 : index
    %86 = vector.load %arg9[%c3_42, %c0_43, %c0_44] : memref<9x16x8xbf16, #tpu.memory_space<vmem>>, vector<1x16x8xbf16>
    %87 = vector.shape_cast %86 : vector<1x16x8xbf16> to vector<16x8xbf16>
    %cst_45 = arith.constant dense<0.000000e+00> : vector<8x8xf32>
    %88 = tpu.matmul %85, %87, %cst_45 {dimension_numbers = #tpu.dot_dimension_numbers<[1], [0], [0], [1], [0, 0, 1, 1], [], []>} : vector<8x16xbf16>, vector<16x8xbf16>, vector<8x8xf32> -> vector<8x8xf32>
    %89 = arith.addf %78, %88 : vector<8x8xf32>
    %c0_46 = arith.constant 0 : index
    %c4 = arith.constant 4 : index
    %90 = vector.load %arg10[%c0_46, %c4] : memref<8x9xf32, #tpu.memory_space<vmem>>, vector<8x1xf32>
    %91 = vector.broadcast %90 : vector<8x1xf32> to vector<8x16xf32>
    %92 = arith.mulf %46, %91 : vector<8x16xf32>
    %93 = arith.truncf %92 : vector<8x16xf32> to vector<8x16xbf16>
    %c4_47 = arith.constant 4 : index
    %c0_48 = arith.constant 0 : index
    %c0_49 = arith.constant 0 : index
    %94 = vector.load %arg9[%c4_47, %c0_48, %c0_49] : memref<9x16x8xbf16, #tpu.memory_space<vmem>>, vector<1x16x8xbf16>
    %95 = vector.shape_cast %94 : vector<1x16x8xbf16> to vector<16x8xbf16>
    %cst_50 = arith.constant dense<0.000000e+00> : vector<8x8xf32>
    %96 = tpu.matmul %93, %95, %cst_50 {dimension_numbers = #tpu.dot_dimension_numbers<[1], [0], [0], [1], [0, 0, 1, 1], [], []>} : vector<8x16xbf16>, vector<16x8xbf16>, vector<8x8xf32> -> vector<8x8xf32>
    %97 = arith.addf %89, %96 : vector<8x8xf32>
    %98 = vector.extract_strided_slice %46 {offsets = [1, 0], sizes = [7, 16], strides = [1, 1]} : vector<8x16xf32> to vector<7x16xf32>
    %99 = vector.extract_strided_slice %46 {offsets = [0, 0], sizes = [1, 16], strides = [1, 1]} : vector<8x16xf32> to vector<1x16xf32>
    %100 = tpu.concatenate %98, %99 in 0 : vector<7x16xf32>, vector<1x16xf32> -> vector<8x16xf32>
    %c0_51 = arith.constant 0 : index
    %c5 = arith.constant 5 : index
    %101 = vector.load %arg10[%c0_51, %c5] : memref<8x9xf32, #tpu.memory_space<vmem>>, vector<8x1xf32>
    %102 = vector.broadcast %101 : vector<8x1xf32> to vector<8x16xf32>
    %103 = arith.mulf %100, %102 : vector<8x16xf32>
    %104 = arith.truncf %103 : vector<8x16xf32> to vector<8x16xbf16>
    %c5_52 = arith.constant 5 : index
    %c0_53 = arith.constant 0 : index
    %c0_54 = arith.constant 0 : index
    %105 = vector.load %arg9[%c5_52, %c0_53, %c0_54] : memref<9x16x8xbf16, #tpu.memory_space<vmem>>, vector<1x16x8xbf16>
    %106 = vector.shape_cast %105 : vector<1x16x8xbf16> to vector<16x8xbf16>
    %cst_55 = arith.constant dense<0.000000e+00> : vector<8x8xf32>
    %107 = tpu.matmul %104, %106, %cst_55 {dimension_numbers = #tpu.dot_dimension_numbers<[1], [0], [0], [1], [0, 0, 1, 1], [], []>} : vector<8x16xbf16>, vector<16x8xbf16>, vector<8x8xf32> -> vector<8x8xf32>
    %108 = arith.addf %97, %107 : vector<8x8xf32>
    %109 = vector.extract_strided_slice %46 {offsets = [1, 0], sizes = [7, 16], strides = [1, 1]} : vector<8x16xf32> to vector<7x16xf32>
    %110 = vector.extract_strided_slice %46 {offsets = [0, 0], sizes = [1, 16], strides = [1, 1]} : vector<8x16xf32> to vector<1x16xf32>
    %111 = tpu.concatenate %109, %110 in 0 : vector<7x16xf32>, vector<1x16xf32> -> vector<8x16xf32>
    %c0_56 = arith.constant 0 : index
    %c6 = arith.constant 6 : index
    %112 = vector.load %arg10[%c0_56, %c6] : memref<8x9xf32, #tpu.memory_space<vmem>>, vector<8x1xf32>
    %113 = vector.broadcast %112 : vector<8x1xf32> to vector<8x16xf32>
    %114 = arith.mulf %111, %113 : vector<8x16xf32>
    %115 = arith.truncf %114 : vector<8x16xf32> to vector<8x16xbf16>
    %c6_57 = arith.constant 6 : index
    %c0_58 = arith.constant 0 : index
    %c0_59 = arith.constant 0 : index
    %116 = vector.load %arg9[%c6_57, %c0_58, %c0_59] : memref<9x16x8xbf16, #tpu.memory_space<vmem>>, vector<1x16x8xbf16>
    %117 = vector.shape_cast %116 : vector<1x16x8xbf16> to vector<16x8xbf16>
    %cst_60 = arith.constant dense<0.000000e+00> : vector<8x8xf32>
    %118 = tpu.matmul %115, %117, %cst_60 {dimension_numbers = #tpu.dot_dimension_numbers<[1], [0], [0], [1], [0, 0, 1, 1], [], []>} : vector<8x16xbf16>, vector<16x8xbf16>, vector<8x8xf32> -> vector<8x8xf32>
    %119 = arith.addf %108, %118 : vector<8x8xf32>
    %120 = vector.extract_strided_slice %46 {offsets = [2, 0], sizes = [6, 16], strides = [1, 1]} : vector<8x16xf32> to vector<6x16xf32>
    %121 = vector.extract_strided_slice %46 {offsets = [0, 0], sizes = [2, 16], strides = [1, 1]} : vector<8x16xf32> to vector<2x16xf32>
    %122 = tpu.concatenate %120, %121 in 0 : vector<6x16xf32>, vector<2x16xf32> -> vector<8x16xf32>
    %c0_61 = arith.constant 0 : index
    %c7 = arith.constant 7 : index
    %123 = vector.load %arg10[%c0_61, %c7] : memref<8x9xf32, #tpu.memory_space<vmem>>, vector<8x1xf32>
    %124 = vector.broadcast %123 : vector<8x1xf32> to vector<8x16xf32>
    %125 = arith.mulf %122, %124 : vector<8x16xf32>
    %126 = arith.truncf %125 : vector<8x16xf32> to vector<8x16xbf16>
    %c7_62 = arith.constant 7 : index
    %c0_63 = arith.constant 0 : index
    %c0_64 = arith.constant 0 : index
    %127 = vector.load %arg9[%c7_62, %c0_63, %c0_64] : memref<9x16x8xbf16, #tpu.memory_space<vmem>>, vector<1x16x8xbf16>
    %128 = vector.shape_cast %127 : vector<1x16x8xbf16> to vector<16x8xbf16>
    %cst_65 = arith.constant dense<0.000000e+00> : vector<8x8xf32>
    %129 = tpu.matmul %126, %128, %cst_65 {dimension_numbers = #tpu.dot_dimension_numbers<[1], [0], [0], [1], [0, 0, 1, 1], [], []>} : vector<8x16xbf16>, vector<16x8xbf16>, vector<8x8xf32> -> vector<8x8xf32>
    %130 = arith.addf %119, %129 : vector<8x8xf32>
    %131 = vector.extract_strided_slice %46 {offsets = [3, 0], sizes = [5, 16], strides = [1, 1]} : vector<8x16xf32> to vector<5x16xf32>
    %132 = vector.extract_strided_slice %46 {offsets = [0, 0], sizes = [3, 16], strides = [1, 1]} : vector<8x16xf32> to vector<3x16xf32>
    %133 = tpu.concatenate %131, %132 in 0 : vector<5x16xf32>, vector<3x16xf32> -> vector<8x16xf32>
    %c0_66 = arith.constant 0 : index
    %c8 = arith.constant 8 : index
    %134 = vector.load %arg10[%c0_66, %c8] : memref<8x9xf32, #tpu.memory_space<vmem>>, vector<8x1xf32>
    %135 = vector.broadcast %134 : vector<8x1xf32> to vector<8x16xf32>
    %136 = arith.mulf %133, %135 : vector<8x16xf32>
    %137 = arith.truncf %136 : vector<8x16xf32> to vector<8x16xbf16>
    %c8_67 = arith.constant 8 : index
    %c0_68 = arith.constant 0 : index
    %c0_69 = arith.constant 0 : index
    %138 = vector.load %arg9[%c8_67, %c0_68, %c0_69] : memref<9x16x8xbf16, #tpu.memory_space<vmem>>, vector<1x16x8xbf16>
    %139 = vector.shape_cast %138 : vector<1x16x8xbf16> to vector<16x8xbf16>
    %cst_70 = arith.constant dense<0.000000e+00> : vector<8x8xf32>
    %140 = tpu.matmul %137, %139, %cst_70 {dimension_numbers = #tpu.dot_dimension_numbers<[1], [0], [0], [1], [0, 0, 1, 1], [], []>} : vector<8x16xbf16>, vector<16x8xbf16>, vector<8x8xf32> -> vector<8x8xf32>
    %141 = arith.addf %130, %140 : vector<8x8xf32>
    %c0_71 = arith.constant 0 : index
    %c0_72 = arith.constant 0 : index
    %142 = vector.load %arg11[%c0_71, %c0_72] : memref<8x8xf32, #tpu.memory_space<vmem>>, vector<8x8xf32>
    tpu.vector_store %arg11[%c0_71, %c0_72], %141 {strides = array<i32>} : memref<8x8xf32, #tpu.memory_space<vmem>>, vector<8x8xf32>,
    %cst_73 = arith.constant dense<0.000000e+00> : vector<8xf32>
    %143 = vector.multi_reduction <add>, %141, %cst_73 [0] : vector<8x8xf32> to vector<8xf32>
    %144 = vector.shape_cast %143 : vector<8xf32> to vector<1x8xf32>
    %145 = arith.mulf %141, %141 : vector<8x8xf32>
    %cst_74 = arith.constant dense<0.000000e+00> : vector<8xf32>
    %146 = vector.multi_reduction <add>, %145, %cst_74 [0] : vector<8x8xf32> to vector<8xf32>
    %147 = vector.shape_cast %146 : vector<8xf32> to vector<1x8xf32>
    %148 = tpu.concatenate %144, %147 in 0 : vector<1x8xf32>, vector<1x8xf32> -> vector<2x8xf32>
    %c0_75 = arith.constant 0 : index
    %c0_76 = arith.constant 0 : index
    %149 = vector.load %arg12[%c0_75, %c0_76] : memref<2x8xf32, #tpu.memory_space<vmem>>, vector<2x8xf32>
    tpu.vector_store %arg12[%c0_75, %c0_76], %148 {strides = array<i32>} : memref<2x8xf32, #tpu.memory_space<vmem>>, vector<2x8xf32>,
    return
  }
  func.func @transform_0(%arg0: i32) -> (i32, i32) {
    %c0_i32 = arith.constant 0 : i32
    %c0_i32_0 = arith.constant 0 : i32
    %c0_i32_1 = arith.constant 0 : i32
    return %c0_i32, %c0_i32_0 : i32, i32
  }
  func.func @transform_1(%arg0: i32) -> (i32, i32) {
    %c0_i32 = arith.constant 0 : i32
    %c0_i32_0 = arith.constant 0 : i32
    %c0_i32_1 = arith.constant 0 : i32
    return %c0_i32, %c0_i32_0 : i32, i32
  }
  func.func @transform_2(%arg0: i32) -> (i32, i32) {
    %c0_i32 = arith.constant 0 : i32
    %c0_i32_0 = arith.constant 0 : i32
    %c0_i32_1 = arith.constant 0 : i32
    return %c0_i32, %c0_i32_0 : i32, i32
  }
  func.func @transform_3(%arg0: i32) -> (i32, i32) {
    %c0_i32 = arith.constant 0 : i32
    %c0_i32_0 = arith.constant 0 : i32
    %c0_i32_1 = arith.constant 0 : i32
    return %c0_i32, %c0_i32_0 : i32, i32
  }
  func.func @transform_4(%arg0: i32) -> (i32, i32) {
    %c0_i32 = arith.constant 0 : i32
    %c0_i32_0 = arith.constant 0 : i32
    %c0_i32_1 = arith.constant 0 : i32
    return %c0_i32, %c0_i32_0 : i32, i32
  }
  func.func @transform_5(%arg0: i32) -> (i32, i32) {
    %c0_i32 = arith.constant 0 : i32
    %c0_i32_0 = arith.constant 0 : i32
    %c0_i32_1 = arith.constant 0 : i32
    return %c0_i32, %c0_i32_0 : i32, i32
  }
  func.func @transform_6(%arg0: i32) -> (i32, i32) {
    %c0_i32 = arith.constant 0 : i32
    %c0_i32_0 = arith.constant 0 : i32
    %c0_i32_1 = arith.constant 0 : i32
    return %c0_i32, %c0_i32_0 : i32, i32
  }
  func.func @transform_7(%arg0: i32) -> (i32, i32) {
    %c0_i32 = arith.constant 0 : i32
    %c0_i32_0 = arith.constant 0 : i32
    %c0_i32_1 = arith.constant 0 : i32
    return %c0_i32, %c0_i32_0 : i32, i32
  }
  func.func @transform_8(%arg0: i32) -> (i32, i32, i32) {
    %c0_i32 = arith.constant 0 : i32
    %c0_i32_0 = arith.constant 0 : i32
    %c0_i32_1 = arith.constant 0 : i32
    %c0_i32_2 = arith.constant 0 : i32
    return %c0_i32, %c0_i32_0, %c0_i32_1 : i32, i32, i32
  }
  func.func @transform_9(%arg0: i32) -> (i32, i32) {
    %c0_i32 = arith.constant 0 : i32
    %c0_i32_0 = arith.constant 0 : i32
    %c0_i32_1 = arith.constant 0 : i32
    return %c0_i32, %c0_i32_0 : i32, i32
  }
  func.func @transform_10(%arg0: i32) -> (i32, i32) {
    %c0_i32 = arith.constant 0 : i32
    %c0_i32_0 = arith.constant 0 : i32
    %c0_i32_1 = arith.constant 0 : i32
    return %c0_i32, %c0_i32_0 : i32, i32
  }
  func.func @transform_11(%arg0: i32) -> (i32, i32) {
    %c0_i32 = arith.constant 0 : i32
    %c0_i32_0 = arith.constant 0 : i32
    %c0_i32_1 = arith.constant 0 : i32
    return %c0_i32, %c0_i32_0 : i32, i32
  }
}

module attributes {stable_mosaic.version = 11 : i64} {
  func.func @kernel(%arg0: i32, %arg1: memref<8x16xf32, #tpu.memory_space<vmem>>, %arg2: memref<8x8xf32, #tpu.memory_space<vmem>>, %arg3: memref<8x8xf32, #tpu.memory_space<vmem>>, %arg4: memref<1x16xf32, #tpu.memory_space<vmem>>, %arg5: memref<1x8xf32, #tpu.memory_space<vmem>>, %arg6: memref<1x8xf32, #tpu.memory_space<vmem>>, %arg7: memref<1x16xf32, #tpu.memory_space<vmem>>, %arg8: memref<1x8xf32, #tpu.memory_space<vmem>>, %arg9: memref<1x8xf32, #tpu.memory_space<vmem>>, %arg10: memref<16x6xf32, #tpu.memory_space<vmem>>, %arg11: memref<8x6xf32, #tpu.memory_space<vmem>>, %arg12: memref<8x6xf32, #tpu.memory_space<vmem>>, %arg13: memref<8x8xf32, #tpu.memory_space<vmem>>, %arg14: memref<1x6xf32, #tpu.memory_space<vmem>>, %arg15: memref<8x6xf32, #tpu.memory_space<vmem>>) attributes {dimension_semantics = [#tpu.dimension_semantics<arbitrary>], iteration_bounds = array<i64: 1>, scalar_prefetch = 0 : i64, scratch_operands = 0 : i64, tpu.core_type = #tpu.core_type<tc>, window_params = [{pipeline_mode = #tpu.pipeline_mode<synchronous>, transform_indices = @transform_0, window_bounds = array<i64: 8, 16>}, {pipeline_mode = #tpu.pipeline_mode<synchronous>, transform_indices = @transform_1, window_bounds = array<i64: 8, 8>}, {pipeline_mode = #tpu.pipeline_mode<synchronous>, transform_indices = @transform_2, window_bounds = array<i64: 8, 8>}, {pipeline_mode = #tpu.pipeline_mode<synchronous>, transform_indices = @transform_3, window_bounds = array<i64: 1, 16>}, {pipeline_mode = #tpu.pipeline_mode<synchronous>, transform_indices = @transform_4, window_bounds = array<i64: 1, 8>}, {pipeline_mode = #tpu.pipeline_mode<synchronous>, transform_indices = @transform_5, window_bounds = array<i64: 1, 8>}, {pipeline_mode = #tpu.pipeline_mode<synchronous>, transform_indices = @transform_6, window_bounds = array<i64: 1, 16>}, {pipeline_mode = #tpu.pipeline_mode<synchronous>, transform_indices = @transform_7, window_bounds = array<i64: 1, 8>}, {pipeline_mode = #tpu.pipeline_mode<synchronous>, transform_indices = @transform_8, window_bounds = array<i64: 1, 8>}, {pipeline_mode = #tpu.pipeline_mode<synchronous>, transform_indices = @transform_9, window_bounds = array<i64: 16, 6>}, {pipeline_mode = #tpu.pipeline_mode<synchronous>, transform_indices = @transform_10, window_bounds = array<i64: 8, 6>}, {pipeline_mode = #tpu.pipeline_mode<synchronous>, transform_indices = @transform_11, window_bounds = array<i64: 8, 6>}, {pipeline_mode = #tpu.pipeline_mode<synchronous>, transform_indices = @transform_12, window_bounds = array<i64: 8, 8>}, {pipeline_mode = #tpu.pipeline_mode<synchronous>, transform_indices = @transform_13, window_bounds = array<i64: 1, 6>}, {pipeline_mode = #tpu.pipeline_mode<synchronous>, transform_indices = @transform_14, window_bounds = array<i64: 8, 6>}]} {
    %c0 = arith.constant 0 : index
    %c0_0 = arith.constant 0 : index
    %0 = vector.load %arg1[%c0, %c0_0] : memref<8x16xf32, #tpu.memory_space<vmem>>, vector<8x16xf32>
    %c0_1 = arith.constant 0 : index
    %c0_2 = arith.constant 0 : index
    %1 = vector.load %arg4[%c0_1, %c0_2] : memref<1x16xf32, #tpu.memory_space<vmem>>, vector<1x16xf32>
    %2 = vector.broadcast %1 : vector<1x16xf32> to vector<8x16xf32>
    %3 = arith.mulf %0, %2 : vector<8x16xf32>
    %c0_3 = arith.constant 0 : index
    %c0_4 = arith.constant 0 : index
    %4 = vector.load %arg7[%c0_3, %c0_4] : memref<1x16xf32, #tpu.memory_space<vmem>>, vector<1x16xf32>
    %5 = vector.broadcast %4 : vector<1x16xf32> to vector<8x16xf32>
    %6 = arith.addf %3, %5 : vector<8x16xf32>
    %cst = arith.constant 0.000000e+00 : f32
    %7 = vector.broadcast %cst : f32 to vector<8x16xf32>
    %8 = arith.maximumf %6, %7 : vector<8x16xf32>
    %c0_5 = arith.constant 0 : index
    %c0_6 = arith.constant 0 : index
    %9 = vector.load %arg10[%c0_5, %c0_6] : memref<16x6xf32, #tpu.memory_space<vmem>>, vector<16x6xf32>
    %cst_7 = arith.constant dense<0.000000e+00> : vector<8x6xf32>
    %10 = tpu.matmul %8, %9, %cst_7 {dimension_numbers = #tpu.dot_dimension_numbers<[1], [0], [0], [1], [0, 0, 1, 1], [], []>} : vector<8x16xf32>, vector<16x6xf32>, vector<8x6xf32> -> vector<8x6xf32>
    %c0_8 = arith.constant 0 : index
    %c0_9 = arith.constant 0 : index
    %11 = vector.load %arg2[%c0_8, %c0_9] : memref<8x8xf32, #tpu.memory_space<vmem>>, vector<8x8xf32>
    %c0_10 = arith.constant 0 : index
    %c0_11 = arith.constant 0 : index
    %12 = vector.load %arg5[%c0_10, %c0_11] : memref<1x8xf32, #tpu.memory_space<vmem>>, vector<1x8xf32>
    %13 = vector.broadcast %12 : vector<1x8xf32> to vector<8x8xf32>
    %14 = arith.mulf %11, %13 : vector<8x8xf32>
    %c0_12 = arith.constant 0 : index
    %c0_13 = arith.constant 0 : index
    %15 = vector.load %arg8[%c0_12, %c0_13] : memref<1x8xf32, #tpu.memory_space<vmem>>, vector<1x8xf32>
    %16 = vector.broadcast %15 : vector<1x8xf32> to vector<8x8xf32>
    %17 = arith.addf %14, %16 : vector<8x8xf32>
    %cst_14 = arith.constant 0.000000e+00 : f32
    %18 = vector.broadcast %cst_14 : f32 to vector<8x8xf32>
    %19 = arith.maximumf %17, %18 : vector<8x8xf32>
    %c0_15 = arith.constant 0 : index
    %c0_16 = arith.constant 0 : index
    %20 = vector.load %arg11[%c0_15, %c0_16] : memref<8x6xf32, #tpu.memory_space<vmem>>, vector<8x6xf32>
    %cst_17 = arith.constant dense<0.000000e+00> : vector<8x6xf32>
    %21 = tpu.matmul %19, %20, %cst_17 {dimension_numbers = #tpu.dot_dimension_numbers<[1], [0], [0], [1], [0, 0, 1, 1], [], []>} : vector<8x8xf32>, vector<8x6xf32>, vector<8x6xf32> -> vector<8x6xf32>
    %22 = arith.addf %10, %21 : vector<8x6xf32>
    %c0_18 = arith.constant 0 : index
    %c0_19 = arith.constant 0 : index
    %23 = vector.load %arg3[%c0_18, %c0_19] : memref<8x8xf32, #tpu.memory_space<vmem>>, vector<8x8xf32>
    %c0_20 = arith.constant 0 : index
    %c0_21 = arith.constant 0 : index
    %24 = vector.load %arg6[%c0_20, %c0_21] : memref<1x8xf32, #tpu.memory_space<vmem>>, vector<1x8xf32>
    %25 = vector.broadcast %24 : vector<1x8xf32> to vector<8x8xf32>
    %26 = arith.mulf %23, %25 : vector<8x8xf32>
    %c0_22 = arith.constant 0 : index
    %c0_23 = arith.constant 0 : index
    %27 = vector.load %arg9[%c0_22, %c0_23] : memref<1x8xf32, #tpu.memory_space<vmem>>, vector<1x8xf32>
    %28 = vector.broadcast %27 : vector<1x8xf32> to vector<8x8xf32>
    %29 = arith.addf %26, %28 : vector<8x8xf32>
    %cst_24 = arith.constant 0.000000e+00 : f32
    %30 = vector.broadcast %cst_24 : f32 to vector<8x8xf32>
    %31 = arith.maximumf %29, %30 : vector<8x8xf32>
    %c0_25 = arith.constant 0 : index
    %c0_26 = arith.constant 0 : index
    %32 = vector.load %arg12[%c0_25, %c0_26] : memref<8x6xf32, #tpu.memory_space<vmem>>, vector<8x6xf32>
    %cst_27 = arith.constant dense<0.000000e+00> : vector<8x6xf32>
    %33 = tpu.matmul %31, %32, %cst_27 {dimension_numbers = #tpu.dot_dimension_numbers<[1], [0], [0], [1], [0, 0, 1, 1], [], []>} : vector<8x8xf32>, vector<8x6xf32>, vector<8x6xf32> -> vector<8x6xf32>
    %34 = arith.addf %22, %33 : vector<8x6xf32>
    %c0_28 = arith.constant 0 : index
    %c0_29 = arith.constant 0 : index
    %35 = vector.load %arg13[%c0_28, %c0_29] : memref<8x8xf32, #tpu.memory_space<vmem>>, vector<8x8xf32>
    %cst_30 = arith.constant dense<0.000000e+00> : vector<8x6xf32>
    %36 = tpu.matmul %35, %34, %cst_30 {dimension_numbers = #tpu.dot_dimension_numbers<[1], [0], [0], [1], [0, 0, 1, 1], [], []>} : vector<8x8xf32>, vector<8x6xf32>, vector<8x6xf32> -> vector<8x6xf32>
    %c0_31 = arith.constant 0 : index
    %c0_32 = arith.constant 0 : index
    %37 = vector.load %arg14[%c0_31, %c0_32] : memref<1x6xf32, #tpu.memory_space<vmem>>, vector<1x6xf32>
    %38 = vector.broadcast %37 : vector<1x6xf32> to vector<8x6xf32>
    %39 = arith.addf %36, %38 : vector<8x6xf32>
    %c0_33 = arith.constant 0 : index
    %c0_34 = arith.constant 0 : index
    %40 = vector.load %arg15[%c0_33, %c0_34] : memref<8x6xf32, #tpu.memory_space<vmem>>, vector<8x6xf32>
    tpu.vector_store %arg15[%c0_33, %c0_34], %39 {strides = array<i32>} : memref<8x6xf32, #tpu.memory_space<vmem>>, vector<8x6xf32>,
    return
  }
  func.func @transform_0(%arg0: i32) -> (i32, i32) {
    %c0_i32 = arith.constant 0 : i32
    %c0_i32_0 = arith.constant 0 : i32
    %c0_i32_1 = arith.constant 0 : i32
    return %c0_i32, %c0_i32_0 : i32, i32
  }
  func.func @transform_1(%arg0: i32) -> (i32, i32) {
    %c0_i32 = arith.constant 0 : i32
    %c0_i32_0 = arith.constant 0 : i32
    %c0_i32_1 = arith.constant 0 : i32
    return %c0_i32, %c0_i32_0 : i32, i32
  }
  func.func @transform_2(%arg0: i32) -> (i32, i32) {
    %c0_i32 = arith.constant 0 : i32
    %c0_i32_0 = arith.constant 0 : i32
    %c0_i32_1 = arith.constant 0 : i32
    return %c0_i32, %c0_i32_0 : i32, i32
  }
  func.func @transform_3(%arg0: i32) -> (i32, i32) {
    %c0_i32 = arith.constant 0 : i32
    %c0_i32_0 = arith.constant 0 : i32
    %c0_i32_1 = arith.constant 0 : i32
    return %c0_i32, %c0_i32_0 : i32, i32
  }
  func.func @transform_4(%arg0: i32) -> (i32, i32) {
    %c0_i32 = arith.constant 0 : i32
    %c0_i32_0 = arith.constant 0 : i32
    %c0_i32_1 = arith.constant 0 : i32
    return %c0_i32, %c0_i32_0 : i32, i32
  }
  func.func @transform_5(%arg0: i32) -> (i32, i32) {
    %c0_i32 = arith.constant 0 : i32
    %c0_i32_0 = arith.constant 0 : i32
    %c0_i32_1 = arith.constant 0 : i32
    return %c0_i32, %c0_i32_0 : i32, i32
  }
  func.func @transform_6(%arg0: i32) -> (i32, i32) {
    %c0_i32 = arith.constant 0 : i32
    %c0_i32_0 = arith.constant 0 : i32
    %c0_i32_1 = arith.constant 0 : i32
    return %c0_i32, %c0_i32_0 : i32, i32
  }
  func.func @transform_7(%arg0: i32) -> (i32, i32) {
    %c0_i32 = arith.constant 0 : i32
    %c0_i32_0 = arith.constant 0 : i32
    %c0_i32_1 = arith.constant 0 : i32
    return %c0_i32, %c0_i32_0 : i32, i32
  }
  func.func @transform_8(%arg0: i32) -> (i32, i32) {
    %c0_i32 = arith.constant 0 : i32
    %c0_i32_0 = arith.constant 0 : i32
    %c0_i32_1 = arith.constant 0 : i32
    return %c0_i32, %c0_i32_0 : i32, i32
  }
  func.func @transform_9(%arg0: i32) -> (i32, i32) {
    %c0_i32 = arith.constant 0 : i32
    %c0_i32_0 = arith.constant 0 : i32
    %c0_i32_1 = arith.constant 0 : i32
    return %c0_i32, %c0_i32_0 : i32, i32
  }
  func.func @transform_10(%arg0: i32) -> (i32, i32) {
    %c0_i32 = arith.constant 0 : i32
    %c0_i32_0 = arith.constant 0 : i32
    %c0_i32_1 = arith.constant 0 : i32
    return %c0_i32, %c0_i32_0 : i32, i32
  }
  func.func @transform_11(%arg0: i32) -> (i32, i32) {
    %c0_i32 = arith.constant 0 : i32
    %c0_i32_0 = arith.constant 0 : i32
    %c0_i32_1 = arith.constant 0 : i32
    return %c0_i32, %c0_i32_0 : i32, i32
  }
  func.func @transform_12(%arg0: i32) -> (i32, i32) {
    %c0_i32 = arith.constant 0 : i32
    %c0_i32_0 = arith.constant 0 : i32
    %c0_i32_1 = arith.constant 0 : i32
    return %c0_i32, %c0_i32_0 : i32, i32
  }
  func.func @transform_13(%arg0: i32) -> (i32, i32) {
    %c0_i32 = arith.constant 0 : i32
    %c0_i32_0 = arith.constant 0 : i32
    %c0_i32_1 = arith.constant 0 : i32
    return %c0_i32, %c0_i32_0 : i32, i32
  }
  func.func @transform_14(%arg0: i32) -> (i32, i32) {
    %c0_i32 = arith.constant 0 : i32
    %c0_i32_0 = arith.constant 0 : i32
    %c0_i32_1 = arith.constant 0 : i32
    return %c0_i32, %c0_i32_0 : i32, i32
  }
}

</mosaic_0001>

<bundles_post_ra>
// kernel: densenet_forward.9
= control target key start
LH: loop header
LB: loop body
LE: loop exit
PB: predicated region body
PF: predicated region fallthrough
CT: control target
= control target key end

     0   :  { %vm40_vm0 = vcmask 130048   ;;  %vm75_vm1 = vcmask 1040384   ;;  %vm77_vm2 = vcmask 123904   ;;  %s159_s0 = inlined_call_operand.vmem [shape: f32[32,16], index: 0, kind: input, shape index: {}]   ;;  %s160_s1 = inlined_call_operand.vmem [shape: f32[1,16], index: 1, kind: input, shape index: {}]   ;;  %s161_s2 = inlined_call_operand.vmem [shape: f32[1,16], index: 2, kind: input, shape index: {}]   ;;  %s162_s3 = inlined_call_operand.vmem [shape: f32[32,16], index: 3, kind: output, shape index: {0}]   ;;  %s163_s4 = inlined_call_operand.vmem [shape: f32[2,16], index: 4, kind: output, shape index: {1}]  }
   0x1   :  { %v16_v0 = vld [vmem:[%s159_s0] sm:$0xff]  ;;  %v17_v3 = vld [vmem:[%s159_s0 + $0x8] sm:$0xff]  ;;  %v18_v6 = vld [vmem:[%s159_s0 + $0x10] sm:$0xff] }
   0x2   :  { %v87_v1 = vld [vmem:[%s160_s1] ss:$0 sm:$0xff]  ;;  %v19_v7 = vld [vmem:[%s159_s0 + $0x18] sm:$0xff] }
   0x3   :  { %v88_v2 = vld [vmem:[%s161_s2] ss:$0 sm:$0xff]  ;;  %v24_v4 = vmul.f32 %v87_v1, %v16_v0  ;;  %v25_v5 = vmul.f32 %v87_v1, %v17_v3  ;;  %v26_v8 = vmul.f32 %v87_v1, %v18_v6  ;;  %v27_v9 = vmul.f32 %v87_v1, %v19_v7 }
   0x5   :  { %v32_v10 = vadd.f32 %v88_v2, %v24_v4  ;;  %v33_v11 = vadd.f32 %v88_v2, %v25_v5  ;;  %v34_v12 = vadd.f32 %v88_v2, %v26_v8  ;;  %v35_v13 = vadd.f32 %v88_v2, %v27_v9 }
   0x7   :  { %v36_v14 = vmax.f32 %v32_v10, 0.0  ;;  %v37_v15 = vmax.f32 %v33_v11, 0.0  ;;  %v38_v16 = vmax.f32 %v34_v12, 0.0  ;;  %v39_v17 = vmax.f32 %v35_v13, 0.0 }
   0x9   :  { %41 = vst.msk [vmem:[%s162_s3] sm:$0xff] %vm40_vm0, %v36_v14  ;;  %v45_v18 = vsel %vm40_vm0, %v36_v14, 0.0  ;;  %v58_v19 = vmul.f32 %v36_v14, %v36_v14  ;;  %v46_v20 = vsel %vm40_vm0, %v37_v15, 0.0  ;;  %v59_v21 = vmul.f32 %v37_v15, %v37_v15 }
   0xa   :  { %42 = vst.msk [vmem:[%s162_s3 + $0x8] sm:$0xff] %vm40_vm0, %v37_v15  ;;  %v47_v22 = vadd.f32 %v46_v20, %v45_v18  ;;  %v48_v23 = vsel %vm40_vm0, %v38_v16, 0.0  ;;  %v60_v24 = vmul.f32 %v38_v16, %v38_v16  ;;  %v50_v27 = vsel %vm40_vm0, %v39_v17, 0.0 }
   0xb   :  { %v62_v25 = vsel %vm40_vm0, %v58_v19, 0.0  ;;  %v63_v26 = vsel %vm40_vm0, %v59_v21, 0.0  ;;  %43 = vst.msk [vmem:[%s162_s3 + $0x10] sm:$0xff] %vm40_vm0, %v38_v16  ;;  %v61_v28 = vmul.f32 %v39_v17, %v39_v17 }
   0xc   :  { %v64_v29 = vadd.f32 %v63_v26, %v62_v25  ;;  %v49_v30 = vadd.f32 %v48_v23, %v47_v22  ;;  %v65_v31 = vsel %vm40_vm0, %v60_v24, 0.0  ;;  %44 = vst.msk [vmem:[%s162_s3 + $0x18] sm:$0xff] %vm40_vm0, %v39_v17 }
   0xd   :  { %v67_v32 = vsel %vm40_vm0, %v61_v28, 0.0 }
   0xe   :  { %v66_v33 = vadd.f32 %v65_v31, %v64_v29  ;;  %v51_v34 = vadd.f32 %v50_v27, %v49_v30 }
  0x10   :  { %v52_v35 = vrot.slane %v51_v34, 4  ;;  %v68_v36 = vadd.f32 %v67_v32, %v66_v33 }
  0x12   :  { %v53_v37 = vadd.f32 %v52_v35, %v51_v34  ;;  %v69_v38 = vrot.slane %v68_v36, 4 }
  0x14   :  { %v54_v39 = vrot.slane %v53_v37, 2  ;;  %v70_v40 = vadd.f32 %v69_v38, %v68_v36 }
  0x16   :  { %v55_v41 = vadd.f32 %v54_v39, %v53_v37  ;;  %v71_v42 = vrot.slane %v70_v40, 2 }
  0x18   :  { %v56_v43 = vrot.slane %v55_v41, 1  ;;  %v72_v44 = vadd.f32 %v71_v42, %v70_v40 }
  0x1a   :  { %v57_v45 = vadd.f32 %v56_v43, %v55_v41  ;;  %v73_v46 = vrot.slane %v72_v44, 1 }
  0x1c   :  { %v74_v47 = vadd.f32 %v73_v46, %v72_v44 }
  0x1e   :  { %v76_v48 = vsel %vm75_vm1, %v57_v45, %v74_v47 }
  0x1f   :  { %78 = vst.msk [vmem:[%s163_s4] sm:$0x3] %vm77_vm2, %v76_v48 }

// kernel: densenet_forward.8
= control target key start
LH: loop header
LB: loop body
LE: loop exit
PB: predicated region body
PF: predicated region fallthrough
CT: control target
= control target key end

     0   :  { %vm227_vm0 = vcmask 1041408   ;;  %vm202_vm1 = vcmask 556032   ;;  %vm329_vm2 = vcmask 130048   ;;  %vm436_vm3 = vcmask 1040384   ;;  %s901_s1 = inlined_call_operand.vmem [shape: bf16[196,16], index: 1, kind: input, shape index: {}]   ;;  %s902_s0 = inlined_call_operand.vmem [shape: bf16[128,196], index: 0, kind: input, shape index: {}]   ;;  %s903_s2 = inlined_call_operand.vmem [shape: f32[128,16], index: 2, kind: output, shape index: {0}]   ;;  %s904_s3 = inlined_call_operand.vmem [shape: f32[1,2,16], index: 3, kind: output, shape index: {1}]  }
   0x1   :  { %v591_v0 = vld [vmem:[%s901_s1 + $0x38] sm:$0xff]  ;;  %v54_v1 = vld [vmem:[%s901_s1 + $0x60] sm:$0x3]  ;;  %v590_v3 = vld [vmem:[%s901_s1 + $0x30] sm:$0xff]  ;;  %vm438_vm4 = vcmask 123904  }
   0x2   :  { %v176_v2 = vunpack.c.l.b16 %v54_v1  ;;  %231 = vmatpush.bf16.msra.mxu0 %v591_v0  ;;  %596 = vmatpush.bf16.msra.mxu2 %v591_v0  ;;  %v595_v6 = vld [vmem:[%s901_s1 + $0x58] sm:$0xff]  ;;  %v589_v7 = vld [vmem:[%s901_s1 + $0x28] sm:$0xff]  ;;  %v594_v8 = vld [vmem:[%s901_s1 + $0x50] sm:$0xff] }
   0x3   :  { %v588_v9 = vld [vmem:[%s901_s1 + $0x20] sm:$0xff]  ;;  %v593_v10 = vld [vmem:[%s901_s1 + $0x48] sm:$0xff]  ;;  %v587_v11 = vld [vmem:[%s901_s1 + $0x18] sm:$0xff] }
   0x4   :  { %v189_v4 = vpack.c.b16 %v176_v2, %v176_v2  ;;  %v592_v12 = vld [vmem:[%s901_s1 + $0x40] sm:$0xff]  ;;  %v586_v13 = vld [vmem:[%s901_s1 + $0x10] sm:$0xff]  ;;  %v452_v15 = vld [vmem:[%s902_s0 + $0x8] sm:$0xf0] }
   0x5   :  { %v568_v14 = vld [vmem:[%s902_s0 + $0x4] sm:$0xf]  ;;  %v578_v16 = vld [vmem:[%s902_s0 + $0x54] sm:$0xf]  ;;  %v492_v17 = vld [vmem:[%s902_s0 + $0x58] sm:$0xf0] }
   0x6   :  { %v229_v5 = vsel %vm227_vm0, %v189_v4, 0  ;;  %232 = vmatpush.bf16.msra.mxu0 %v590_v3  ;;  %597 = vmatpush.bf16.msra.mxu2 %v590_v3  ;;  %v455_v18 = vor.u32 %v568_v14, %v452_v15  ;;  %v585_v19 = vld [vmem:[%s901_s1 + $0x8] sm:$0xff]  ;;  %v495_v20 = vor.u32 %v578_v16, %v492_v17  ;;  %v584_v21 = vld [vmem:[%s901_s1] sm:$0xff]  ;;  %v570_v28 = vld [vmem:[%s902_s0 + $0x14] sm:$0xf] }
   0x7   :  { %283 = vmatpush.bf16.msra.mxu1 %v229_v5  ;;  %604 = vmatpush.bf16.msra.mxu3 %v229_v5  ;;  %v450_v22 = vld [vmem:[%s902_s0] sm:$0xf]  ;;  %v569_v23 = vld [vmem:[%s902_s0 + $0x4] sm:$0xf0]  ;;  %v460_v29 = vld [vmem:[%s902_s0 + $0x18] sm:$0xf0] }
   0x8   :  { %v482_v24 = vld [vmem:[%s902_s0 + $0x40] sm:$0xf]  ;;  %v577_v25 = vld [vmem:[%s902_s0 + $0x44] sm:$0xf0]  ;;  %v451_v26 = vor.u32 %v569_v23, %v450_v22  ;;  %v580_v30 = vld [vmem:[%s902_s0 + $0x64] sm:$0xf]  ;;  %v463_v32 = vor.u32 %v570_v28, %v460_v29 }
   0x9   :  { %v483_v27 = vor.u32 %v577_v25, %v482_v24  ;;  %v500_v31 = vld [vmem:[%s902_s0 + $0x68] sm:$0xf0]  ;;  %v458_v34 = vld [vmem:[%s902_s0 + $0x10] sm:$0xf]  ;;  %v571_v35 = vld [vmem:[%s902_s0 + $0x14] sm:$0xf0] }
   0xa   :  { %233 = vmatpush.bf16.msra.mxu0 %v589_v7  ;;  %598 = vmatpush.bf16.msra.mxu2 %v589_v7  ;;  %v503_v33 = vor.u32 %v580_v30, %v500_v31  ;;  %v490_v36 = vld [vmem:[%s902_s0 + $0x50] sm:$0xf]  ;;  %v579_v37 = vld [vmem:[%s902_s0 + $0x54] sm:$0xf0]  ;;  %v459_v38 = vor.u32 %v571_v35, %v458_v34  ;;  %v572_v40 = vld [vmem:[%s902_s0 + $0x24] sm:$0xf] }
   0xb   :  { %284 = vmatpush.bf16.msra.mxu1 %v595_v6  ;;  %605 = vmatpush.bf16.msra.mxu3 %v595_v6  ;;  %v491_v39 = vor.u32 %v579_v37, %v490_v36  ;;  %v468_v41 = vld [vmem:[%s902_s0 + $0x28] sm:$0xf0]  ;;  %v582_v42 = vld [vmem:[%s902_s0 + $0x74] sm:$0xf]  ;;  %v508_v43 = vld [vmem:[%s902_s0 + $0x78] sm:$0xf0] }
   0xc   :  { %v471_v44 = vor.u32 %v572_v40, %v468_v41  ;;  %v511_v45 = vor.u32 %v582_v42, %v508_v43  ;;  %v466_v46 = vld [vmem:[%s902_s0 + $0x20] sm:$0xf]  ;;  %v573_v47 = vld [vmem:[%s902_s0 + $0x24] sm:$0xf0]  ;;  %v574_v52 = vld [vmem:[%s902_s0 + $0x34] sm:$0xf] }
   0xd   :  { %v498_v48 = vld [vmem:[%s902_s0 + $0x60] sm:$0xf]  ;;  %v581_v49 = vld [vmem:[%s902_s0 + $0x64] sm:$0xf0]  ;;  %v467_v50 = vor.u32 %v573_v47, %v466_v46  ;;  %v476_v53 = vld [vmem:[%s902_s0 + $0x38] sm:$0xf0] }
   0xe   :  { %234 = vmatpush.bf16.msra.mxu0 %v588_v9  ;;  %599 = vmatpush.bf16.msra.mxu2 %v588_v9  ;;  %v499_v51 = vor.u32 %v581_v49, %v498_v48  ;;  %v479_v54 = vor.u32 %v574_v52, %v476_v53  ;;  %v474_v55 = vld [vmem:[%s902_s0 + $0x30] sm:$0xf]  ;;  %v575_v56 = vld [vmem:[%s902_s0 + $0x34] sm:$0xf0]  ;;  %v576_v61 = vld [vmem:[%s902_s0 + $0x44] sm:$0xf] }
   0xf   :  { %285 = vmatpush.bf16.msra.mxu1 %v594_v8  ;;  %606 = vmatpush.bf16.msra.mxu3 %v594_v8  ;;  %v506_v57 = vld [vmem:[%s902_s0 + $0x70] sm:$0xf]  ;;  %v583_v58 = vld [vmem:[%s902_s0 + $0x74] sm:$0xf0]  ;;  %v475_v59 = vor.u32 %v575_v56, %v474_v55  ;;  %v484_v62 = vld [vmem:[%s902_s0 + $0x48] sm:$0xf0] }
  0x10   :  { %v507_v60 = vor.u32 %v583_v58, %v506_v57  ;;  %v487_v63 = vor.u32 %v576_v61, %v484_v62 }
  0x12   :  { %235 = vmatpush.bf16.msra.mxu0 %v587_v11  ;;  %600 = vmatpush.bf16.msra.mxu2 %v587_v11 }
  0x13   :  { %286 = vmatpush.bf16.msra.mxu1 %v593_v10  ;;  %607 = vmatpush.bf16.msra.mxu3 %v593_v10 }
  0x16   :  { %236 = vmatpush.bf16.msra.mxu0 %v586_v13  ;;  %601 = vmatpush.bf16.msra.mxu2 %v586_v13 }
  0x17   :  { %287 = vmatpush.bf16.msra.mxu1 %v592_v12  ;;  %608 = vmatpush.bf16.msra.mxu3 %v592_v12 }
  0x1a   :  { %560 = vmatmul.msk.bf16.vlgmr.msra.gmra.mxu1 %vm202_vm1, %v455_v18  ;;  %237 = vmatpush.bf16.msra.mxu0 %v585_v19 }
  0x1b   :  { %565 = vmatmul.msk.bf16.vlgmr.msra.gmra.mxu3 %vm202_vm1, %v495_v20  ;;  %602 = vmatpush.bf16.msra.mxu2 %v585_v19 }
  0x1e   :  { %238 = vmatpush.bf16.msra.mxu0 %v584_v21 }
  0x1f   :  { %603 = vmatpush.bf16.msra.mxu2 %v584_v21 }
  0x21   :  { %239 = vmatmul.bf16.vlgmr.msra.gmra.mxu0 %v451_v26 }
  0x22   :  { %259 = vmatmul.bf16.vlgmr.msra.gmra.mxu2 %v483_v27 }
  0x2a   :  { %561 = vmatmul.msk.bf16.gmra.mxu1 %vm202_vm1, %v463_v32 }
  0x2b   :  { %566 = vmatmul.msk.bf16.gmra.mxu3 %vm202_vm1, %v503_v33 }
  0x31   :  { %244 = vmatmul.bf16.gmra.mxu0 %v459_v38 }
  0x32   :  { %264 = vmatmul.bf16.gmra.mxu2 %v491_v39 }
  0x3a   :  { %562 = vmatmul.msk.bf16.gmra.mxu1 %vm202_vm1, %v471_v44 }
  0x3b   :  { %567 = vmatmul.msk.bf16.gmra.mxu3 %vm202_vm1, %v511_v45 }
  0x41   :  { %249 = vmatmul.bf16.gmra.mxu0 %v467_v50 }
  0x42   :  { %269 = vmatmul.bf16.gmra.mxu2 %v499_v51 }
  0x4a   :  { %563 = vmatmul.msk.bf16.gmra.mxu1 %vm202_vm1, %v479_v54 }
  0x51   :  { %254 = vmatmul.bf16.gmra.mxu0 %v475_v59 }
  0x52   :  { %274 = vmatmul.bf16.gmra.mxu2 %v507_v60 }
  0x5a   :  { %564 = vmatmul.msk.bf16.gmra.mxu1 %vm202_vm1, %v487_v63 }
  0x97   :  { %v289_v0 = vpop.f32.mrf.mxu1 }
  0x9e   :  { %v240_v2 = vpop.f32.mrf.mxu0  ;;  %v314_v8 = vpop.f32.mrf.mxu3 }
  0x9f   :  { %v291_v1 = vpop.f32.mrf.mxu1  ;;  %v290_v3 = vadd.f32 %v289_v0, %v240_v2 }
  0xa1   :  { %330 = vst.msk [vmem:[%s903_s2] sm:$0xff] %vm329_vm2, %v290_v3  ;;  %v383_v32 = vmul.f32 %v290_v3, %v290_v3  ;;  %v346_v36 = vsel %vm329_vm2, %v290_v3, 0.0 }
  0xa3   :  { %v399_v45 = vsel %vm329_vm2, %v383_v32, 0.0 }
  0xa5   :  { %v776_v4 = vpop.f32.mrf.mxu2 }
  0xa6   :  { %v242_v6 = vpop.f32.mrf.mxu0  ;;  %v316_v13 = vpop.f32.mrf.mxu3 }
  0xa7   :  { %v294_v5 = vpop.f32.mrf.mxu1  ;;  %v292_v7 = vadd.f32 %v291_v1, %v242_v6 }
  0xa9   :  { %331 = vst.msk [vmem:[%s903_s2 + $0x8] sm:$0xff] %vm329_vm2, %v292_v7  ;;  %v384_v31 = vmul.f32 %v292_v7, %v292_v7  ;;  %v347_v33 = vsel %vm329_vm2, %v292_v7, 0.0 }
  0xaa   :  { %v348_v44 = vadd.f32 %v347_v33, %v346_v36 }
  0xab   :  { %v400_v40 = vsel %vm329_vm2, %v384_v31, 0.0 }
  0xac   :  { %v401_v50 = vadd.f32 %v400_v40, %v399_v45 }
  0xad   :  { %v782_v9 = vpop.f32.mrf.mxu2 }
  0xae   :  { %v245_v11 = vpop.f32.mrf.mxu0  ;;  %v319_v20 = vpop.f32.mrf.mxu3 }
  0xaf   :  { %v296_v10 = vpop.f32.mrf.mxu1  ;;  %v295_v12 = vadd.f32 %v294_v5, %v245_v11 }
  0xb1   :  { %332 = vst.msk [vmem:[%s903_s2 + $0x10] sm:$0xff] %vm329_vm2, %v295_v12  ;;  %v385_v34 = vmul.f32 %v295_v12, %v295_v12  ;;  %v349_v41 = vsel %vm329_vm2, %v295_v12, 0.0 }
  0xb2   :  { %v350_v51 = vadd.f32 %v349_v41, %v348_v44 }
  0xb3   :  { %v402_v46 = vsel %vm329_vm2, %v385_v34, 0.0 }
  0xb4   :  { %v403_v55 = vadd.f32 %v402_v46, %v401_v50 }
  0xb5   :  { %v265_v14 = vpop.f32.mrf.mxu2 }
  0xb6   :  { %v247_v16 = vpop.f32.mrf.mxu0  ;;  %v788_v17 = vadd.f32 %v314_v8, %v265_v14  ;;  %v321_v30 = vpop.f32.mrf.mxu3 }
  0xb7   :  { %v299_v15 = vpop.f32.mrf.mxu1  ;;  %v297_v18 = vadd.f32 %v296_v10, %v247_v16 }
  0xb8   :  { %340 = vst.msk [vmem:[%s903_s2 + $0x50] sm:$0xff] %vm329_vm2, %v788_v17  ;;  %v365_v34 = vsel %vm329_vm2, %v788_v17, 0.0 }
  0xb9   :  { %333 = vst.msk [vmem:[%s903_s2 + $0x18] sm:$0xff] %vm329_vm2, %v297_v18  ;;  %v386_v42 = vmul.f32 %v297_v18, %v297_v18  ;;  %v351_v47 = vsel %vm329_vm2, %v297_v18, 0.0 }
  0xba   :  { %v352_v56 = vadd.f32 %v351_v47, %v350_v51 }
  0xbb   :  { %v404_v52 = vsel %vm329_vm2, %v386_v42, 0.0 }
  0xbc   :  { %v405_v61 = vadd.f32 %v404_v52, %v403_v55 }
  0xbd   :  { %v267_v19 = vpop.f32.mrf.mxu2 }
  0xbe   :  { %v250_v22 = vpop.f32.mrf.mxu0  ;;  %v799_v23 = vadd.f32 %v316_v13, %v267_v19  ;;  %v324_v49 = vpop.f32.mrf.mxu3 }
  0xbf   :  { %v301_v21 = vpop.f32.mrf.mxu1  ;;  %v300_v24 = vadd.f32 %v299_v15, %v250_v22 }
  0xc0   :  { %341 = vst.msk [vmem:[%s903_s2 + $0x58] sm:$0xff] %vm329_vm2, %v799_v23  ;;  %v367_v41 = vsel %vm329_vm2, %v799_v23, 0.0 }
  0xc1   :  { %334 = vst.msk [vmem:[%s903_s2 + $0x20] sm:$0xff] %vm329_vm2, %v300_v24  ;;  %v387_v48 = vmul.f32 %v300_v24, %v300_v24  ;;  %v353_v53 = vsel %vm329_vm2, %v300_v24, 0.0 }
  0xc2   :  { %v354_v62 = vadd.f32 %v353_v53, %v352_v56 }
  0xc3   :  { %v406_v57 = vsel %vm329_vm2, %v387_v48, 0.0 }
  0xc4   :  { %v407_v7 = vadd.f32 %v406_v57, %v405_v61 }
  0xc5   :  { %v270_v25 = vpop.f32.mrf.mxu2 }
  0xc6   :  { %v252_v27 = vpop.f32.mrf.mxu0  ;;  %v810_v28 = vadd.f32 %v319_v20, %v270_v25  ;;  %v326_v15 = vpop.f32.mrf.mxu3 }
  0xc7   :  { %v304_v26 = vpop.f32.mrf.mxu1  ;;  %v302_v29 = vadd.f32 %v301_v21, %v252_v27 }
  0xc8   :  { %342 = vst.msk [vmem:[%s903_s2 + $0x60] sm:$0xff] %vm329_vm2, %v810_v28  ;;  %v395_v42 = vmul.f32 %v810_v28, %v810_v28 }
  0xc9   :  { %335 = vst.msk [vmem:[%s903_s2 + $0x28] sm:$0xff] %vm329_vm2, %v302_v29  ;;  %v388_v54 = vmul.f32 %v302_v29, %v302_v29  ;;  %v355_v58 = vsel %vm329_vm2, %v302_v29, 0.0  ;;  %v393_v29 = vmul.f32 %v788_v17, %v788_v17  ;;  %v369_v17 = vsel %vm329_vm2, %v810_v28, 0.0 }
  0xca   :  { %v356_v8 = vadd.f32 %v355_v58, %v354_v62 }
  0xcb   :  { %v408_v2 = vsel %vm329_vm2, %v388_v54, 0.0  ;;  %v418_v40 = vsel %vm329_vm2, %v393_v29, 0.0 }
  0xcc   :  { %v409_v13 = vadd.f32 %v408_v2, %v407_v7 }
  0xcd   :  { %v272_v35 = vpop.f32.mrf.mxu2 }
  0xce   :  { %v255_v38 = vpop.f32.mrf.mxu0  ;;  %v823_v39 = vadd.f32 %v321_v30, %v272_v35  ;;  %v394_v35 = vmul.f32 %v799_v23, %v799_v23 }
  0xcf   :  { %v306_v37 = vpop.f32.mrf.mxu1  ;;  %v305_v43 = vadd.f32 %v304_v26, %v255_v38 }
  0xd0   :  { %343 = vst.msk [vmem:[%s903_s2 + $0x68] sm:$0xff] %vm329_vm2, %v823_v39  ;;  %v420_v45 = vsel %vm329_vm2, %v394_v35, 0.0  ;;  %v396_v46 = vmul.f32 %v823_v39, %v823_v39  ;;  %v371_v23 = vsel %vm329_vm2, %v823_v39, 0.0 }
  0xd1   :  { %336 = vst.msk [vmem:[%s903_s2 + $0x30] sm:$0xff] %vm329_vm2, %v305_v43  ;;  %v389_v59 = vmul.f32 %v305_v43, %v305_v43  ;;  %v357_v3 = vsel %vm329_vm2, %v305_v43, 0.0 }
  0xd2   :  { %v424_v53 = vsel %vm329_vm2, %v396_v46, 0.0 }
  0xd3   :  { %v410_v10 = vsel %vm329_vm2, %v389_v59, 0.0 }
  0xd4   :  { %v411_v16 = vadd.f32 %v410_v10, %v409_v13 }
  0xd5   :  { %v275_v60 = vpop.f32.mrf.mxu2 }
  0xd6   :  { %v257_v0 = vpop.f32.mrf.mxu0  ;;  %v325_v1 = vadd.f32 %v324_v49, %v275_v60  ;;  %v422_v49 = vsel %vm329_vm2, %v395_v42, 0.0 }
  0xd7   :  { %v309_v63 = vpop.f32.mrf.mxu1  ;;  %v307_v6 = vadd.f32 %v306_v37, %v257_v0 }
  0xd8   :  { %v310_v5 = vadd.f32 %v309_v63, %v776_v4  ;;  %344 = vst.msk [vmem:[%s903_s2 + $0x70] sm:$0xff] %vm329_vm2, %v325_v1  ;;  %v358_v4 = vadd.f32 %v357_v3, %v356_v8  ;;  %v397_v50 = vmul.f32 %v325_v1, %v325_v1  ;;  %v373_v54 = vsel %vm329_vm2, %v325_v1, 0.0 }
  0xd9   :  { %v359_v11 = vsel %vm329_vm2, %v307_v6, 0.0  ;;  %v390_v12 = vmul.f32 %v307_v6, %v307_v6  ;;  %337 = vst.msk [vmem:[%s903_s2 + $0x38] sm:$0xff] %vm329_vm2, %v307_v6 }
  0xda   :  { %338 = vst.msk [vmem:[%s903_s2 + $0x40] sm:$0xff] %vm329_vm2, %v310_v5  ;;  %v360_v18 = vadd.f32 %v359_v11, %v358_v4  ;;  %v391_v19 = vmul.f32 %v310_v5, %v310_v5  ;;  %v361_v25 = vsel %vm329_vm2, %v310_v5, 0.0  ;;  %v426_v57 = vsel %vm329_vm2, %v397_v50, 0.0 }
  0xdb   :  { %v412_v14 = vsel %vm329_vm2, %v390_v12, 0.0 }
  0xdc   :  { %v413_v21 = vadd.f32 %v412_v14, %v411_v16  ;;  %v362_v27 = vadd.f32 %v361_v25, %v360_v18  ;;  %v414_v30 = vsel %vm329_vm2, %v391_v19, 0.0 }
  0xdd   :  { %v277_v20 = vpop.f32.mrf.mxu2 }
  0xde   :  { %v327_v24 = vadd.f32 %v326_v15, %v277_v20  ;;  %v415_v33 = vadd.f32 %v414_v30, %v413_v21 }
  0xdf   :  { %v311_v22 = vpop.f32.mrf.mxu1 }
  0xe0   :  { %v312_v26 = vadd.f32 %v311_v22, %v782_v9  ;;  %345 = vst.msk [vmem:[%s903_s2 + $0x78] sm:$0xff] %vm329_vm2, %v327_v24  ;;  %v398_v55 = vmul.f32 %v327_v24, %v327_v24  ;;  %v375_v58 = vsel %vm329_vm2, %v327_v24, 0.0 }
  0xe2   :  { %339 = vst.msk [vmem:[%s903_s2 + $0x48] sm:$0xff] %vm329_vm2, %v312_v26  ;;  %v363_v31 = vsel %vm329_vm2, %v312_v26, 0.0  ;;  %v392_v32 = vmul.f32 %v312_v26, %v312_v26  ;;  %v428_v61 = vsel %vm329_vm2, %v398_v55, 0.0 }
  0xe3   :  { %v364_v9 = vadd.f32 %v363_v31, %v362_v27 }
  0xe4   :  { %v416_v36 = vsel %vm329_vm2, %v392_v32, 0.0 }
  0xe5   :  { %v366_v37 = vadd.f32 %v365_v34, %v364_v9  ;;  %v417_v38 = vadd.f32 %v416_v36, %v415_v33 }
  0xe7   :  { %v368_v43 = vadd.f32 %v367_v41, %v366_v37  ;;  %v419_v44 = vadd.f32 %v418_v40, %v417_v38 }
  0xe9   :  { %v421_v47 = vadd.f32 %v420_v45, %v419_v44  ;;  %v370_v48 = vadd.f32 %v369_v17, %v368_v43 }
  0xeb   :  { %v372_v51 = vadd.f32 %v371_v23, %v370_v48  ;;  %v423_v52 = vadd.f32 %v422_v49, %v421_v47 }
  0xed   :  { %v374_v56 = vadd.f32 %v373_v54, %v372_v51  ;;  %v425_v28 = vadd.f32 %v424_v53, %v423_v52 }
  0xef   :  { %v376_v59 = vadd.f32 %v375_v58, %v374_v56  ;;  %v427_v60 = vadd.f32 %v426_v57, %v425_v28 }
  0xf1   :  { %v377_v62 = vrot.slane %v376_v59, 4  ;;  %v429_v39 = vadd.f32 %v428_v61, %v427_v60 }
  0xf3   :  { %v378_v63 = vadd.f32 %v377_v62, %v376_v59  ;;  %v430_v0 = vrot.slane %v429_v39, 4 }
  0xf5   :  { %v379_v2 = vrot.slane %v378_v63, 2  ;;  %v431_v3 = vadd.f32 %v430_v0, %v429_v39 }
  0xf7   :  { %v380_v5 = vadd.f32 %v379_v2, %v378_v63  ;;  %v432_v6 = vrot.slane %v431_v3, 2 }
  0xf9   :  { %v381_v1 = vrot.slane %v380_v5, 1  ;;  %v433_v7 = vadd.f32 %v432_v6, %v431_v3 }
  0xfb   :  { %v434_v8 = vrot.slane %v433_v7, 1  ;;  %v382_v10 = vadd.f32 %v381_v1, %v380_v5 }
  0xfd   :  { %v435_v11 = vadd.f32 %v434_v8, %v433_v7 }
  0xff   :  { %v437_v12 = vsel %vm436_vm3, %v382_v10, %v435_v11 }
 0x100   :  { %439 = vst.msk [vmem:[%s904_s3] sm:$0x3] %vm438_vm4, %v437_v12 }

// kernel: densenet_forward.10
= control target key start
LH: loop header
LB: loop body
LE: loop exit
PB: predicated region body
PF: predicated region fallthrough
CT: control target
= control target key end

     0   :  { %v938_v0 = vmov 1   ;;  %v939_v1 = vmov 0   ;;  %vm60_vm0 = vcmask 130048   ;;  %v940_v27 = vmov 3   ;;  %s1307_s5 = inlined_call_operand.vmem [shape: f32[32,9], index: 5, kind: input, shape index: {}]   ;;  %s1308_s3 = inlined_call_operand.vmem [shape: bf16[16,16], index: 3, kind: input, shape index: {}]   ;;  %s1309_s0 = inlined_call_operand.vmem [shape: f32[32,16], index: 0, kind: input, shape index: {}]   ;;  %s1310_s1 = inlined_call_operand.vmem [shape: f32[1,16], index: 1, kind: input, shape index: {}]   ;;  %s1311_s2 = inlined_call_operand.vmem [shape: f32[1,16], index: 2, kind: input, shape index: {}]   ;;  %s1312_s4 = inlined_call_operand.vmem [shape: bf16[9,16,8], index: 4, kind: input, shape index: {}]   ;;  %s1313_s6 = inlined_call_operand.vmem [shape: f32[32,8], index: 6, kind: output, shape index: {0}]   ;;  %s1314_s7 = inlined_call_operand.vmem [shape: f32[2,8], index: 7, kind: output, shape index: {1}]  }
   0x1   :  { %901 = vset.pattern.permute.xlu1 %v938_v0  ;;  %902 = vset.pattern.permute.xlu2 %v939_v1  ;;  %v990_v2 = vld [vmem:[%s1307_s5] sm:$0xff]  ;;  %v27_v5 = vld [vmem:[%s1309_s0 + $0x8] sm:$0xff]  ;;  %v28_v8 = vld [vmem:[%s1309_s0 + $0x10] sm:$0xff]  ;;  %v941_v28 = vmov 2   ;;  %v942_v29 = vmov 4   ;;  %v943_v30 = vmov 5  }
   0x2   :  { %v879_v3 = vld [vmem:[%s1308_s3] sm:$0xff]  ;;  %168 = vperm.xlu2 %902, %v990_v2   ;;  %209 = vperm.xlu1 %901, %v990_v2   ;;  %v29_v9 = vld [vmem:[%s1309_s0 + $0x18] sm:$0xff]  ;;  %v1018_v10 = vld [vmem:[%s1307_s5 + $0x10] sm:$0xff]  ;;  %v944_v31 = vmov 8   ;;  %v945_v32 = vmov 6   ;;  %v946_v33 = vmov 7  }
   0x3   :  { %v26_v4 = vld [vmem:[%s1309_s0] sm:$0xff]  ;;  %74 = vmatpush.bf16.msra.mxu0 %v879_v3  ;;  %889 = vmatpush.bf16.msra.mxu2 %v879_v3  ;;  %v1024_v15 = vld [vmem:[%s1307_s5 + $0x8] sm:$0xff]  ;;  %v1031_v26 = vld [vmem:[%s1307_s5 + $0x18] sm:$0xff]  ;;  %vm196_vm4 = vcmask 1043456   ;;  %vm150_vm5 = vcmask 1044480   ;;  %vm371_vm6 = vcmask 1040384  }
   0x4   :  { %v934_v6 = vld [vmem:[%s1310_s1] ss:$0 sm:$0xff]  ;;  %900 = vset.pattern.permute.xlu0 %v938_v0  ;;  %vm297_vm7 = vcmask 1042432   ;;  %vm503_vm8 = vcmask 1046528   ;;  %vm757_vm9 = vcmask 64512   ;;  %vm793_vm10 = vcmask 58368  }
   0x5   :  { %v935_v7 = vld [vmem:[%s1311_s2] ss:$0 sm:$0xff]  ;;  %v34_v11 = vmul.f32 %v934_v6, %v26_v4  ;;  %v35_v12 = vmul.f32 %v934_v6, %v27_v5  ;;  %v36_v13 = vmul.f32 %v934_v6, %v28_v8  ;;  %v37_v14 = vmul.f32 %v934_v6, %v29_v9  ;;  %217 = vperm.xlu0 %900, %v1018_v10  }
   0x7   :  { %v42_v16 = vadd.f32 %v935_v7, %v34_v11  ;;  %v43_v17 = vadd.f32 %v935_v7, %v35_v12  ;;  %v44_v18 = vadd.f32 %v935_v7, %v36_v13  ;;  %v45_v19 = vadd.f32 %v935_v7, %v37_v14 }
   0x9   :  { %v46_v20 = vmax.f32 %v42_v16, 0.0  ;;  %v47_v21 = vmax.f32 %v43_v17, 0.0  ;;  %v48_v22 = vmax.f32 %v44_v18, 0.0  ;;  %v49_v23 = vmax.f32 %v45_v19, 0.0 }
   0xa   :  { %173 = vperm.xlu2 %902, %v1024_v15   ;;  %213 = vperm.xlu1 %901, %v1024_v15  }
   0xb   :  { %v50_v24 = vpack.c.bf16 %v47_v21, %v46_v20  ;;  %v51_v25 = vpack.c.bf16 %v49_v23, %v48_v22  ;;  %v881_v20 = vld [vmem:[%s1312_s4 + $0x8] sm:$0xff]  ;;  %v880_v21 = vld [vmem:[%s1312_s4] sm:$0xff]  ;;  %v883_v22 = vld [vmem:[%s1312_s4 + $0x18] sm:$0xff] }
   0xc   :  { %252 = vmatpush.bf16.msra.mxu1 %v881_v20  ;;  %890 = vmatpush.bf16.msra.mxu3 %v881_v20  ;;  %v886_v20 = vld [vmem:[%s1312_s4 + $0x30] sm:$0xff] }
   0xd   :  { %807 = vmatmul.msk.bf16.vlgmr.msra.gmra.mxu0 %vm60_vm0, %v50_v24  ;;  %808 = vmatmul.msk.bf16.vlgmr.msra.gmra.mxu2 %vm60_vm0, %v51_v25 }
   0xe   :  { %221 = vperm.xlu0 %900, %v1031_v26   ;;  %283 = vmatpush.bf16.msrb.mxu2 %v880_v21  ;;  %v888_v21 = vld [vmem:[%s1312_s4 + $0x40] sm:$0xff] }
   0xf   :  { %427 = vmatpush.bf16.msrb.mxu0 %v883_v22 }
  0x12   :  { %905 = vset.pattern.permute.xlu2 %v940_v27  ;;  %904 = vset.pattern.permute.xlu1 %v941_v28 }
  0x13   :  { %384 = vperm.xlu2 %905, %v990_v2   ;;  %314 = vperm.xlu1 %904, %v1024_v15  }
  0x16   :  { %903 = vset.pattern.permute.xlu0 %v941_v28 }
  0x17   :  { %310 = vperm.xlu0 %903, %v990_v2  }
  0x1b   :  { %907 = vset.pattern.permute.xlu2 %v942_v29  ;;  %906 = vset.pattern.permute.xlu1 %v940_v27 }
  0x1c   :  { %444 = vperm.xlu2 %907, %v990_v2   ;;  %388 = vperm.xlu1 %906, %v1024_v15  }
  0x1f   :  { %908 = vset.pattern.permute.xlu0 %v942_v29 }
  0x20   :  { %448 = vperm.xlu0 %908, %v1024_v15  }
  0x24   :  { %910 = vset.pattern.permute.xlu2 %v939_v1  ;;  %909 = vset.pattern.permute.xlu1 %v939_v1 }
  0x25   :  { %183 = vperm.xlu2 %910, %v1031_v26   ;;  %178 = vperm.xlu1 %909, %v1018_v10  }
  0x28   :  { %913 = vset.pattern.permute.xlu0 %v940_v27 }
  0x29   :  { %392 = vperm.xlu0 %913, %v1018_v10  }
  0x2d   :  { %912 = vset.pattern.permute.xlu2 %v941_v28  ;;  %911 = vset.pattern.permute.xlu1 %v941_v28 }
  0x2e   :  { %322 = vperm.xlu2 %912, %v1031_v26   ;;  %318 = vperm.xlu1 %911, %v1018_v10  }
  0x31   :  { %918 = vset.pattern.permute.xlu0 %v943_v30 }
  0x32   :  { %522 = vperm.xlu0 %918, %v1024_v15  }
  0x36   :  { %915 = vset.pattern.permute.xlu2 %v942_v29  ;;  %914 = vset.pattern.permute.xlu1 %v940_v27  ;;  %v882_v27 = vld [vmem:[%s1312_s4 + $0x10] sm:$0xff] }
  0x37   :  { %452 = vperm.xlu2 %915, %v1018_v10   ;;  %396 = vperm.xlu1 %914, %v1031_v26  }
  0x38   :  { %353 = vmatpush.bf16.msrb.mxu3 %v882_v27 }
  0x3a   :  { %923 = vset.pattern.permute.xlu0 %v944_v31 }
  0x3b   :  { %698 = vperm.xlu0 %923, %v990_v2  }
  0x3f   :  { %917 = vset.pattern.permute.xlu2 %v943_v30  ;;  %916 = vset.pattern.permute.xlu1 %v942_v29 }
  0x40   :  { %518 = vperm.xlu2 %917, %v990_v2   ;;  %456 = vperm.xlu1 %916, %v1031_v26  }
  0x43   :  { %928 = vset.pattern.permute.xlu0 %v945_v32 }
  0x44   :  { %590 = vperm.xlu0 %928, %v1031_v26  }
  0x48   :  { %920 = vset.pattern.permute.xlu2 %v945_v32  ;;  %919 = vset.pattern.permute.xlu1 %v945_v32 }
  0x49   :  { %582 = vperm.xlu2 %920, %v1024_v15   ;;  %578 = vperm.xlu1 %919, %v990_v2  }
  0x4c   :  { %933 = vset.pattern.permute.xlu0 %v944_v31 }
  0x51   :  { %922 = vset.pattern.permute.xlu2 %v946_v33  ;;  %921 = vset.pattern.permute.xlu1 %v946_v33 }
  0x52   :  { %642 = vperm.xlu2 %922, %v1024_v15   ;;  %638 = vperm.xlu1 %921, %v990_v2  }
  0x5a   :  { %925 = vset.pattern.permute.xlu2 %v943_v30  ;;  %924 = vset.pattern.permute.xlu1 %v944_v31 }
  0x5b   :  { %526 = vperm.xlu2 %925, %v1018_v10   ;;  %702 = vperm.xlu1 %924, %v1024_v15  }
  0x5c   :  { %v1074_v38 = vpop.permute.xlu2 %168 }
  0x63   :  { %927 = vset.pattern.permute.xlu2 %v945_v32  ;;  %926 = vset.pattern.permute.xlu1 %v943_v30  ;;  %v884_v30 = vld [vmem:[%s1312_s4 + $0x20] sm:$0xff] }
  0x64   :  { %586 = vperm.xlu2 %927, %v1018_v10   ;;  %530 = vperm.xlu1 %926, %v1031_v26   ;;  %v1100_v58 = vpop.permute.xlu2 %173 }
  0x65   :  { %487 = vmatpush.bf16.msrb.mxu1 %v884_v30 }
  0x6c   :  { %930 = vset.pattern.permute.xlu2 %v946_v33  ;;  %929 = vset.pattern.permute.xlu1 %v946_v33 }
  0x6d   :  { %650 = vperm.xlu2 %930, %v1031_v26   ;;  %646 = vperm.xlu1 %929, %v1018_v10   ;;  %v1104_v6 = vpop.permute.xlu2 %384 }
  0x74   :  { %v1068_v35 = vpop.permute.xlu1 %209 }
  0x75   :  { %932 = vset.pattern.permute.xlu2 %v944_v31  ;;  %931 = vset.pattern.permute.xlu1 %v944_v31  ;;  %v885_v31 = vld [vmem:[%s1312_s4 + $0x28] sm:$0xff] }
  0x76   :  { %710 = vperm.xlu2 %932, %v1031_v26   ;;  %706 = vperm.xlu1 %931, %v1018_v10   ;;  %v1108_v16 = vpop.permute.xlu2 %444 }
  0x77   :  { %v218_v32 = vpop.permute.xlu0 %217  ;;  %561 = vmatpush.bf16.msra.mxu2 %v885_v31 }
  0x7c   :  { %v1097_v54 = vpop.permute.xlu1 %213 }
  0x7f   :  { %v1121_v24 = vpop.permute.xlu2 %183 }
  0x85   :  { %v1102_v3 = vpop.permute.xlu1 %314 }
  0x8a   :  { %v1066_v34 = vpop.f32.mrf.mxu0 }
  0x8b   :  { %v100_v37 = vmul.f32 %v1066_v34, %v1066_v34  ;;  %v86_v40 = vsel %vm60_vm0, %v1066_v34, 0.0 }
  0x8d   :  { %v104_v44 = vsel %vm60_vm0, %v100_v37, 0.0 }
  0x8e   :  { %v1106_v14 = vpop.permute.xlu1 %388 }
  0x90   :  { %v1070_v36 = vpop.f32.mrf.mxu2 }
  0x91   :  { %v102_v45 = vmul.f32 %v1070_v36, %v1070_v36  ;;  %v89_v48 = vsel %vm60_vm0, %v1070_v36, 0.0 }
  0x92   :  { %v1076_v39 = vpop.f32.mrf.mxu0 }
  0x93   :  { %v87_v41 = vsel %vm60_vm0, %v1076_v39, 0.0  ;;  %v101_v42 = vmul.f32 %v1076_v39, %v1076_v39  ;;  %v107_v51 = vsel %vm60_vm0, %v102_v45, 0.0 }
  0x94   :  { %v88_v43 = vadd.f32 %v87_v41, %v86_v40  ;;  %v1134_v40 = vpop.permute.xlu2 %322 }
  0x95   :  { %v105_v46 = vsel %vm60_vm0, %v101_v42, 0.0 }
  0x96   :  { %v106_v47 = vadd.f32 %v105_v46, %v104_v44  ;;  %v90_v50 = vadd.f32 %v89_v48, %v88_v43 }
  0x97   :  { %v1110_v19 = vpop.permute.xlu1 %178 }
  0x98   :  { %v1090_v49 = vpop.f32.mrf.mxu2  ;;  %v108_v56 = vadd.f32 %v107_v51, %v106_v47 }
  0x99   :  { %v91_v52 = vsel %vm60_vm0, %v1090_v49, 0.0  ;;  %v103_v53 = vmul.f32 %v1090_v49, %v1090_v49 }
  0x9a   :  { %v92_v55 = vadd.f32 %v91_v52, %v90_v50 }
  0x9b   :  { %v109_v57 = vsel %vm60_vm0, %v103_v53, 0.0 }
  0x9c   :  { %v93_v59 = vrot.slane %v92_v55, 4  ;;  %v110_v60 = vadd.f32 %v109_v57, %v108_v56 }
  0x9e   :  { %v94_v61 = vadd.f32 %v93_v59, %v92_v55  ;;  %v111_v62 = vrot.slane %v110_v60, 4  ;;  %v222_v55 = vpop.permute.xlu0 %221 }
  0xa0   :  { %v95_v63 = vrot.slane %v94_v61, 2  ;;  %v112_v0 = vadd.f32 %v111_v62, %v110_v60  ;;  %v1132_v33 = vpop.permute.xlu1 %318  ;;  %v887_v60 = vld [vmem:[%s1312_s4 + $0x38] sm:$0xff] }
  0xa1   :  { %681 = vmatpush.bf16.msra.mxu0 %v887_v60 }
  0xa2   :  { %v96_v1 = vadd.f32 %v95_v63, %v94_v61  ;;  %v113_v2 = vrot.slane %v112_v0, 2 }
  0xa4   :  { %v97_v4 = vrot.slane %v96_v1, 1  ;;  %v114_v5 = vadd.f32 %v113_v2, %v112_v0 }
  0xa6   :  { %v98_v7 = vadd.f32 %v97_v4, %v96_v1  ;;  %v115_v8 = vrot.slane %v114_v5, 1 }
  0xa8   :  { %v99_v9 = vmul.f32 0.03125, %v98_v7  ;;  %v116_v10 = vadd.f32 %v115_v8, %v114_v5  ;;  %v311_v5 = vpop.permute.xlu0 %310 }
  0xaa   :  { %v117_v11 = vmul.f32 0.03125, %v116_v10  ;;  %v118_v12 = vmul.f32 %v99_v9, %v99_v9  ;;  %v122_v41 = vsub.f32 %v1076_v39, %v99_v9  ;;  %v123_v42 = vsub.f32 %v1070_v36, %v99_v9  ;;  %v1148_v39 = vpop.permute.xlu1 %396  ;;  %v1150_v36 = vpop.permute.xlu2 %452 }
  0xab   :  { %v124_v43 = vsub.f32 %v1090_v49, %v99_v9  ;;  %v121_v44 = vsub.f32 %v1066_v34, %v99_v9 }
  0xac   :  { %v119_v13 = vsub.f32 %v117_v11, %v118_v12 }
  0xae   :  { %v120_v15 = vmax.f32 %v119_v13, 0.0 }
  0xb0   :  { %v125_v17 = vadd.f32 1e-05, %v120_v15 }
  0xb2   :  { %936 = vrsqrt.f32 %v125_v17  ;;  %vm132_vm2 = vweird.f32 %v125_v17  ;;  %v1173_v7 = vpop.permute.xlu1 %456  ;;  %v1185_v12 = vpop.permute.xlu2 %518 }
  0xb8   :  { %v937_v18 = vpop.eup %936 }
  0xb9   :  { %v127_v23 = vmul.f32 %v937_v18, %v125_v17  ;;  %vm133_vm1 = vweird.f32 %v937_v18 }
  0xba   :  { %vm134_vm3 = vmor %vm132_vm2, %vm133_vm1 }
  0xbb   :  { %v128_v25 = vmul.f32 %v937_v18, %v127_v23 }
  0xbd   :  { %v129_v26 = vmul.f32 0.5, %v128_v25 }
  0xbf   :  { %v130_v28 = vsub.f32 1.5, %v129_v26 }
  0xc1   :  { %v131_v29 = vmul.f32 %v937_v18, %v130_v28 }
  0xc3   :  { %v135_v37 = vsel %vm134_vm3, %v937_v18, %v131_v29 }
  0xc4   :  { %v137_v45 = vmul.f32 %v135_v37, %v122_v41  ;;  %v138_v46 = vmul.f32 %v135_v37, %v123_v42  ;;  %v139_v47 = vmul.f32 %v135_v37, %v124_v43  ;;  %v136_v48 = vmul.f32 %v135_v37, %v121_v44  ;;  %v449_v37 = vpop.permute.xlu0 %448  ;;  %v579_v41 = vpop.permute.xlu1 %578 }
  0xc6   :  { %v1140_v50 = vmax.f32 %v137_v45, 0.0  ;;  %v1142_v51 = vmax.f32 %v138_v46, 0.0  ;;  %v1144_v52 = vmax.f32 %v139_v47, 0.0  ;;  %v1146_v53 = vmax.f32 %v136_v48, 0.0 }
  0xc8   :  { %v194_v49 = vrot.slane %v1144_v52, 4  ;;  %v200_v34 = vrot.slane %v1142_v51, 4  ;;  %v198_v56 = vrot.slane %v1140_v50, 4  ;;  %v152_v57 = vrot.slane %v1140_v50, 3 }
  0xc9   :  { %v151_v59 = vrot.slane %v1146_v53, 3  ;;  %v145_v0 = vrot.slane %v1144_v52, 3  ;;  %v197_v1 = vrot.slane %v1146_v53, 4  ;;  %v369_v13 = vrot.slane %v1144_v52, 7 }
  0xca   :  { %v1161_v61 = vsel %vm196_vm4, %v200_v34, %v194_v49  ;;  %v1164_v62 = vsel %vm196_vm4, %v198_v56, %v200_v34  ;;  %v373_v15 = vrot.slane %v1140_v50, 7  ;;  %v372_v23 = vrot.slane %v1146_v53, 7 }
  0xcb   :  { %v1167_v63 = vsel %vm150_vm5, %v151_v59, %v152_v57  ;;  %v227_v2 = vmul.f32 %v222_v55, %v1161_v61  ;;  %v226_v4 = vmul.f32 %v218_v32, %v1164_v62  ;;  %v1176_v8 = vsel %vm196_vm4, %v197_v1, %v198_v56 }
  0xcc   :  { %v1179_v9 = vsel %vm196_vm4, %v194_v49, %v197_v1  ;;  %v187_v10 = vmul.f32 %v1100_v58, %v1167_v63  ;;  %v225_v11 = vmul.f32 %v1097_v54, %v1176_v8  ;;  %v1192_v18 = vsel %vm150_vm5, %v145_v0, %v151_v59  ;;  %v639_v1 = vpop.permute.xlu1 %638 }
  0xcd   :  { %v224_v17 = vmul.f32 %v1068_v35, %v1179_v9  ;;  %v186_v54 = vmul.f32 %v1074_v38, %v1192_v18  ;;  %v229_v58 = vpack.c.bf16 %v227_v2, %v226_v4  ;;  %v374_v25 = vsel %vm371_vm6, %v372_v23, %v373_v15 }
  0xce   :  { %v382_v26 = vsel %vm371_vm6, %v369_v13, %v372_v23  ;;  %v400_v27 = vmul.f32 %v1106_v14, %v374_v25  ;;  %v295_v28 = vrot.slane %v1144_v52, 5  ;;  %v298_v29 = vrot.slane %v1146_v53, 5 }
  0xcf   :  { %v228_v22 = vpack.c.bf16 %v225_v11, %v224_v17  ;;  %v190_v35 = vpack.c.bf16 %v187_v10, %v186_v54  ;;  %816 = vmatmul.msk.bf16.vlgmr.msra.gmra.mxu3 %vm60_vm0, %v229_v58  ;;  %v399_v38 = vmul.f32 %v1104_v6, %v382_v26  ;;  %v299_v30 = vrot.slane %v1140_v50, 5  ;;  %v583_v6 = vpop.permute.xlu2 %582 }
  0xd0   :  { %621 = vmatpush.bf16.msra.mxu3 %v886_v20  ;;  %v154_v32 = vrot.slane %v1142_v51, 3  ;;  %v1216_v42 = vsel %vm297_vm7, %v295_v28, %v298_v29  ;;  %v375_v44 = vrot.slane %v1142_v51, 7  ;;  %v459_v48 = vmul.f32 %v1108_v16, %v1146_v53 }
  0xd1   :  { %815 = vmatmul.msk.bf16.vlgmr.msra.gmra.mxu1 %vm60_vm0, %v228_v22  ;;  %821 = vmatmul.msk.bf16.vlgmr.msrb.gmra.mxu2 %vm60_vm0, %v190_v35  ;;  %v403_v31 = vpack.c.bf16 %v400_v27, %v399_v38  ;;  %v1219_v14 = vsel %vm297_vm7, %v298_v29, %v299_v30  ;;  %v325_v46 = vmul.f32 %v311_v5, %v1216_v42  ;;  %v504_v5 = vrot.slane %v1146_v53, 1 }
  0xd2   :  { %741 = vmatpush.bf16.msra.mxu1 %v888_v21  ;;  %v155_v43 = vsel %vm150_vm5, %v152_v57, %v154_v32  ;;  %v1224_v45 = vsel %vm150_vm5, %v154_v32, %v145_v0  ;;  %v326_v47 = vmul.f32 %v1102_v3, %v1219_v14  ;;  %v460_v55 = vmul.f32 %v449_v37, %v1140_v50  ;;  %v393_v0 = vpop.permute.xlu0 %392 }
  0xd3   :  { %837 = vmatmul.msk.bf16.vlgmr.msrb.gmra.mxu0 %vm60_vm0, %v403_v31  ;;  %v188_v49 = vmul.f32 %v1110_v19, %v155_v43  ;;  %v189_v34 = vmul.f32 %v1121_v24, %v1224_v45  ;;  %v377_v56 = vsel %vm371_vm6, %v375_v44, %v369_v13  ;;  %v376_v57 = vsel %vm371_vm6, %v373_v15, %v375_v44 }
  0xd4   :  { %v329_v59 = vpack.c.bf16 %v326_v47, %v325_v46  ;;  %v463_v60 = vpack.c.bf16 %v460_v55, %v459_v48  ;;  %v402_v3 = vmul.f32 %v1148_v39, %v377_v56  ;;  %v401_v2 = vmul.f32 %v393_v0, %v376_v57  ;;  %v703_v20 = vpop.permute.xlu1 %702 }
  0xd5   :  { %v191_v4 = vpack.c.bf16 %v189_v34, %v188_v49  ;;  %v301_v19 = vrot.slane %v1142_v51, 5  ;;  %v505_v10 = vrot.slane %v1140_v50, 1  ;;  %v507_v11 = vrot.slane %v1142_v51, 1 }
  0xd6   :  { %v404_v24 = vpack.c.bf16 %v402_v3, %v401_v2  ;;  %v461_v50 = vmul.f32 %v1150_v36, %v1142_v51  ;;  %v462_v58 = vmul.f32 %v1173_v7, %v1144_v52  ;;  %v509_v7 = vrot.slane %v1144_v52, 1 }
  0xd7   :  { %v643_v16 = vpop.permute.xlu2 %642  ;;  %v302_v39 = vsel %vm297_vm7, %v299_v30, %v301_v19  ;;  %v303_v13 = vsel %vm297_vm7, %v301_v19, %v295_v28  ;;  %v506_v15 = vsel %vm503_vm8, %v504_v5, %v505_v10  ;;  %v508_v17 = vsel %vm503_vm8, %v505_v10, %v507_v11 }
  0xd8   :  { %v327_v54 = vmul.f32 %v1132_v33, %v302_v39  ;;  %v328_v53 = vmul.f32 %v1134_v40, %v303_v13  ;;  %v533_v23 = vmul.f32 %v1185_v12, %v506_v15  ;;  %v464_v26 = vpack.c.bf16 %v462_v58, %v461_v50 }
  0xd9   :  { %v654_v38 = vmul.f32 %v643_v16, %v1164_v62  ;;  %v653_v33 = vmul.f32 %v639_v1, %v1176_v8  ;;  %v594_v12 = vmul.f32 %v583_v6, %v155_v43  ;;  %v593_v28 = vmul.f32 %v579_v41, %v1167_v63 }
  0xda   :  { %v523_v22 = vpop.permute.xlu0 %522  ;;  %v330_v25 = vpack.c.bf16 %v328_v53, %v327_v54  ;;  %v510_v62 = vsel %vm503_vm8, %v507_v11, %v509_v7  ;;  %v714_v29 = vmul.f32 %v703_v20, %v302_v39  ;;  %v516_v8 = vsel %vm503_vm8, %v509_v7, %v504_v5 }
  0xdb   :  { %v534_v35 = vmul.f32 %v523_v22, %v508_v17  ;;  %v657_v51 = vpack.c.bf16 %v654_v38, %v653_v33  ;;  %v597_v46 = vpack.c.bf16 %v594_v12, %v593_v28 }
  0xdc   :  { %v531_v40 = vpop.permute.xlu1 %530 }
  0xdd   :  { %v537_v27 = vpack.c.bf16 %v534_v35, %v533_v23  ;;  %v536_v31 = vmul.f32 %v531_v40, %v516_v8 }
  0xdf   :  { %829 = vmatmul.msk.bf16.vlgmr.msrb.gmra.mxu3 %vm60_vm0, %v329_v59  ;;  %v527_v21 = vpop.permute.xlu2 %526 }
  0xe0   :  { %v535_v44 = vmul.f32 %v527_v21, %v510_v62 }
  0xe1   :  { %845 = vmatmul.msk.bf16.vlgmr.msrb.gmra.mxu1 %vm60_vm0, %v463_v60  ;;  %822 = vmatmul.msk.bf16.gmra.mxu2 %vm60_vm0, %v191_v4 }
  0xe2   :  { %v699_v30 = vpop.permute.xlu0 %698  ;;  %v538_v55 = vpack.c.bf16 %v536_v31, %v535_v44 }
  0xe3   :  { %838 = vmatmul.msk.bf16.gmra.mxu0 %vm60_vm0, %v404_v24  ;;  %v713_v32 = vmul.f32 %v699_v30, %v1219_v14 }
  0xe4   :  { %v647_v37 = vpop.permute.xlu1 %646 }
  0xe5   :  { %v717_v48 = vpack.c.bf16 %v714_v29, %v713_v32  ;;  %v655_v52 = vmul.f32 %v647_v37, %v1161_v61 }
  0xe7   :  { %v587_v36 = vpop.permute.xlu2 %586 }
  0xe8   :  { %v595_v43 = vmul.f32 %v587_v36, %v1224_v45 }
  0xea   :  { %v591_v6 = vpop.permute.xlu0 %590 }
  0xeb   :  { %v596_v49 = vmul.f32 %v591_v6, %v1192_v18 }
  0xec   :  { %v707_v14 = vpop.permute.xlu1 %706 }
  0xed   :  { %v715_v56 = vmul.f32 %v707_v14, %v303_v13  ;;  %v598_v57 = vpack.c.bf16 %v596_v49, %v595_v43 }
  0xef   :  { %830 = vmatmul.msk.bf16.gmra.mxu3 %vm60_vm0, %v330_v25  ;;  %v651_v47 = vpop.permute.xlu2 %650 }
  0xf0   :  { %v656_v63 = vmul.f32 %v651_v47, %v1179_v9 }
  0xf1   :  { %846 = vmatmul.msk.bf16.gmra.mxu1 %vm60_vm0, %v464_v26  ;;  %853 = vmatmul.msk.bf16.vlgmr.msra.gmra.mxu2 %vm60_vm0, %v537_v27 }
  0xf2   :  { %v658_v41 = vpack.c.bf16 %v656_v63, %v655_v52 }
  0xf3   :  { %869 = vmatmul.msk.bf16.vlgmr.msra.gmra.mxu0 %vm60_vm0, %v657_v51 }
  0xf7   :  { %v711_v34 = vpop.permute.xlu2 %710 }
  0xf8   :  { %v716_v61 = vmul.f32 %v711_v34, %v1216_v42 }
  0xfa   :  { %v718_v59 = vpack.c.bf16 %v716_v61, %v715_v56 }
  0xff   :  { %861 = vmatmul.msk.bf16.vlgmr.msra.gmra.mxu3 %vm60_vm0, %v597_v46 }
 0x101   :  { %877 = vmatmul.msk.bf16.vlgmr.msra.gmra.mxu1 %vm60_vm0, %v717_v48  ;;  %854 = vmatmul.msk.bf16.gmra.mxu2 %vm60_vm0, %v538_v55 }
 0x103   :  { %870 = vmatmul.msk.bf16.gmra.mxu0 %vm60_vm0, %v658_v41 }
 0x10f   :  { %862 = vmatmul.msk.bf16.gmra.mxu3 %vm60_vm0, %v598_v57 }
 0x111   :  { %878 = vmatmul.msk.bf16.gmra.mxu1 %vm60_vm0, %v718_v59 }
 0x14e   :  { %v254_v9 = vpop.f32.mrf.mxu1 }
 0x150   :  { %v429_v3 = vpop.f32.mrf.mxu0 }
 0x152   :  { %v259_v60 = vpop.f32.mrf.mxu3 }
 0x154   :  { %v285_v0 = vpop.f32.mrf.mxu2 }
 0x155   :  { %v286_v15 = vadd.f32 %v285_v0, %v254_v9 }
 0x156   :  { %v256_v1 = vpop.f32.mrf.mxu1 }
 0x158   :  { %v431_v16 = vpop.f32.mrf.mxu0 }
 0x15a   :  { %v261_v2 = vpop.f32.mrf.mxu3 }
 0x15c   :  { %v287_v4 = vpop.f32.mrf.mxu2 }
 0x15d   :  { %v288_v58 = vadd.f32 %v287_v4, %v256_v1 }
 0x15e   :  { %v489_v45 = vpop.f32.mrf.mxu1 }
 0x160   :  { %v434_v5 = vpop.f32.mrf.mxu0 }
 0x162   :  { %v355_v18 = vpop.f32.mrf.mxu3 }
 0x163   :  { %v365_v20 = vadd.f32 %v355_v18, %v286_v15 }
 0x164   :  { %v290_v19 = vpop.f32.mrf.mxu2 }
 0x165   :  { %v439_v50 = vadd.f32 %v429_v3, %v365_v20  ;;  %v291_v40 = vadd.f32 %v290_v19, %v259_v60 }
 0x166   :  { %v491_v24 = vpop.f32.mrf.mxu1 }
 0x167   :  { %v499_v23 = vadd.f32 %v489_v45, %v439_v50 }
 0x168   :  { %v436_v13 = vpop.f32.mrf.mxu0 }
 0x16a   :  { %v357_v42 = vpop.f32.mrf.mxu3 }
 0x16b   :  { %v366_v22 = vadd.f32 %v357_v42, %v288_v58 }
 0x16c   :  { %v292_v11 = vpop.f32.mrf.mxu2 }
 0x16d   :  { %v440_v27 = vadd.f32 %v431_v16, %v366_v22  ;;  %v293_v37 = vadd.f32 %v292_v11, %v261_v2 }
 0x16e   :  { %v494_v10 = vpop.f32.mrf.mxu1 }
 0x16f   :  { %v500_v7 = vadd.f32 %v491_v24, %v440_v27 }
 0x170   :  { %v683_v21 = vpop.f32.mrf.mxu0 }
 0x172   :  { %v360_v39 = vpop.f32.mrf.mxu3 }
 0x173   :  { %v367_v36 = vadd.f32 %v360_v39, %v291_v40 }
 0x174   :  { %v563_v54 = vpop.f32.mrf.mxu2 }
 0x175   :  { %v573_v25 = vadd.f32 %v563_v54, %v499_v23  ;;  %v441_v30 = vadd.f32 %v434_v5, %v367_v36 }
 0x176   :  { %v496_v17 = vpop.f32.mrf.mxu1 }
 0x177   :  { %v501_v47 = vadd.f32 %v494_v10, %v441_v30 }
 0x178   :  { %v685_v28 = vpop.f32.mrf.mxu0 }
 0x17a   :  { %v362_v53 = vpop.f32.mrf.mxu3 }
 0x17b   :  { %v368_v46 = vadd.f32 %v362_v53, %v293_v37 }
 0x17c   :  { %v565_v26 = vpop.f32.mrf.mxu2 }
 0x17d   :  { %v574_v62 = vadd.f32 %v565_v26, %v500_v7  ;;  %v442_v41 = vadd.f32 %v436_v13, %v368_v46 }
 0x17e   :  { %v743_v35 = vpop.f32.mrf.mxu1 }
 0x17f   :  { %v502_v34 = vadd.f32 %v496_v17, %v442_v41 }
 0x180   :  { %v688_v52 = vpop.f32.mrf.mxu0 }
 0x182   :  { %v623_v38 = vpop.f32.mrf.mxu3 }
 0x183   :  { %v633_v33 = vadd.f32 %v623_v38, %v573_v25 }
 0x184   :  { %v568_v32 = vpop.f32.mrf.mxu2 }
 0x185   :  { %v693_v51 = vadd.f32 %v683_v21, %v633_v33  ;;  %v575_v55 = vadd.f32 %v568_v32, %v501_v47 }
 0x186   :  { %v745_v29 = vpop.f32.mrf.mxu1 }
 0x187   :  { %v753_v12 = vadd.f32 %v743_v35, %v693_v51 }
 0x188   :  { %v690_v3 = vpop.f32.mrf.mxu0 }
 0x189   :  { %758 = vst.msk [vmem:[%s1313_s6] sm:$0xff] %vm757_vm9, %v753_v12  ;;  %v775_v9 = vmul.f32 %v753_v12, %v753_v12  ;;  %v762_v2 = vsel %vm757_vm9, %v753_v12, 0.0 }
 0x18a   :  { %v625_v8 = vpop.f32.mrf.mxu3 }
 0x18b   :  { %v634_v31 = vadd.f32 %v625_v8, %v574_v62  ;;  %v779_v24 = vsel %vm757_vm9, %v775_v9, 0.0 }
 0x18c   :  { %v570_v49 = vpop.f32.mrf.mxu2 }
 0x18d   :  { %v694_v44 = vadd.f32 %v685_v28, %v634_v31  ;;  %v576_v61 = vadd.f32 %v570_v49, %v502_v34 }
 0x18e   :  { %v748_v14 = vpop.f32.mrf.mxu1 }
 0x18f   :  { %v754_v48 = vadd.f32 %v745_v29, %v694_v44 }
 0x191   :  { %759 = vst.msk [vmem:[%s1313_s6 + $0x8] sm:$0xff] %vm757_vm9, %v754_v48  ;;  %v776_v57 = vmul.f32 %v754_v48, %v754_v48  ;;  %v763_v60 = vsel %vm757_vm9, %v754_v48, 0.0 }
 0x192   :  { %v628_v63 = vpop.f32.mrf.mxu3  ;;  %v764_v18 = vadd.f32 %v763_v60, %v762_v2 }
 0x193   :  { %v635_v6 = vadd.f32 %v628_v63, %v575_v55  ;;  %v780_v4 = vsel %vm757_vm9, %v776_v57, 0.0 }
 0x194   :  { %v781_v10 = vadd.f32 %v780_v4, %v779_v24 }
 0x195   :  { %v695_v43 = vadd.f32 %v688_v52, %v635_v6 }
 0x196   :  { %v750_v19 = vpop.f32.mrf.mxu1 }
 0x197   :  { %v755_v56 = vadd.f32 %v748_v14, %v695_v43 }
 0x199   :  { %760 = vst.msk [vmem:[%s1313_s6 + $0x10] sm:$0xff] %vm757_vm9, %v755_v56  ;;  %v777_v0 = vmul.f32 %v755_v56, %v755_v56  ;;  %v765_v45 = vsel %vm757_vm9, %v755_v56, 0.0 }
 0x19a   :  { %v630_v59 = vpop.f32.mrf.mxu3  ;;  %v766_v11 = vadd.f32 %v765_v45, %v764_v18 }
 0x19b   :  { %v636_v1 = vadd.f32 %v630_v59, %v576_v61  ;;  %v782_v5 = vsel %vm757_vm9, %v777_v0, 0.0 }
 0x19c   :  { %v783_v15 = vadd.f32 %v782_v5, %v781_v10 }
 0x19d   :  { %v696_v16 = vadd.f32 %v690_v3, %v636_v1 }
 0x19f   :  { %v756_v42 = vadd.f32 %v750_v19, %v696_v16 }
 0x1a1   :  { %761 = vst.msk [vmem:[%s1313_s6 + $0x18] sm:$0xff] %vm757_vm9, %v756_v42  ;;  %v767_v39 = vsel %vm757_vm9, %v756_v42, 0.0  ;;  %v778_v13 = vmul.f32 %v756_v42, %v756_v42 }
 0x1a2   :  { %v768_v17 = vadd.f32 %v767_v39, %v766_v11 }
 0x1a3   :  { %v784_v20 = vsel %vm757_vm9, %v778_v13, 0.0 }
 0x1a4   :  { %v769_v54 = vrot.slane %v768_v17, 4  ;;  %v785_v53 = vadd.f32 %v784_v20, %v783_v15 }
 0x1a6   :  { %v770_v50 = vadd.f32 %v769_v54, %v768_v17  ;;  %v786_v58 = vrot.slane %v785_v53, 4 }
 0x1a8   :  { %v771_v21 = vrot.slane %v770_v50, 2  ;;  %v787_v22 = vadd.f32 %v786_v58, %v785_v53 }
 0x1aa   :  { %v772_v23 = vadd.f32 %v771_v21, %v770_v50  ;;  %v788_v35 = vrot.slane %v787_v22, 2 }
 0x1ac   :  { %v773_v25 = vrot.slane %v772_v23, 1  ;;  %v789_v26 = vadd.f32 %v788_v35, %v787_v22 }
 0x1ae   :  { %v790_v38 = vrot.slane %v789_v26, 1  ;;  %v774_v27 = vadd.f32 %v773_v25, %v772_v23 }
 0x1b0   :  { %v791_v33 = vadd.f32 %v790_v38, %v789_v26 }
 0x1b2   :  { %v792_v40 = vsel %vm371_vm6, %v774_v27, %v791_v33 }
 0x1b3   :  { %794 = vst.msk [vmem:[%s1314_s7] sm:$0x3] %vm793_vm10, %v792_v40 }

// kernel: densenet_forward.12
= control target key start
LH: loop header
LB: loop body
LE: loop exit
PB: predicated region body
PF: predicated region fallthrough
CT: control target
= control target key end

     0   :  { %vm109_vm0 = vcmask 1043456   ;;  %vm102_vm1 = vcmask 64512   ;;  %vm138_vm2 = vcmask 130048   ;;  %vm224_vm3 = vcmask 261120   ;;  %s451_s10 = inlined_call_operand.vmem [shape: bf16[8,16], index: 10, kind: input, shape index: {}]   ;;  %s452_s9 = inlined_call_operand.vmem [shape: bf16[16,16], index: 9, kind: input, shape index: {}]   ;;  %s453_s11 = inlined_call_operand.vmem [shape: bf16[8,16], index: 11, kind: input, shape index: {}]   ;;  %s454_s1 = inlined_call_operand.vmem [shape: f32[32,8], index: 1, kind: input, shape index: {}]   ;;  %s455_s4 = inlined_call_operand.vmem [shape: f32[1,8], index: 4, kind: input, shape index: {}]   ;;  %s456_s7 = inlined_call_operand.vmem [shape: f32[1,8], index: 7, kind: input, shape index: {}]   ;;  %s457_s0 = inlined_call_operand.vmem [shape: f32[32,16], index: 0, kind: input, shape index: {}]   ;;  %s458_s3 = inlined_call_operand.vmem [shape: f32[1,16], index: 3, kind: input, shape index: {}]   ;;  %s459_s6 = inlined_call_operand.vmem [shape: f32[1,16], index: 6, kind: input, shape index: {}]   ;;  %s460_s2 = inlined_call_operand.vmem [shape: f32[32,8], index: 2, kind: input, shape index: {}]   ;;  %s461_s5 = inlined_call_operand.vmem [shape: f32[1,8], index: 5, kind: input, shape index: {}]   ;;  %s462_s8 = inlined_call_operand.vmem [shape: f32[1,8], index: 8, kind: input, shape index: {}]   ;;  %s463_s12 = inlined_call_operand.vmem [shape: f32[8,32], index: 12, kind: input, shape index: {}]   ;;  %s464_s13 = inlined_call_operand.vmem [shape: f32[8,16], index: 13, kind: output, shape index: {0}]   ;;  %s465_s14 = inlined_call_operand.vmem [shape: f32[2,16], index: 14, kind: output, shape index: {1}]  }
   0x1   :  { %v101_v0 = vld [vmem:[%s451_s10] sm:$0xf]  ;;  %v76_v6 = vld [vmem:[%s454_s1 + $0x8] sm:$0xff]  ;;  %v77_v23 = vld [vmem:[%s454_s1 + $0x10] sm:$0xff]  ;;  %vm264_vm4 = vcmask 1040384   ;;  %vm266_vm5 = vcmask 123904  }
   0x2   :  { %v287_v1 = vld [vmem:[%s452_s9] sm:$0xff]  ;;  %v111_v3 = vsel %vm109_vm0, %v101_v0, 0  ;;  %v48_v10 = vld [vmem:[%s457_s0 + $0x8] sm:$0xff]  ;;  %v78_v24 = vld [vmem:[%s454_s1 + $0x18] sm:$0xff] }
   0x3   :  { %v190_v2 = vld [vmem:[%s453_s11] sm:$0xf]  ;;  %120 = vmatpush.bf16.msra.mxu0 %v111_v3  ;;  %152 = vmatpush.bf16.msra.mxu1 %v287_v1  ;;  %v165_v20 = vld [vmem:[%s460_s2 + $0x8] sm:$0xff]  ;;  %v49_v40 = vld [vmem:[%s457_s0 + $0x10] sm:$0xff] }
   0x4   :  { %v198_v4 = vsel %vm109_vm0, %v190_v2, 0  ;;  %v75_v5 = vld [vmem:[%s454_s1] sm:$0xff]  ;;  %288 = vmatpush.bf16.msra.mxu3 %v111_v3  ;;  %v50_v41 = vld [vmem:[%s457_s0 + $0x18] sm:$0xff]  ;;  %v166_v49 = vld [vmem:[%s460_s2 + $0x10] sm:$0xff] }
   0x5   :  { %v289_v7 = vld [vmem:[%s455_s4] ss:$0 sm:$0xff]  ;;  %207 = vmatpush.bf16.msra.mxu2 %v198_v4  ;;  %v167_v50 = vld [vmem:[%s460_s2 + $0x18] sm:$0xff] }
   0x6   :  { %v290_v8 = vld [vmem:[%s456_s7] ss:$0 sm:$0xff]  ;;  %v83_v11 = vmul.f32 %v289_v7, %v75_v5  ;;  %v84_v12 = vmul.f32 %v289_v7, %v76_v6  ;;  %v85_v31 = vmul.f32 %v289_v7, %v77_v23  ;;  %v86_v32 = vmul.f32 %v289_v7, %v78_v24 }
   0x7   :  { %v47_v9 = vld [vmem:[%s457_s0] sm:$0xff] }
   0x8   :  { %v291_v13 = vld [vmem:[%s458_s3] ss:$0 sm:$0xff]  ;;  %v91_v16 = vadd.f32 %v290_v8, %v83_v11  ;;  %v92_v17 = vadd.f32 %v290_v8, %v84_v12  ;;  %v93_v38 = vadd.f32 %v290_v8, %v85_v31  ;;  %v94_v39 = vadd.f32 %v290_v8, %v86_v32 }
   0x9   :  { %v292_v14 = vld [vmem:[%s459_s6] ss:$0 sm:$0xff]  ;;  %v55_v18 = vmul.f32 %v291_v13, %v47_v9  ;;  %v56_v19 = vmul.f32 %v291_v13, %v48_v10  ;;  %v57_v47 = vmul.f32 %v291_v13, %v49_v40  ;;  %v58_v48 = vmul.f32 %v291_v13, %v50_v41 }
   0xa   :  { %v164_v15 = vld [vmem:[%s460_s2] sm:$0xff]  ;;  %v95_v25 = vmax.f32 %v91_v16, 0.0  ;;  %v96_v26 = vmax.f32 %v92_v17, 0.0  ;;  %v97_v45 = vmax.f32 %v93_v38, 0.0  ;;  %v98_v46 = vmax.f32 %v94_v39, 0.0 }
   0xb   :  { %v293_v21 = vld [vmem:[%s461_s5] ss:$0 sm:$0xff]  ;;  %v63_v27 = vadd.f32 %v292_v14, %v55_v18  ;;  %v64_v28 = vadd.f32 %v292_v14, %v56_v19  ;;  %v65_v55 = vadd.f32 %v292_v14, %v57_v47  ;;  %v66_v56 = vadd.f32 %v292_v14, %v58_v48 }
   0xc   :  { %v294_v22 = vld [vmem:[%s462_s8] ss:$0 sm:$0xff]  ;;  %v172_v29 = vmul.f32 %v293_v21, %v164_v15  ;;  %v173_v30 = vmul.f32 %v293_v21, %v165_v20  ;;  %v99_v33 = vpack.c.bf16 %v96_v26, %v95_v25  ;;  %v100_v52 = vpack.c.bf16 %v98_v46, %v97_v45 }
   0xd   :  { %v67_v34 = vmax.f32 %v63_v27, 0.0  ;;  %v68_v35 = vmax.f32 %v64_v28, 0.0  ;;  %v174_v53 = vmul.f32 %v293_v21, %v166_v49  ;;  %v175_v54 = vmul.f32 %v293_v21, %v167_v50  ;;  %v223_v21 = vld [vmem:[%s463_s12] sm:$0xff] }
   0xe   :  { %v180_v36 = vadd.f32 %v294_v22, %v172_v29  ;;  %v181_v37 = vadd.f32 %v294_v22, %v173_v30  ;;  %276 = vmatmul.msk.bf16.vlgmr.msra.gmra.mxu0 %vm102_vm1, %v99_v33  ;;  %277 = vmatmul.msk.bf16.vlgmr.msra.gmra.mxu3 %vm102_vm1, %v100_v52  ;;  %v69_v59 = vmax.f32 %v65_v55, 0.0  ;;  %v70_v60 = vmax.f32 %v66_v56, 0.0 }
   0xf   :  { %v71_v42 = vpack.c.bf16 %v68_v35, %v67_v34  ;;  %v182_v57 = vadd.f32 %v294_v22, %v174_v53  ;;  %v183_v58 = vadd.f32 %v294_v22, %v175_v54 }
  0x10   :  { %v184_v43 = vmax.f32 %v180_v36, 0.0  ;;  %v185_v44 = vmax.f32 %v181_v37, 0.0  ;;  %v72_v63 = vpack.c.bf16 %v70_v60, %v69_v59 }
  0x11   :  { %282 = vmatmul.msk.bf16.vlgmr.msra.gmra.mxu1 %vm138_vm2, %v71_v42  ;;  %v186_v61 = vmax.f32 %v182_v57, 0.0  ;;  %v187_v62 = vmax.f32 %v183_v58, 0.0 }
  0x12   :  { %v188_v51 = vpack.c.bf16 %v185_v44, %v184_v43 }
  0x13   :  { %v189_v0 = vpack.c.bf16 %v187_v62, %v186_v61 }
  0x14   :  { %284 = vmatmul.msk.bf16.vlgmr.msra.gmra.mxu2 %vm102_vm1, %v188_v51 }
  0x21   :  { %283 = vmatmul.msk.bf16.gmra.mxu1 %vm138_vm2, %v72_v63 }
  0x24   :  { %285 = vmatmul.msk.bf16.gmra.mxu2 %vm102_vm1, %v189_v0 }
  0x8b   :  { %v122_v7 = vpop.f32.mrf.mxu0 }
  0x8e   :  { %v154_v1 = vpop.f32.mrf.mxu1 }
  0x8f   :  { %v155_v16 = vadd.f32 %v154_v1, %v122_v7 }
  0x91   :  { %v127_v6 = vpop.f32.mrf.mxu3 }
  0x93   :  { %v124_v13 = vpop.f32.mrf.mxu0 }
  0x96   :  { %v156_v3 = vpop.f32.mrf.mxu1 }
  0x97   :  { %v209_v2 = vpop.f32.mrf.mxu2  ;;  %v157_v17 = vadd.f32 %v156_v3, %v124_v13 }
  0x98   :  { %v219_v20 = vadd.f32 %v209_v2, %v155_v16 }
  0x99   :  { %v129_v10 = vpop.f32.mrf.mxu3 }
  0x9e   :  { %v159_v5 = vpop.f32.mrf.mxu1 }
  0x9f   :  { %v211_v4 = vpop.f32.mrf.mxu2  ;;  %v160_v11 = vadd.f32 %v159_v5, %v127_v6 }
  0xa0   :  { %v220_v19 = vadd.f32 %v211_v4, %v157_v17 }
  0xa6   :  { %v161_v9 = vpop.f32.mrf.mxu1 }
  0xa7   :  { %v214_v8 = vpop.f32.mrf.mxu2  ;;  %v162_v12 = vadd.f32 %v161_v9, %v129_v10 }
  0xa8   :  { %v221_v18 = vadd.f32 %v214_v8, %v160_v11 }
  0xaf   :  { %v216_v14 = vpop.f32.mrf.mxu2 }
  0xb0   :  { %v222_v15 = vadd.f32 %v216_v14, %v162_v12 }
  0xb2   :  { %240 = vmatpush.msrb.mxu3 %v222_v15 }
  0xb4   :  { %241 = vmatpush.msrb.mxu3 %v221_v18 }
  0xb6   :  { %242 = vmatpush.msrb.mxu3 %v220_v19 }
  0xb8   :  { %243 = vmatpush.msrb.mxu3 %v219_v20 }
  0xb9   :  { %286 = vmatmul.msk.f32.vlgmr.msrb.gmra.mxu3 %vm224_vm3, %v223_v21 }
 0x13c   :  { %v245_v22 = vpop.f32.mrf.mxu3 }
 0x13d   :  { %248 = vst.msk [vmem:[%s464_s13] sm:$0xff] %vm138_vm2, %v245_v22  ;;  %v249_v23 = vsel %vm138_vm2, %v245_v22, 0.0  ;;  %v256_v24 = vmul.f32 %v245_v22, %v245_v22 }
 0x13e   :  { %v250_v25 = vrot.slane %v249_v23, 4 }
 0x13f   :  { %v257_v26 = vsel %vm138_vm2, %v256_v24, 0.0 }
 0x140   :  { %v251_v27 = vadd.f32 %v250_v25, %v249_v23  ;;  %v258_v28 = vrot.slane %v257_v26, 4 }
 0x142   :  { %v252_v29 = vrot.slane %v251_v27, 2  ;;  %v259_v30 = vadd.f32 %v258_v28, %v257_v26 }
 0x144   :  { %v253_v31 = vadd.f32 %v252_v29, %v251_v27  ;;  %v260_v32 = vrot.slane %v259_v30, 2 }
 0x146   :  { %v254_v33 = vrot.slane %v253_v31, 1  ;;  %v261_v34 = vadd.f32 %v260_v32, %v259_v30 }
 0x148   :  { %v262_v35 = vrot.slane %v261_v34, 1  ;;  %v255_v36 = vadd.f32 %v254_v33, %v253_v31 }
 0x14a   :  { %v263_v37 = vadd.f32 %v262_v35, %v261_v34 }
 0x14c   :  { %v265_v38 = vsel %vm264_vm4, %v255_v36, %v263_v37 }
 0x14d   :  { %267 = vst.msk [vmem:[%s465_s14] sm:$0x3] %vm266_vm5, %v265_v38 }

// kernel: densenet_forward.11
= control target key start
LH: loop header
LB: loop body
LE: loop exit
PB: predicated region body
PF: predicated region fallthrough
CT: control target
= control target key end

     0   :  { %vm100_vm0 = vcmask 1043456   ;;  %v1007_v0 = vmov 1   ;;  %v1008_v2 = vmov 0   ;;  %vm93_vm1 = vcmask 64512   ;;  %s1447_s9 = inlined_call_operand.vmem [shape: f32[32,9], index: 9, kind: input, shape index: {}]   ;;  %s1448_s7 = inlined_call_operand.vmem [shape: bf16[8,16], index: 7, kind: input, shape index: {}]   ;;  %s1449_s6 = inlined_call_operand.vmem [shape: bf16[16,16], index: 6, kind: input, shape index: {}]   ;;  %s1450_s1 = inlined_call_operand.vmem [shape: f32[32,8], index: 1, kind: input, shape index: {}]   ;;  %s1451_s3 = inlined_call_operand.vmem [shape: f32[1,8], index: 3, kind: input, shape index: {}]   ;;  %s1452_s5 = inlined_call_operand.vmem [shape: f32[1,8], index: 5, kind: input, shape index: {}]   ;;  %s1453_s0 = inlined_call_operand.vmem [shape: f32[32,16], index: 0, kind: input, shape index: {}]   ;;  %s1454_s2 = inlined_call_operand.vmem [shape: f32[1,16], index: 2, kind: input, shape index: {}]   ;;  %s1455_s4 = inlined_call_operand.vmem [shape: f32[1,16], index: 4, kind: input, shape index: {}]   ;;  %s1456_s8 = inlined_call_operand.vmem [shape: bf16[9,16,8], index: 8, kind: input, shape index: {}]   ;;  %s1457_s10 = inlined_call_operand.vmem [shape: f32[32,8], index: 10, kind: output, shape index: {0}]   ;;  %s1458_s11 = inlined_call_operand.vmem [shape: f32[2,8], index: 11, kind: output, shape index: {1}]  }
   0x1   :  { %969 = vset.pattern.permute.xlu1 %v1007_v0  ;;  %v1079_v1 = vld [vmem:[%s1447_s9 + $0x10] sm:$0xff]  ;;  %970 = vset.pattern.permute.xlu2 %v1008_v2  ;;  %v1085_v3 = vld [vmem:[%s1447_s9] sm:$0xff]  ;;  %v67_v8 = vld [vmem:[%s1450_s1 + $0x8] sm:$0xff]  ;;  %vm129_vm2 = vcmask 130048   ;;  %v1009_v44 = vmov 4   ;;  %v1010_v45 = vmov 2  }
   0x2   :  { %v92_v4 = vld [vmem:[%s1448_s7] sm:$0xf]  ;;  %285 = vperm.xlu1 %969, %v1079_v1   ;;  %237 = vperm.xlu2 %970, %v1085_v3   ;;  %v39_v14 = vld [vmem:[%s1453_s0 + $0x8] sm:$0xff]  ;;  %v68_v17 = vld [vmem:[%s1450_s1 + $0x10] sm:$0xff]  ;;  %v1011_v51 = vmov 3   ;;  %v1012_v52 = vmov 5  }
   0x3   :  { %v102_v5 = vsel %vm100_vm0, %v92_v4, 0  ;;  %v948_v6 = vld [vmem:[%s1449_s6] sm:$0xff]  ;;  %968 = vset.pattern.permute.xlu0 %v1007_v0  ;;  %v1127_v18 = vld [vmem:[%s1447_s9 + $0x18] sm:$0xff]  ;;  %v1135_v24 = vld [vmem:[%s1447_s9 + $0x8] sm:$0xff]  ;;  %v1013_v53 = vmov 7   ;;  %v1014_v54 = vmov 8  }
   0x4   :  { %v66_v7 = vld [vmem:[%s1450_s1] sm:$0xff]  ;;  %111 = vmatpush.bf16.msra.mxu0 %v102_v5  ;;  %958 = vmatpush.bf16.msra.mxu3 %v102_v5  ;;  %v69_v23 = vld [vmem:[%s1450_s1 + $0x18] sm:$0xff]  ;;  %v40_v38 = vld [vmem:[%s1453_s0 + $0x10] sm:$0xff]  ;;  %v1015_v55 = vmov 6   ;;  %vm439_vm6 = vcmask 1040384   ;;  %vm365_vm7 = vcmask 1042432  }
   0x5   :  { %v1001_v9 = vld [vmem:[%s1451_s3] ss:$0 sm:$0xff]  ;;  %143 = vmatpush.bf16.msra.mxu1 %v948_v6  ;;  %277 = vperm.xlu0 %968, %v1085_v3   ;;  %v41_v39 = vld [vmem:[%s1453_s0 + $0x18] sm:$0xff]  ;;  %vm219_vm8 = vcmask 1044480   ;;  %vm571_vm9 = vcmask 1046528   ;;  %vm860_vm10 = vcmask 58368  }
   0x6   :  { %v1002_v10 = vld [vmem:[%s1452_s5] ss:$0 sm:$0xff]  ;;  %v74_v12 = vmul.f32 %v1001_v9, %v66_v7  ;;  %v75_v13 = vmul.f32 %v1001_v9, %v67_v8  ;;  %v76_v25 = vmul.f32 %v1001_v9, %v68_v17  ;;  %v77_v26 = vmul.f32 %v1001_v9, %v69_v23 }
   0x7   :  { %v38_v11 = vld [vmem:[%s1453_s0] sm:$0xff] }
   0x8   :  { %v1003_v15 = vld [vmem:[%s1454_s2] ss:$0 sm:$0xff]  ;;  %v82_v19 = vadd.f32 %v1002_v10, %v74_v12  ;;  %v83_v20 = vadd.f32 %v1002_v10, %v75_v13  ;;  %v84_v31 = vadd.f32 %v1002_v10, %v76_v25  ;;  %v85_v32 = vadd.f32 %v1002_v10, %v77_v26 }
   0x9   :  { %v1004_v16 = vld [vmem:[%s1455_s4] ss:$0 sm:$0xff]  ;;  %v46_v21 = vmul.f32 %v1003_v15, %v38_v11  ;;  %v47_v22 = vmul.f32 %v1003_v15, %v39_v14  ;;  %v48_v42 = vmul.f32 %v1003_v15, %v40_v38  ;;  %v49_v43 = vmul.f32 %v1003_v15, %v41_v39 }
   0xa   :  { %v86_v27 = vmax.f32 %v82_v19, 0.0  ;;  %v87_v28 = vmax.f32 %v83_v20, 0.0  ;;  %289 = vperm.xlu1 %969, %v1127_v18   ;;  %242 = vperm.xlu2 %970, %v1135_v24   ;;  %v88_v36 = vmax.f32 %v84_v31, 0.0  ;;  %v89_v37 = vmax.f32 %v85_v32, 0.0 }
   0xb   :  { %v54_v29 = vadd.f32 %v1004_v16, %v46_v21  ;;  %v55_v30 = vadd.f32 %v1004_v16, %v47_v22  ;;  %v56_v46 = vadd.f32 %v1004_v16, %v48_v42  ;;  %v57_v47 = vadd.f32 %v1004_v16, %v49_v43 }
   0xc   :  { %v90_v33 = vpack.c.bf16 %v87_v28, %v86_v27  ;;  %v91_v41 = vpack.c.bf16 %v89_v37, %v88_v36 }
   0xd   :  { %v58_v34 = vmax.f32 %v54_v29, 0.0  ;;  %v59_v35 = vmax.f32 %v55_v30, 0.0  ;;  %281 = vperm.xlu0 %968, %v1135_v24   ;;  %v60_v48 = vmax.f32 %v56_v46, 0.0  ;;  %v61_v49 = vmax.f32 %v57_v47, 0.0 }
   0xe   :  { %870 = vmatmul.msk.bf16.vlgmr.msra.gmra.mxu0 %vm93_vm1, %v90_v33  ;;  %871 = vmatmul.msk.bf16.vlgmr.msra.gmra.mxu3 %vm93_vm1, %v91_v41 }
   0xf   :  { %v62_v40 = vpack.c.bf16 %v59_v35, %v58_v34  ;;  %v63_v50 = vpack.c.bf16 %v61_v49, %v60_v48 }
  0x11   :  { %876 = vmatmul.msk.bf16.vlgmr.msra.gmra.mxu1 %vm129_vm2, %v62_v40 }
  0x12   :  { %972 = vset.pattern.permute.xlu1 %v1009_v44  ;;  %973 = vset.pattern.permute.xlu2 %v1010_v45 }
  0x13   :  { %516 = vperm.xlu1 %972, %v1135_v24   ;;  %378 = vperm.xlu2 %973, %v1085_v3  }
  0x15   :  { %971 = vset.pattern.permute.xlu0 %v1009_v44 }
  0x16   :  { %512 = vperm.xlu0 %971, %v1085_v3  }
  0x1b   :  { %974 = vset.pattern.permute.xlu1 %v1010_v45  ;;  %975 = vset.pattern.permute.xlu2 %v1011_v51 }
  0x1c   :  { %382 = vperm.xlu1 %974, %v1135_v24   ;;  %452 = vperm.xlu2 %975, %v1085_v3  }
  0x1e   :  { %976 = vset.pattern.permute.xlu0 %v1011_v51 }
  0x1f   :  { %456 = vperm.xlu0 %976, %v1135_v24  }
  0x21   :  { %877 = vmatmul.msk.bf16.gmra.mxu1 %vm129_vm2, %v63_v50 }
  0x24   :  { %977 = vset.pattern.permute.xlu1 %v1008_v2  ;;  %978 = vset.pattern.permute.xlu2 %v1008_v2 }
  0x25   :  { %247 = vperm.xlu1 %977, %v1079_v1   ;;  %252 = vperm.xlu2 %978, %v1127_v18  }
  0x27   :  { %981 = vset.pattern.permute.xlu0 %v1010_v45 }
  0x28   :  { %386 = vperm.xlu0 %981, %v1079_v1  }
  0x2d   :  { %979 = vset.pattern.permute.xlu1 %v1009_v44  ;;  %980 = vset.pattern.permute.xlu2 %v1009_v44 }
  0x2e   :  { %520 = vperm.xlu1 %979, %v1079_v1   ;;  %524 = vperm.xlu2 %980, %v1127_v18  }
  0x30   :  { %986 = vset.pattern.permute.xlu0 %v1012_v52 }
  0x31   :  { %590 = vperm.xlu0 %986, %v1135_v24  }
  0x36   :  { %982 = vset.pattern.permute.xlu1 %v1010_v45  ;;  %983 = vset.pattern.permute.xlu2 %v1011_v51 }
  0x37   :  { %390 = vperm.xlu1 %982, %v1127_v18   ;;  %460 = vperm.xlu2 %983, %v1079_v1  }
  0x39   :  { %991 = vset.pattern.permute.xlu0 %v1013_v53 }
  0x3a   :  { %706 = vperm.xlu0 %991, %v1085_v3  }
  0x3f   :  { %984 = vset.pattern.permute.xlu1 %v1011_v51  ;;  %985 = vset.pattern.permute.xlu2 %v1012_v52 }
  0x40   :  { %464 = vperm.xlu1 %984, %v1127_v18   ;;  %586 = vperm.xlu2 %985, %v1085_v3  }
  0x42   :  { %996 = vset.pattern.permute.xlu0 %v1014_v54 }
  0x43   :  { %778 = vperm.xlu0 %996, %v1127_v18  }
  0x48   :  { %987 = vset.pattern.permute.xlu1 %v1014_v54  ;;  %988 = vset.pattern.permute.xlu2 %v1014_v54 }
  0x49   :  { %766 = vperm.xlu1 %987, %v1085_v3   ;;  %770 = vperm.xlu2 %988, %v1135_v24  }
  0x51   :  { %989 = vset.pattern.permute.xlu1 %v1015_v55  ;;  %990 = vset.pattern.permute.xlu2 %v1015_v55 }
  0x52   :  { %646 = vperm.xlu1 %989, %v1085_v3   ;;  %650 = vperm.xlu2 %990, %v1135_v24  }
  0x5a   :  { %992 = vset.pattern.permute.xlu1 %v1013_v53  ;;  %993 = vset.pattern.permute.xlu2 %v1012_v52 }
  0x5b   :  { %710 = vperm.xlu1 %992, %v1135_v24   ;;  %594 = vperm.xlu2 %993, %v1079_v1  }
  0x5c   :  { %v1182_v56 = vpop.permute.xlu2 %237 }
  0x63   :  { %994 = vset.pattern.permute.xlu1 %v1012_v52  ;;  %995 = vset.pattern.permute.xlu2 %v1014_v54 }
  0x64   :  { %598 = vperm.xlu1 %994, %v1127_v18   ;;  %774 = vperm.xlu2 %995, %v1079_v1   ;;  %v1184_v57 = vpop.permute.xlu2 %242 }
  0x6c   :  { %997 = vset.pattern.permute.xlu1 %v1015_v55  ;;  %998 = vset.pattern.permute.xlu2 %v1015_v55 }
  0x6d   :  { %654 = vperm.xlu1 %997, %v1079_v1   ;;  %658 = vperm.xlu2 %998, %v1127_v18   ;;  %v1188_v59 = vpop.permute.xlu2 %378 }
  0x74   :  { %v1186_v58 = vpop.permute.xlu1 %285 }
  0x75   :  { %999 = vset.pattern.permute.xlu1 %v1013_v53  ;;  %1000 = vset.pattern.permute.xlu2 %v1013_v53 }
  0x76   :  { %714 = vperm.xlu1 %999, %v1079_v1   ;;  %718 = vperm.xlu2 %1000, %v1127_v18   ;;  %v1192_v0 = vpop.permute.xlu2 %452 }
  0x77   :  { %v1206_v10 = vpop.permute.xlu0 %277 }
  0x7c   :  { %v1190_v62 = vpop.permute.xlu1 %289 }
  0x7f   :  { %v1204_v9 = vpop.permute.xlu2 %252  ;;  %v1232_v34 = vpop.permute.xlu0 %281 }
  0x85   :  { %v1194_v1 = vpop.permute.xlu1 %516 }
  0x88   :  { %v1230_v31 = vpop.permute.xlu2 %524  ;;  %v1238_v47 = vpop.permute.xlu0 %512 }
  0x8b   :  { %v113_v61 = vpop.f32.mrf.mxu0 }
  0x8e   :  { %v145_v60 = vpop.f32.mrf.mxu1  ;;  %v1220_v21 = vpop.permute.xlu1 %382 }
  0x8f   :  { %v1198_v6 = vadd.f32 %v145_v60, %v113_v61 }
  0x91   :  { %v118_v3 = vpop.f32.mrf.mxu3  ;;  %v169_v11 = vmul.f32 %v1198_v6, %v1198_v6  ;;  %v155_v14 = vsel %vm129_vm2, %v1198_v6, 0.0  ;;  %v1236_v44 = vpop.permute.xlu2 %460 }
  0x92   :  { %v457_v61 = vpop.permute.xlu0 %456 }
  0x93   :  { %v115_v2 = vpop.f32.mrf.mxu0  ;;  %v173_v20 = vsel %vm129_vm2, %v169_v11, 0.0 }
  0x96   :  { %v147_v63 = vpop.f32.mrf.mxu1 }
  0x97   :  { %v1196_v4 = vadd.f32 %v147_v63, %v115_v2  ;;  %v1234_v39 = vpop.permute.xlu1 %247 }
  0x99   :  { %v170_v8 = vmul.f32 %v1196_v4, %v1196_v4  ;;  %v156_v12 = vsel %vm129_vm2, %v1196_v4, 0.0  ;;  %v120_v18 = vpop.f32.mrf.mxu3 }
  0x9a   :  { %v157_v17 = vadd.f32 %v156_v12, %v155_v14  ;;  %v1242_v60 = vpop.permute.xlu2 %586  ;;  %v950_v12 = vld [vmem:[%s1456_s8 + $0x8] sm:$0xff]  ;;  %v951_v14 = vld [vmem:[%s1456_s8 + $0x10] sm:$0xff] }
  0x9b   :  { %v174_v15 = vsel %vm129_vm2, %v170_v8, 0.0  ;;  %v1248_v8 = vpop.permute.xlu0 %386  ;;  %320 = vmatpush.bf16.msra.mxu2 %v950_v12  ;;  %421 = vmatpush.bf16.msrb.mxu0 %v951_v14 }
  0x9c   :  { %v175_v24 = vadd.f32 %v174_v15, %v173_v20  ;;  %v952_v15 = vld [vmem:[%s1456_s8 + $0x18] sm:$0xff] }
  0x9d   :  { %495 = vmatpush.bf16.msrb.mxu1 %v952_v15 }
  0x9e   :  { %v150_v5 = vpop.f32.mrf.mxu1 }
  0x9f   :  { %v1200_v7 = vadd.f32 %v150_v5, %v118_v3 }
  0xa0   :  { %v1240_v52 = vpop.permute.xlu1 %520 }
  0xa1   :  { %v171_v13 = vmul.f32 %v1200_v7, %v1200_v7  ;;  %v158_v16 = vsel %vm129_vm2, %v1200_v7, 0.0 }
  0xa2   :  { %v159_v25 = vadd.f32 %v158_v16, %v157_v17  ;;  %v953_v17 = vld [vmem:[%s1456_s8 + $0x20] sm:$0xff] }
  0xa3   :  { %v176_v22 = vsel %vm129_vm2, %v171_v13, 0.0  ;;  %v1246_v5 = vpop.permute.xlu2 %770  ;;  %v949_v13 = vld [vmem:[%s1456_s8] sm:$0xff]  ;;  %555 = vmatpush.bf16.msrb.mxu2 %v953_v17 }
  0xa4   :  { %v177_v28 = vadd.f32 %v176_v22, %v175_v24  ;;  %351 = vmatpush.bf16.msrb.mxu3 %v949_v13 }
  0xa6   :  { %v152_v19 = vpop.f32.mrf.mxu1 }
  0xa7   :  { %v1223_v23 = vadd.f32 %v152_v19, %v120_v18 }
  0xa9   :  { %v160_v26 = vsel %vm129_vm2, %v1223_v23, 0.0  ;;  %v172_v27 = vmul.f32 %v1223_v23, %v1223_v23  ;;  %v1244_v63 = vpop.permute.xlu1 %390 }
  0xaa   :  { %v161_v29 = vadd.f32 %v160_v26, %v159_v25 }
  0xab   :  { %v178_v30 = vsel %vm129_vm2, %v172_v27, 0.0 }
  0xac   :  { %v162_v32 = vrot.slane %v161_v29, 4  ;;  %v179_v33 = vadd.f32 %v178_v30, %v177_v28  ;;  %v1273_v30 = vpop.permute.xlu0 %590 }
  0xae   :  { %v163_v35 = vadd.f32 %v162_v32, %v161_v29  ;;  %v180_v36 = vrot.slane %v179_v33, 4  ;;  %v1271_v29 = vpop.permute.xlu2 %650 }
  0xb0   :  { %v164_v37 = vrot.slane %v163_v35, 2  ;;  %v181_v38 = vadd.f32 %v180_v36, %v179_v33 }
  0xb2   :  { %v165_v40 = vadd.f32 %v164_v37, %v163_v35  ;;  %v182_v41 = vrot.slane %v181_v38, 2  ;;  %v1265_v19 = vpop.permute.xlu1 %464 }
  0xb4   :  { %v166_v42 = vrot.slane %v165_v40, 1  ;;  %v183_v43 = vadd.f32 %v182_v41, %v181_v38 }
  0xb6   :  { %v167_v45 = vadd.f32 %v166_v42, %v165_v40  ;;  %v184_v46 = vrot.slane %v183_v43, 1 }
  0xb8   :  { %v168_v48 = vmul.f32 0.03125, %v167_v45  ;;  %v185_v49 = vadd.f32 %v184_v46, %v183_v43  ;;  %v1288_v43 = vpop.permute.xlu2 %594  ;;  %v1290_v45 = vpop.permute.xlu0 %706  ;;  %v954_v46 = vld [vmem:[%s1456_s8 + $0x28] sm:$0xff] }
  0xb9   :  { %629 = vmatpush.bf16.msra.mxu3 %v954_v46 }
  0xba   :  { %v186_v50 = vmul.f32 0.03125, %v185_v49  ;;  %v187_v51 = vmul.f32 %v168_v48, %v168_v48  ;;  %v191_v22 = vsub.f32 %v1196_v4, %v168_v48  ;;  %v190_v24 = vsub.f32 %v1198_v6, %v168_v48  ;;  %v956_v49 = vld [vmem:[%s1456_s8 + $0x38] sm:$0xff] }
  0xbb   :  { %v192_v25 = vsub.f32 %v1200_v7, %v168_v48  ;;  %v193_v26 = vsub.f32 %v1223_v23, %v168_v48  ;;  %v767_v7 = vpop.permute.xlu1 %766  ;;  %v955_v48 = vld [vmem:[%s1456_s8 + $0x30] sm:$0xff]  ;;  %749 = vmatpush.bf16.msra.mxu1 %v956_v49 }
  0xbc   :  { %v188_v53 = vsub.f32 %v186_v50, %v187_v51  ;;  %689 = vmatpush.bf16.msra.mxu0 %v955_v48 }
  0xbe   :  { %v189_v54 = vmax.f32 %v188_v53, 0.0 }
  0xc0   :  { %v194_v55 = vadd.f32 1e-05, %v189_v54 }
  0xc2   :  { %1005 = vrsqrt.f32 %v194_v55  ;;  %vm201_vm4 = vweird.f32 %v194_v55 }
  0xc4   :  { %v1310_v15 = vpop.permute.xlu1 %646 }
  0xc8   :  { %v1006_v2 = vpop.eup %1005 }
  0xc9   :  { %v196_v3 = vmul.f32 %v1006_v2, %v194_v55  ;;  %vm202_vm3 = vweird.f32 %v1006_v2 }
  0xca   :  { %vm203_vm5 = vmor %vm201_vm4, %vm202_vm3 }
  0xcb   :  { %v197_v11 = vmul.f32 %v1006_v2, %v196_v3 }
  0xcd   :  { %v198_v16 = vmul.f32 0.5, %v197_v11 }
  0xcf   :  { %v199_v18 = vsub.f32 1.5, %v198_v16 }
  0xd1   :  { %v200_v20 = vmul.f32 %v1006_v2, %v199_v18 }
  0xd3   :  { %v204_v27 = vsel %vm203_vm5, %v1006_v2, %v200_v20 }
  0xd4   :  { %v206_v28 = vmul.f32 %v204_v27, %v191_v22  ;;  %v205_v32 = vmul.f32 %v204_v27, %v190_v24  ;;  %v207_v33 = vmul.f32 %v204_v27, %v192_v25  ;;  %v208_v35 = vmul.f32 %v204_v27, %v193_v26 }
  0xd6   :  { %v1275_v36 = vmax.f32 %v206_v28, 0.0  ;;  %v1277_v37 = vmax.f32 %v205_v32, 0.0  ;;  %v1279_v4 = vmax.f32 %v207_v33, 0.0  ;;  %v1281_v6 = vmax.f32 %v208_v35, 0.0  ;;  %v775_v35 = vpop.permute.xlu2 %774 }
  0xd8   :  { %v367_v23 = vrot.slane %v1275_v36, 5  ;;  %v369_v38 = vrot.slane %v1279_v4, 5  ;;  %v437_v40 = vrot.slane %v1281_v6, 7  ;;  %v440_v41 = vrot.slane %v1277_v37, 7 }
  0xd9   :  { %v441_v42 = vrot.slane %v1275_v36, 7  ;;  %v265_v55 = vrot.slane %v1277_v37, 4  ;;  %v266_v2 = vrot.slane %v1275_v36, 4  ;;  %v363_v11 = vrot.slane %v1281_v6, 5 }
  0xda   :  { %v450_v51 = vsel %vm439_vm6, %v437_v40, %v440_v41  ;;  %v370_v3 = vsel %vm365_vm7, %v367_v23, %v369_v38  ;;  %v221_v12 = vrot.slane %v1275_v36, 3  ;;  %v366_v14 = vrot.slane %v1277_v37, 5 }
  0xdb   :  { %v442_v50 = vsel %vm439_vm6, %v440_v41, %v441_v42  ;;  %v467_v53 = vmul.f32 %v1192_v0, %v450_v51  ;;  %v1313_v0 = vmul.f32 %v1246_v5, %v370_v3  ;;  %v214_v16 = vrot.slane %v1281_v6, 3 }
  0xdc   :  { %v468_v54 = vmul.f32 %v457_v61, %v442_v50  ;;  %v220_v61 = vrot.slane %v1277_v37, 3  ;;  %v267_v17 = vsel %vm100_vm0, %v265_v55, %v266_v2  ;;  %v368_v18 = vsel %vm365_vm7, %v366_v14, %v367_v23  ;;  %v779_v23 = vpop.permute.xlu0 %778 }
  0xdd   :  { %v263_v20 = vrot.slane %v1281_v6, 4  ;;  %v371_v22 = vsel %vm365_vm7, %v369_v38, %v363_v11  ;;  %v1322_v24 = vmul.f32 %v767_v7, %v368_v18  ;;  %v443_v5 = vrot.slane %v1279_v4, 7 }
  0xde   :  { %v471_v13 = vpack.c.bf16 %v468_v54, %v467_v53  ;;  %v1325_v25 = vsel %vm219_vm8, %v220_v61, %v221_v12  ;;  %v1331_v27 = vsel %vm219_vm8, %v214_v16, %v220_v61  ;;  %v293_v28 = vmul.f32 %v1232_v34, %v267_v17  ;;  %v711_v53 = vpop.permute.xlu1 %710 }
  0xdf   :  { %v256_v26 = vmul.f32 %v1184_v57, %v1325_v25  ;;  %v394_v32 = vmul.f32 %v1220_v21, %v368_v18  ;;  %v785_v33 = vpack.c.bf16 %v1313_v0, %v1322_v24  ;;  %v255_v7 = vmul.f32 %v1182_v56, %v1331_v27 }
  0xe0   :  { %906 = vmatmul.msk.bf16.vlgmr.msrb.gmra.mxu1 %vm129_vm2, %v471_v13  ;;  %v1339_v38 = vmul.f32 %v775_v35, %v371_v22  ;;  %v1342_v41 = vsel %vm100_vm0, %v263_v20, %v265_v55  ;;  %v376_v57 = vsel %vm365_vm7, %v363_v11, %v366_v14  ;;  %v444_v48 = vsel %vm439_vm6, %v441_v42, %v443_v5 }
  0xe1   :  { %v259_v46 = vpack.c.bf16 %v256_v26, %v255_v7  ;;  %v292_v34 = vmul.f32 %v1206_v10, %v1342_v41  ;;  %v393_v21 = vmul.f32 %v1188_v59, %v376_v57  ;;  %v445_v49 = vsel %vm439_vm6, %v443_v5, %v437_v40  ;;  %v957_v59 = vld [vmem:[%s1456_s8 + $0x40] sm:$0xff] }
  0xe2   :  { %v1350_v50 = vmul.f32 %v779_v23, %v376_v57  ;;  %v469_v55 = vmul.f32 %v1236_v44, %v444_v48  ;;  %v470_v10 = vmul.f32 %v1265_v19, %v445_v49  ;;  %v223_v40 = vrot.slane %v1279_v4, 3 }
  0xe3   :  { %v397_v56 = vpack.c.bf16 %v394_v32, %v393_v21  ;;  %v296_v51 = vpack.c.bf16 %v293_v28, %v292_v34  ;;  %890 = vmatmul.msk.bf16.vlgmr.msrb.gmra.mxu3 %vm129_vm2, %v259_v46  ;;  %v268_v42 = vrot.slane %v1279_v4, 4  ;;  %v396_v26 = vmul.f32 %v1244_v63, %v371_v22  ;;  %v659_v22 = vpop.permute.xlu2 %658 }
  0xe4   :  { %v786_v54 = vpack.c.bf16 %v1350_v50, %v1339_v38  ;;  %v472_v11 = vpack.c.bf16 %v470_v10, %v469_v55  ;;  %v224_v13 = vsel %vm219_vm8, %v221_v12, %v223_v40  ;;  %v225_v44 = vsel %vm219_vm8, %v223_v40, %v214_v16 }
  0xe5   :  { %884 = vmatmul.msk.bf16.vlgmr.msra.gmra.mxu2 %vm129_vm2, %v296_v51  ;;  %898 = vmatmul.msk.bf16.vlgmr.msrb.gmra.mxu0 %vm129_vm2, %v397_v56  ;;  %v269_v19 = vsel %vm100_vm0, %v266_v2, %v268_v42  ;;  %v270_v14 = vsel %vm100_vm0, %v268_v42, %v263_v20  ;;  %v257_v61 = vmul.f32 %v1234_v39, %v224_v13  ;;  %v573_v39 = vrot.slane %v1275_v36, 1 }
  0xe6   :  { %809 = vmatpush.bf16.msra.mxu2 %v957_v59  ;;  %v258_v18 = vmul.f32 %v1204_v9, %v225_v44  ;;  %v599_v5 = vpop.permute.xlu1 %598  ;;  %v395_v28 = vmul.f32 %v1248_v8, %v370_v3  ;;  %v294_v32 = vmul.f32 %v1186_v58, %v269_v19  ;;  %v295_v12 = vmul.f32 %v1190_v62, %v270_v14 }
  0xe7   :  { %v721_v2 = vmul.f32 %v1290_v45, %v267_v17  ;;  %v722_v20 = vmul.f32 %v711_v53, %v269_v19  ;;  %v572_v9 = vrot.slane %v1277_v37, 1  ;;  %v575_v58 = vrot.slane %v1279_v4, 1 }
  0xe8   :  { %v260_v16 = vpack.c.bf16 %v258_v18, %v257_v61  ;;  %v398_v35 = vpack.c.bf16 %v396_v26, %v395_v28  ;;  %v297_v7 = vpack.c.bf16 %v295_v12, %v294_v32  ;;  %v527_v23 = vmul.f32 %v1238_v47, %v1277_v37 }
  0xe9   :  { %v725_v63 = vpack.c.bf16 %v722_v20, %v721_v2  ;;  %v574_v8 = vsel %vm571_vm9, %v572_v9, %v573_v39  ;;  %v576_v3 = vsel %vm571_vm9, %v573_v39, %v575_v58  ;;  %v528_v57 = vmul.f32 %v1194_v1, %v1275_v36 }
  0xea   :  { %v601_v45 = vmul.f32 %v1242_v60, %v574_v8  ;;  %v602_v17 = vmul.f32 %v1273_v30, %v576_v3  ;;  %v662_v46 = vmul.f32 %v1271_v29, %v224_v13  ;;  %v661_v34 = vmul.f32 %v1310_v15, %v1325_v25 }
  0xeb   :  { %v531_v49 = vpack.c.bf16 %v528_v57, %v527_v23  ;;  %v719_v60 = vpop.permute.xlu2 %718  ;;  %v577_v1 = vrot.slane %v1281_v6, 1  ;;  %v529_v15 = vmul.f32 %v1240_v52, %v1279_v4  ;;  %v530_v25 = vmul.f32 %v1230_v31, %v1281_v6 }
  0xec   :  { %v605_v21 = vpack.c.bf16 %v602_v17, %v601_v45  ;;  %v665_v56 = vpack.c.bf16 %v662_v46, %v661_v34  ;;  %v724_v47 = vmul.f32 %v719_v60, %v1342_v41  ;;  %v664_v41 = vmul.f32 %v659_v22, %v1331_v27 }
  0xed   :  { %v578_v30 = vsel %vm571_vm9, %v575_v58, %v577_v1  ;;  %v584_v36 = vsel %vm571_vm9, %v577_v1, %v572_v9  ;;  %v532_v59 = vpack.c.bf16 %v530_v25, %v529_v15 }
  0xee   :  { %v655_v62 = vpop.permute.xlu1 %654  ;;  %v604_v37 = vmul.f32 %v599_v5, %v584_v36  ;;  %v603_v53 = vmul.f32 %v1288_v43, %v578_v30 }
  0xef   :  { %v663_v55 = vmul.f32 %v655_v62, %v225_v44 }
  0xf0   :  { %907 = vmatmul.msk.bf16.gmra.mxu1 %vm129_vm2, %v472_v11  ;;  %v606_v10 = vpack.c.bf16 %v604_v37, %v603_v53 }
  0xf1   :  { %v666_v40 = vpack.c.bf16 %v664_v41, %v663_v55 }
  0xf3   :  { %891 = vmatmul.msk.bf16.gmra.mxu3 %vm129_vm2, %v260_v16 }
  0xf5   :  { %885 = vmatmul.msk.bf16.gmra.mxu2 %vm129_vm2, %v297_v7  ;;  %899 = vmatmul.msk.bf16.gmra.mxu0 %vm129_vm2, %v398_v35 }
  0xf6   :  { %v715_v48 = vpop.permute.xlu1 %714 }
  0xf7   :  { %v723_v51 = vmul.f32 %v715_v48, %v270_v14 }
  0xf9   :  { %v726_v29 = vpack.c.bf16 %v724_v47, %v723_v51 }
 0x100   :  { %938 = vmatmul.msk.bf16.vlgmr.msra.gmra.mxu1 %vm129_vm2, %v725_v63 }
 0x103   :  { %922 = vmatmul.msk.bf16.vlgmr.msra.gmra.mxu3 %vm129_vm2, %v605_v21 }
 0x105   :  { %914 = vmatmul.msk.bf16.vlgmr.msrb.gmra.mxu2 %vm129_vm2, %v531_v49  ;;  %930 = vmatmul.msk.bf16.vlgmr.msra.gmra.mxu0 %vm129_vm2, %v665_v56 }
 0x110   :  { %939 = vmatmul.msk.bf16.gmra.mxu1 %vm129_vm2, %v726_v29 }
 0x113   :  { %923 = vmatmul.msk.bf16.gmra.mxu3 %vm129_vm2, %v606_v10 }
 0x115   :  { %915 = vmatmul.msk.bf16.gmra.mxu2 %vm129_vm2, %v532_v59  ;;  %931 = vmatmul.msk.bf16.gmra.mxu0 %vm129_vm2, %v666_v40 }
 0x125   :  { %946 = vmatmul.msk.bf16.vlgmr.msra.gmra.mxu2 %vm129_vm2, %v785_v33 }
 0x135   :  { %947 = vmatmul.msk.bf16.gmra.mxu2 %vm129_vm2, %v786_v54 }
 0x15d   :  { %v497_v43 = vpop.f32.mrf.mxu1 }
 0x162   :  { %v423_v6 = vpop.f32.mrf.mxu0 }
 0x165   :  { %v499_v44 = vpop.f32.mrf.mxu1 }
 0x166   :  { %v353_v52 = vpop.f32.mrf.mxu3 }
 0x168   :  { %v322_v31 = vpop.f32.mrf.mxu2 }
 0x169   :  { %v354_v18 = vadd.f32 %v353_v52, %v322_v31 }
 0x16a   :  { %v425_v11 = vpop.f32.mrf.mxu0 }
 0x16b   :  { %v433_v50 = vadd.f32 %v423_v6, %v354_v18 }
 0x16d   :  { %v502_v24 = vpop.f32.mrf.mxu1  ;;  %v507_v32 = vadd.f32 %v497_v43, %v433_v50 }
 0x16e   :  { %v355_v42 = vpop.f32.mrf.mxu3 }
 0x170   :  { %v324_v4 = vpop.f32.mrf.mxu2 }
 0x171   :  { %v356_v28 = vadd.f32 %v355_v42, %v324_v4 }
 0x172   :  { %v428_v14 = vpop.f32.mrf.mxu0 }
 0x173   :  { %v434_v35 = vadd.f32 %v425_v11, %v356_v28 }
 0x175   :  { %v504_v54 = vpop.f32.mrf.mxu1  ;;  %v508_v39 = vadd.f32 %v499_v44, %v434_v35 }
 0x176   :  { %v358_v19 = vpop.f32.mrf.mxu3 }
 0x178   :  { %v327_v27 = vpop.f32.mrf.mxu2 }
 0x179   :  { %v359_v9 = vadd.f32 %v358_v19, %v327_v27 }
 0x17a   :  { %v430_v38 = vpop.f32.mrf.mxu0 }
 0x17b   :  { %v435_v8 = vadd.f32 %v428_v14, %v359_v9 }
 0x17d   :  { %v751_v2 = vpop.f32.mrf.mxu1  ;;  %v509_v57 = vadd.f32 %v502_v24, %v435_v8 }
 0x17e   :  { %v360_v33 = vpop.f32.mrf.mxu3 }
 0x180   :  { %v329_v13 = vpop.f32.mrf.mxu2 }
 0x181   :  { %v361_v23 = vadd.f32 %v360_v33, %v329_v13 }
 0x182   :  { %v691_v16 = vpop.f32.mrf.mxu0 }
 0x183   :  { %v436_v56 = vadd.f32 %v430_v38, %v361_v23 }
 0x185   :  { %v753_v34 = vpop.f32.mrf.mxu1  ;;  %v510_v29 = vadd.f32 %v504_v54, %v436_v56 }
 0x186   :  { %v631_v5 = vpop.f32.mrf.mxu3 }
 0x188   :  { %v557_v0 = vpop.f32.mrf.mxu2 }
 0x189   :  { %v567_v12 = vadd.f32 %v557_v0, %v507_v32 }
 0x18a   :  { %v693_v3 = vpop.f32.mrf.mxu0 }
 0x18b   :  { %v641_v7 = vadd.f32 %v631_v5, %v567_v12 }
 0x18d   :  { %v701_v62 = vadd.f32 %v691_v16, %v641_v7  ;;  %v756_v15 = vpop.f32.mrf.mxu1 }
 0x18e   :  { %v633_v58 = vpop.f32.mrf.mxu3 }
 0x18f   :  { %v761_v45 = vadd.f32 %v751_v2, %v701_v62 }
 0x190   :  { %v559_v61 = vpop.f32.mrf.mxu2 }
 0x191   :  { %v568_v63 = vadd.f32 %v559_v61, %v508_v39 }
 0x192   :  { %v696_v47 = vpop.f32.mrf.mxu0 }
 0x193   :  { %v642_v22 = vadd.f32 %v633_v58, %v568_v63 }
 0x195   :  { %v702_v21 = vadd.f32 %v693_v3, %v642_v22  ;;  %v758_v43 = vpop.f32.mrf.mxu1 }
 0x196   :  { %v636_v49 = vpop.f32.mrf.mxu3 }
 0x197   :  { %v762_v51 = vadd.f32 %v753_v34, %v702_v21 }
 0x198   :  { %v562_v26 = vpop.f32.mrf.mxu2 }
 0x199   :  { %v569_v48 = vadd.f32 %v562_v26, %v509_v57 }
 0x19a   :  { %v698_v59 = vpop.f32.mrf.mxu0 }
 0x19b   :  { %v643_v60 = vadd.f32 %v636_v49, %v569_v48 }
 0x19d   :  { %v703_v36 = vadd.f32 %v696_v47, %v643_v60 }
 0x19e   :  { %v638_v25 = vpop.f32.mrf.mxu3 }
 0x19f   :  { %v763_v55 = vadd.f32 %v756_v15, %v703_v36 }
 0x1a0   :  { %v564_v20 = vpop.f32.mrf.mxu2 }
 0x1a1   :  { %v570_v37 = vadd.f32 %v564_v20, %v510_v29 }
 0x1a3   :  { %v644_v53 = vadd.f32 %v638_v25, %v570_v37 }
 0x1a5   :  { %v704_v40 = vadd.f32 %v698_v59, %v644_v53 }
 0x1a7   :  { %v764_v13 = vadd.f32 %v758_v43, %v704_v40 }
 0x1a8   :  { %v811_v17 = vpop.f32.mrf.mxu2 }
 0x1a9   :  { %v821_v46 = vadd.f32 %v811_v17, %v761_v45 }
 0x1ab   :  { %825 = vst.msk [vmem:[%s1457_s10] sm:$0xff] %vm93_vm1, %v821_v46  ;;  %v842_v52 = vmul.f32 %v821_v46, %v821_v46  ;;  %v829_v27 = vsel %vm93_vm1, %v821_v46, 0.0 }
 0x1ad   :  { %v846_v14 = vsel %vm93_vm1, %v842_v52, 0.0 }
 0x1b0   :  { %v813_v1 = vpop.f32.mrf.mxu2 }
 0x1b1   :  { %v822_v30 = vadd.f32 %v813_v1, %v762_v51 }
 0x1b3   :  { %826 = vst.msk [vmem:[%s1457_s10 + $0x8] sm:$0xff] %vm93_vm1, %v822_v30  ;;  %v843_v31 = vmul.f32 %v822_v30, %v822_v30  ;;  %v830_v4 = vsel %vm93_vm1, %v822_v30, 0.0 }
 0x1b4   :  { %v831_v44 = vadd.f32 %v830_v4, %v829_v27 }
 0x1b5   :  { %v847_v42 = vsel %vm93_vm1, %v843_v31, 0.0 }
 0x1b6   :  { %v848_v33 = vadd.f32 %v847_v42, %v846_v14 }
 0x1b8   :  { %v816_v41 = vpop.f32.mrf.mxu2 }
 0x1b9   :  { %v823_v10 = vadd.f32 %v816_v41, %v763_v55 }
 0x1bb   :  { %827 = vst.msk [vmem:[%s1457_s10 + $0x10] sm:$0xff] %vm93_vm1, %v823_v10  ;;  %v844_v6 = vmul.f32 %v823_v10, %v823_v10  ;;  %v832_v11 = vsel %vm93_vm1, %v823_v10, 0.0 }
 0x1bc   :  { %v833_v61 = vadd.f32 %v832_v11, %v831_v44 }
 0x1bd   :  { %v849_v0 = vsel %vm93_vm1, %v844_v6, 0.0 }
 0x1be   :  { %v850_v50 = vadd.f32 %v849_v0, %v848_v33 }
 0x1c0   :  { %v818_v19 = vpop.f32.mrf.mxu2 }
 0x1c1   :  { %v824_v24 = vadd.f32 %v818_v19, %v764_v13 }
 0x1c3   :  { %828 = vst.msk [vmem:[%s1457_s10 + $0x18] sm:$0xff] %vm93_vm1, %v824_v24  ;;  %v834_v18 = vsel %vm93_vm1, %v824_v24, 0.0  ;;  %v845_v38 = vmul.f32 %v824_v24, %v824_v24 }
 0x1c4   :  { %v835_v54 = vadd.f32 %v834_v18, %v833_v61 }
 0x1c5   :  { %v851_v5 = vsel %vm93_vm1, %v845_v38, 0.0 }
 0x1c6   :  { %v836_v26 = vrot.slane %v835_v54, 4  ;;  %v852_v28 = vadd.f32 %v851_v5, %v850_v50 }
 0x1c8   :  { %v837_v32 = vadd.f32 %v836_v26, %v835_v54  ;;  %v853_v12 = vrot.slane %v852_v28, 4 }
 0x1ca   :  { %v838_v16 = vrot.slane %v837_v32, 2  ;;  %v854_v35 = vadd.f32 %v853_v12, %v852_v28 }
 0x1cc   :  { %v839_v7 = vadd.f32 %v838_v16, %v837_v32  ;;  %v855_v2 = vrot.slane %v854_v35, 2 }
 0x1ce   :  { %v840_v20 = vrot.slane %v839_v7, 1  ;;  %v856_v9 = vadd.f32 %v855_v2, %v854_v35 }
 0x1d0   :  { %v857_v39 = vrot.slane %v856_v9, 1  ;;  %v841_v58 = vadd.f32 %v840_v20, %v839_v7 }
 0x1d2   :  { %v858_v62 = vadd.f32 %v857_v39, %v856_v9 }
 0x1d4   :  { %v859_v63 = vsel %vm439_vm6, %v841_v58, %v858_v62 }
 0x1d5   :  { %861 = vst.msk [vmem:[%s1458_s11] sm:$0x3] %vm860_vm10, %v859_v63 }

// kernel: densenet_forward.13
= control target key start
LH: loop header
LB: loop body
LE: loop exit
PB: predicated region body
PF: predicated region fallthrough
CT: control target
= control target key end

     0   :  { %v536_v2 = vmov 2   ;;  %v537_v3 = vmov 1   ;;  %v538_v8 = vmov 4   ;;  %vm47_vm0 = vcmask 130048   ;;  %s645_s3 = inlined_call_operand.vmem [shape: bf16[16,16], index: 3, kind: input, shape index: {}]   ;;  %s646_s0 = inlined_call_operand.vmem [shape: f32[8,16], index: 0, kind: input, shape index: {}]   ;;  %s647_s1 = inlined_call_operand.vmem [shape: f32[1,16], index: 1, kind: input, shape index: {}]   ;;  %s648_s2 = inlined_call_operand.vmem [shape: f32[1,16], index: 2, kind: input, shape index: {}]   ;;  %s649_s5 = inlined_call_operand.vmem [shape: f32[8,9], index: 5, kind: input, shape index: {}]   ;;  %s650_s4 = inlined_call_operand.vmem [shape: bf16[9,16,8], index: 4, kind: input, shape index: {}]   ;;  %s651_s6 = inlined_call_operand.vmem [shape: f32[8,8], index: 6, kind: output, shape index: {0}]   ;;  %s652_s7 = inlined_call_operand.vmem [shape: f32[2,8], index: 7, kind: output, shape index: {1}]  }
   0x1   :  { %v504_v0 = vld [vmem:[%s645_s3] sm:$0xff]  ;;  %525 = vset.pattern.permute.xlu1 %v536_v2  ;;  %523 = vset.pattern.permute.xlu0 %v537_v3  ;;  %v539_v12 = vmov 3   ;;  %v540_v13 = vmov 0   ;;  %v541_v14 = vmov 5   ;;  %v542_v15 = vmov 6   ;;  %v506_v38 = vld [vmem:[%s650_s4 + $0x8] sm:$0xff] }
   0x2   :  { %v26_v1 = vld [vmem:[%s646_s0] sm:$0xff]  ;;  %58 = vmatpush.bf16.msra.mxu0 %v504_v0  ;;  %527 = vset.pattern.permute.xlu2 %v538_v8  ;;  %v543_v16 = vmov 8   ;;  %v544_v17 = vmov 7   ;;  %v507_v40 = vld [vmem:[%s650_s4 + $0x10] sm:$0xff]  ;;  %v508_v42 = vld [vmem:[%s650_s4 + $0x18] sm:$0xff]  ;;  %vm410_vm4 = vcmask 64512  }
   0x3   :  { %v532_v4 = vld [vmem:[%s647_s1] ss:$0 sm:$0xff]  ;;  %142 = vmatpush.bf16.msra.mxu1 %v506_v38  ;;  %199 = vmatpush.bf16.msra.mxu3 %v507_v40  ;;  %v510_v45 = vld [vmem:[%s650_s4 + $0x28] sm:$0xff]  ;;  %v511_v46 = vld [vmem:[%s650_s4 + $0x30] sm:$0xff]  ;;  %vm172_vm5 = vcmask 1040384   ;;  %vm428_vm6 = vcmask 58368  }
   0x4   :  { %v533_v5 = vld [vmem:[%s648_s2] ss:$0 sm:$0xff]  ;;  %v31_v7 = vmul.f32 %v532_v4, %v26_v1  ;;  %v512_v48 = vld [vmem:[%s650_s4 + $0x38] sm:$0xff] }
   0x5   :  { %v103_v6 = vld [vmem:[%s649_s5] sm:$0xff] }
   0x6   :  { %175 = vperm.xlu1 %525, %v103_v6   ;;  %118 = vperm.xlu0 %523, %v103_v6   ;;  %v36_v9 = vadd.f32 %v533_v5, %v31_v7  ;;  %v505_v39 = vld [vmem:[%s650_s4] sm:$0xff] }
   0x7   :  { %239 = vperm.xlu2 %527, %v103_v6   ;;  %164 = vmatpush.bf16.msra.mxu2 %v505_v39  ;;  %v509_v44 = vld [vmem:[%s650_s4 + $0x20] sm:$0xff] }
   0x8   :  { %v37_v10 = vmax.f32 %v36_v9, 0.0  ;;  %231 = vmatpush.bf16.msrb.mxu0 %v508_v42  ;;  %263 = vmatpush.bf16.msrb.mxu1 %v509_v44 }
   0x9   :  { %331 = vmatpush.bf16.msrb.mxu3 %v511_v46 }
   0xa   :  { %v38_v11 = vpack.c.bf16 %v37_v10, %v37_v10  ;;  %v513_v10 = vld [vmem:[%s650_s4 + $0x40] sm:$0xff] }
   0xb   :  { %299 = vmatpush.bf16.msrb.mxu2 %v510_v45 }
   0xc   :  { %442 = vmatmul.msk.bf16.vlgmr.msra.gmra.mxu0 %vm47_vm0, %v38_v11 }
   0xd   :  { %367 = vmatpush.bf16.msra.mxu0 %v512_v48 }
   0xe   :  { %526 = vset.pattern.permute.xlu1 %v539_v12  ;;  %524 = vset.pattern.permute.xlu0 %v540_v13 }
   0xf   :  { %207 = vperm.xlu1 %526, %v103_v6   ;;  %106 = vperm.xlu0 %524, %v103_v6  }
  0x10   :  { %528 = vset.pattern.permute.xlu2 %v541_v14 }
  0x11   :  { %275 = vperm.xlu2 %528, %v103_v6  }
  0x17   :  { %529 = vset.pattern.permute.xlu1 %v542_v15  ;;  %531 = vset.pattern.permute.xlu0 %v543_v16 }
  0x18   :  { %307 = vperm.xlu1 %529, %v103_v6   ;;  %379 = vperm.xlu0 %531, %v103_v6  }
  0x19   :  { %530 = vset.pattern.permute.xlu2 %v544_v17 }
  0x1a   :  { %343 = vperm.xlu2 %530, %v103_v6  }
  0x61   :  { %v240_v58 = vpop.permute.xlu2 %239 }
  0x6b   :  { %v276_v9 = vpop.permute.xlu2 %275 }
  0x74   :  { %v344_v16 = vpop.permute.xlu2 %343 }
  0x78   :  { %v176_v54 = vpop.permute.xlu1 %175  ;;  %v119_v55 = vpop.permute.xlu0 %118 }
  0x81   :  { %v208_v3 = vpop.permute.xlu1 %207  ;;  %v107_v4 = vpop.permute.xlu0 %106 }
  0x89   :  { %v60_v18 = vpop.f32.mrf.mxu0 }
  0x8a   :  { %v64_v19 = vsel %vm47_vm0, %v60_v18, 0.0  ;;  %v72_v20 = vmul.f32 %v60_v18, %v60_v18  ;;  %v308_v15 = vpop.permute.xlu1 %307 }
  0x8b   :  { %v65_v21 = vrot.slane %v64_v19, 4 }
  0x8c   :  { %v73_v22 = vsel %vm47_vm0, %v72_v20, 0.0 }
  0x8d   :  { %v66_v23 = vadd.f32 %v65_v21, %v64_v19  ;;  %v74_v24 = vrot.slane %v73_v22, 4 }
  0x8f   :  { %v67_v25 = vrot.slane %v66_v23, 2  ;;  %v75_v26 = vadd.f32 %v74_v24, %v73_v22 }
  0x91   :  { %v68_v27 = vadd.f32 %v67_v25, %v66_v23  ;;  %v76_v28 = vrot.slane %v75_v26, 2  ;;  %v62_v29 = vpop.f32.mrf.mxu0 }
  0x93   :  { %v69_v30 = vrot.slane %v68_v27, 1  ;;  %v77_v31 = vadd.f32 %v76_v28, %v75_v26  ;;  %v380_v26 = vpop.permute.xlu0 %379 }
  0x95   :  { %v70_v32 = vadd.f32 %v69_v30, %v68_v27  ;;  %v78_v33 = vrot.slane %v77_v31, 1 }
  0x97   :  { %v71_v34 = vmul.f32 0.125, %v70_v32  ;;  %v79_v35 = vadd.f32 %v78_v33, %v77_v31 }
  0x99   :  { %v80_v36 = vmul.f32 0.125, %v79_v35  ;;  %v81_v37 = vmul.f32 %v71_v34, %v71_v34  ;;  %v84_v57 = vsub.f32 %v60_v18, %v71_v34 }
  0x9b   :  { %v82_v41 = vsub.f32 %v80_v36, %v81_v37 }
  0x9d   :  { %v83_v43 = vmax.f32 %v82_v41, 0.0 }
  0x9f   :  { %v85_v47 = vadd.f32 1e-05, %v83_v43 }
  0xa1   :  { %534 = vrsqrt.f32 %v85_v47  ;;  %vm92_vm2 = vweird.f32 %v85_v47 }
  0xa7   :  { %v535_v49 = vpop.eup %534 }
  0xa8   :  { %v87_v50 = vmul.f32 %v535_v49, %v85_v47  ;;  %vm93_vm1 = vweird.f32 %v535_v49 }
  0xa9   :  { %vm94_vm3 = vmor %vm92_vm2, %vm93_vm1 }
  0xaa   :  { %v88_v51 = vmul.f32 %v535_v49, %v87_v50 }
  0xac   :  { %v89_v52 = vmul.f32 0.5, %v88_v51 }
  0xae   :  { %v90_v53 = vsub.f32 1.5, %v89_v52 }
  0xb0   :  { %v91_v56 = vmul.f32 %v535_v49, %v90_v53 }
  0xb2   :  { %v95_v59 = vsel %vm94_vm3, %v535_v49, %v91_v56 }
  0xb3   :  { %v96_v60 = vmul.f32 %v95_v59, %v84_v57 }
  0xb5   :  { %v97_v61 = vmax.f32 %v96_v60, 0.0 }
  0xb7   :  { %v170_v62 = vrot.slane %v97_v61, 7  ;;  %v113_v63 = vrot.slane %v97_v61, 6  ;;  %v99_v0 = vrot.slane %v97_v61, 5  ;;  %v270_v13 = vrot.slane %v97_v61, 1 }
  0xb8   :  { %v338_v14 = vrot.slane %v97_v61, 2  ;;  %v242_v17 = vmul.f32 %v240_v58, %v97_v61  ;;  %v374_v25 = vrot.slane %v97_v61, 3 }
  0xb9   :  { %v178_v1 = vmul.f32 %v176_v54, %v170_v62  ;;  %v121_v2 = vmul.f32 %v119_v55, %v113_v63  ;;  %v210_v5 = vmul.f32 %v208_v3, %v170_v62  ;;  %v109_v6 = vmul.f32 %v107_v4, %v99_v0 }
  0xba   :  { %v310_v18 = vmul.f32 %v308_v15, %v270_v13  ;;  %v278_v19 = vmul.f32 %v276_v9, %v270_v13  ;;  %v346_v20 = vmul.f32 %v344_v16, %v338_v14  ;;  %v243_v21 = vpack.c.bf16 %v242_v17, %v242_v17 }
  0xbb   :  { %v179_v7 = vpack.c.bf16 %v178_v1, %v178_v1  ;;  %v122_v8 = vpack.c.bf16 %v121_v2, %v121_v2  ;;  %v211_v11 = vpack.c.bf16 %v210_v5, %v210_v5  ;;  %v110_v12 = vpack.c.bf16 %v109_v6, %v109_v6 }
  0xbc   :  { %v311_v22 = vpack.c.bf16 %v310_v18, %v310_v18  ;;  %v279_v23 = vpack.c.bf16 %v278_v19, %v278_v19  ;;  %v347_v24 = vpack.c.bf16 %v346_v20, %v346_v20  ;;  %v382_v27 = vmul.f32 %v380_v26, %v374_v25 }
  0xbd   :  { %449 = vmatmul.msk.bf16.vlgmr.msra.gmra.mxu1 %vm47_vm0, %v122_v8  ;;  %461 = vmatmul.msk.bf16.vlgmr.msra.gmra.mxu3 %vm47_vm0, %v179_v7 }
  0xbe   :  { %454 = vmatmul.msk.bf16.vlgmr.msra.gmra.mxu2 %vm47_vm0, %v110_v12  ;;  %468 = vmatmul.msk.bf16.vlgmr.msrb.gmra.mxu0 %vm47_vm0, %v211_v11  ;;  %v383_v28 = vpack.c.bf16 %v382_v27, %v382_v27 }
  0xbf   :  { %403 = vmatpush.bf16.msra.mxu1 %v513_v10 }
  0xcd   :  { %475 = vmatmul.msk.bf16.vlgmr.msrb.gmra.mxu1 %vm47_vm0, %v243_v21  ;;  %489 = vmatmul.msk.bf16.vlgmr.msrb.gmra.mxu3 %vm47_vm0, %v311_v22 }
  0xce   :  { %482 = vmatmul.msk.bf16.vlgmr.msrb.gmra.mxu2 %vm47_vm0, %v279_v23  ;;  %496 = vmatmul.msk.bf16.vlgmr.msra.gmra.mxu0 %vm47_vm0, %v347_v24 }
  0xdd   :  { %503 = vmatmul.msk.bf16.vlgmr.msra.gmra.mxu1 %vm47_vm0, %v383_v28 }
 0x13a   :  { %v144_v29 = vpop.f32.mrf.mxu1 }
 0x13b   :  { %v233_v30 = vpop.f32.mrf.mxu0 }
 0x140   :  { %v201_v31 = vpop.f32.mrf.mxu3 }
 0x141   :  { %v166_v32 = vpop.f32.mrf.mxu2 }
 0x142   :  { %v146_v33 = vpop.f32.mrf.mxu1  ;;  %v167_v35 = vadd.f32 %v166_v32, %v144_v29 }
 0x143   :  { %v235_v34 = vpop.f32.mrf.mxu0 }
 0x144   :  { %v205_v38 = vadd.f32 %v201_v31, %v167_v35 }
 0x146   :  { %v237_v41 = vadd.f32 %v233_v30, %v205_v38 }
 0x148   :  { %v203_v36 = vpop.f32.mrf.mxu3 }
 0x149   :  { %v168_v37 = vpop.f32.mrf.mxu2 }
 0x14a   :  { %v265_v39 = vpop.f32.mrf.mxu1 }
 0x14b   :  { %v369_v40 = vpop.f32.mrf.mxu0  ;;  %v269_v42 = vadd.f32 %v265_v39, %v237_v41 }
 0x150   :  { %v333_v43 = vpop.f32.mrf.mxu3 }
 0x151   :  { %v301_v44 = vpop.f32.mrf.mxu2 }
 0x152   :  { %v305_v45 = vadd.f32 %v301_v44, %v269_v42  ;;  %v267_v46 = vpop.f32.mrf.mxu1 }
 0x153   :  { %v371_v47 = vpop.f32.mrf.mxu0 }
 0x154   :  { %v337_v48 = vadd.f32 %v333_v43, %v305_v45 }
 0x156   :  { %v373_v51 = vadd.f32 %v369_v40, %v337_v48 }
 0x158   :  { %v335_v49 = vpop.f32.mrf.mxu3 }
 0x159   :  { %v303_v50 = vpop.f32.mrf.mxu2 }
 0x15a   :  { %v405_v52 = vpop.f32.mrf.mxu1 }
 0x15b   :  { %v409_v53 = vadd.f32 %v405_v52, %v373_v51 }
 0x15d   :  { %411 = vst.msk [vmem:[%s651_s6] sm:$0xff] %vm410_vm4, %v409_v53  ;;  %v412_v54 = vsel %vm410_vm4, %v409_v53, 0.0  ;;  %v419_v55 = vmul.f32 %v409_v53, %v409_v53 }
 0x15e   :  { %v413_v56 = vrot.slane %v412_v54, 4 }
 0x15f   :  { %v420_v57 = vsel %vm410_vm4, %v419_v55, 0.0 }
 0x160   :  { %v414_v58 = vadd.f32 %v413_v56, %v412_v54  ;;  %v421_v59 = vrot.slane %v420_v57, 4 }
 0x162   :  { %v415_v60 = vrot.slane %v414_v58, 2  ;;  %v422_v61 = vadd.f32 %v421_v59, %v420_v57  ;;  %v407_v62 = vpop.f32.mrf.mxu1 }
 0x164   :  { %v416_v63 = vadd.f32 %v415_v60, %v414_v58  ;;  %v423_v0 = vrot.slane %v422_v61, 2 }
 0x166   :  { %v417_v1 = vrot.slane %v416_v63, 1  ;;  %v424_v2 = vadd.f32 %v423_v0, %v422_v61 }
 0x168   :  { %v425_v3 = vrot.slane %v424_v2, 1  ;;  %v418_v4 = vadd.f32 %v417_v1, %v416_v63 }
 0x16a   :  { %v426_v5 = vadd.f32 %v425_v3, %v424_v2 }
 0x16c   :  { %v427_v6 = vsel %vm172_vm5, %v418_v4, %v426_v5 }
 0x16d   :  { %429 = vst.msk [vmem:[%s652_s7] sm:$0x3] %vm428_vm6, %v427_v6 }

// kernel: densenet_forward.14
= control target key start
LH: loop header
LB: loop body
LE: loop exit
PB: predicated region body
PF: predicated region fallthrough
CT: control target
= control target key end

     0   :  { %vm71_vm0 = vcmask 1043456   ;;  %v586_v3 = vmov 4   ;;  %v587_v7 = vmov 1   ;;  %v588_v15 = vmov 3   ;;  %s731_s7 = inlined_call_operand.vmem [shape: bf16[8,16], index: 7, kind: input, shape index: {}]   ;;  %s732_s6 = inlined_call_operand.vmem [shape: bf16[16,16], index: 6, kind: input, shape index: {}]   ;;  %s733_s1 = inlined_call_operand.vmem [shape: f32[8,8], index: 1, kind: input, shape index: {}]   ;;  %s734_s3 = inlined_call_operand.vmem [shape: f32[1,8], index: 3, kind: input, shape index: {}]   ;;  %s735_s5 = inlined_call_operand.vmem [shape: f32[1,8], index: 5, kind: input, shape index: {}]   ;;  %s736_s0 = inlined_call_operand.vmem [shape: f32[8,16], index: 0, kind: input, shape index: {}]   ;;  %s737_s2 = inlined_call_operand.vmem [shape: f32[1,16], index: 2, kind: input, shape index: {}]   ;;  %s738_s4 = inlined_call_operand.vmem [shape: f32[1,16], index: 4, kind: input, shape index: {}]   ;;  %s739_s9 = inlined_call_operand.vmem [shape: f32[8,9], index: 9, kind: input, shape index: {}]   ;;  %s740_s8 = inlined_call_operand.vmem [shape: bf16[9,16,8], index: 8, kind: input, shape index: {}]   ;;  %s741_s10 = inlined_call_operand.vmem [shape: f32[8,8], index: 10, kind: output, shape index: {0}]   ;;  %s742_s11 = inlined_call_operand.vmem [shape: f32[2,8], index: 11, kind: output, shape index: {1}]  }
   0x1   :  { %v66_v0 = vld [vmem:[%s731_s7] sm:$0xf]  ;;  %572 = vset.pattern.permute.xlu1 %v586_v3  ;;  %570 = vset.pattern.permute.xlu0 %v587_v7  ;;  %vm67_vm1 = vcmask 64512   ;;  %vm94_vm2 = vcmask 130048   ;;  %v589_v21 = vmov 2   ;;  %v590_v22 = vmov 0  }
   0x2   :  { %v551_v1 = vld [vmem:[%s732_s6] sm:$0xff]  ;;  %v73_v4 = vsel %vm71_vm0, %v66_v0, 0  ;;  %574 = vset.pattern.permute.xlu2 %v588_v15  ;;  %v591_v23 = vmov 5   ;;  %v592_v24 = vmov 8   ;;  %v593_v25 = vmov 7   ;;  %v553_v50 = vld [vmem:[%s740_s8 + $0x8] sm:$0xff] }
   0x3   :  { %v53_v2 = vld [vmem:[%s733_s1] sm:$0xff]  ;;  %82 = vmatpush.bf16.msra.mxu0 %v73_v4  ;;  %105 = vmatpush.bf16.msra.mxu1 %v551_v1  ;;  %v594_v26 = vmov 6   ;;  %v554_v52 = vld [vmem:[%s740_s8 + $0x10] sm:$0xff]  ;;  %v555_v54 = vld [vmem:[%s740_s8 + $0x18] sm:$0xff]  ;;  %vm219_vm6 = vcmask 1040384   ;;  %vm474_vm7 = vcmask 58368  }
   0x4   :  { %v580_v5 = vld [vmem:[%s734_s3] ss:$0 sm:$0xff]  ;;  %189 = vmatpush.bf16.msra.mxu2 %v553_v50  ;;  %v557_v57 = vld [vmem:[%s740_s8 + $0x28] sm:$0xff]  ;;  %v558_v58 = vld [vmem:[%s740_s8 + $0x30] sm:$0xff] }
   0x5   :  { %v38_v6 = vld [vmem:[%s736_s0] sm:$0xff]  ;;  %v58_v9 = vmul.f32 %v580_v5, %v53_v2  ;;  %v559_v60 = vld [vmem:[%s740_s8 + $0x38] sm:$0xff] }
   0x6   :  { %v581_v8 = vld [vmem:[%s735_s5] ss:$0 sm:$0xff] }
   0x7   :  { %v582_v10 = vld [vmem:[%s737_s2] ss:$0 sm:$0xff]  ;;  %v63_v13 = vadd.f32 %v581_v8, %v58_v9  ;;  %246 = vmatpush.bf16.msrb.mxu0 %v554_v52  ;;  %278 = vmatpush.bf16.msrb.mxu1 %v555_v54 }
   0x8   :  { %v583_v11 = vld [vmem:[%s738_s4] ss:$0 sm:$0xff]  ;;  %v43_v14 = vmul.f32 %v582_v10, %v38_v6 }
   0x9   :  { %v150_v12 = vld [vmem:[%s739_s9] sm:$0xff]  ;;  %v64_v16 = vmax.f32 %v63_v13, 0.0 }
   0xa   :  { %286 = vperm.xlu1 %572, %v150_v12   ;;  %165 = vperm.xlu0 %570, %v150_v12   ;;  %v48_v17 = vadd.f32 %v583_v11, %v43_v14  ;;  %v552_v51 = vld [vmem:[%s740_s8] sm:$0xff] }
   0xb   :  { %254 = vperm.xlu2 %574, %v150_v12   ;;  %v65_v18 = vpack.c.bf16 %v64_v16, %v64_v16  ;;  %211 = vmatpush.bf16.msra.mxu3 %v552_v51  ;;  %v556_v56 = vld [vmem:[%s740_s8 + $0x20] sm:$0xff] }
   0xc   :  { %v49_v19 = vmax.f32 %v48_v17, 0.0  ;;  %310 = vmatpush.bf16.msrb.mxu2 %v556_v56 }
   0xd   :  { %484 = vmatmul.msk.bf16.vlgmr.msra.gmra.mxu0 %vm67_vm1, %v65_v18 }
   0xe   :  { %v50_v20 = vpack.c.bf16 %v49_v19, %v49_v19  ;;  %378 = vmatpush.bf16.msra.mxu0 %v558_v58 }
   0xf   :  { %346 = vmatpush.bf16.msrb.mxu3 %v557_v57 }
  0x10   :  { %489 = vmatmul.msk.bf16.vlgmr.msra.gmra.mxu1 %vm94_vm2, %v50_v20 }
  0x11   :  { %414 = vmatpush.bf16.msra.mxu1 %v559_v60 }
  0x12   :  { %573 = vset.pattern.permute.xlu1 %v589_v21  ;;  %571 = vset.pattern.permute.xlu0 %v590_v22  ;;  %v560_v22 = vld [vmem:[%s740_s8 + $0x40] sm:$0xff] }
  0x13   :  { %222 = vperm.xlu1 %573, %v150_v12   ;;  %153 = vperm.xlu0 %571, %v150_v12  }
  0x14   :  { %575 = vset.pattern.permute.xlu2 %v591_v23 }
  0x15   :  { %322 = vperm.xlu2 %575, %v150_v12  }
  0x1b   :  { %576 = vset.pattern.permute.xlu1 %v592_v24  ;;  %578 = vset.pattern.permute.xlu0 %v593_v25 }
  0x1c   :  { %426 = vperm.xlu1 %576, %v150_v12   ;;  %390 = vperm.xlu0 %578, %v150_v12  }
  0x1d   :  { %577 = vset.pattern.permute.xlu2 %v594_v26 }
  0x1e   :  { %354 = vperm.xlu2 %577, %v150_v12  }
  0x24   :  { %579 = vset.pattern.permute.xlu0 %v592_v24 }
  0x65   :  { %v255_v6 = vpop.permute.xlu2 %254 }
  0x6f   :  { %v323_v21 = vpop.permute.xlu2 %322 }
  0x7c   :  { %v287_v2 = vpop.permute.xlu1 %286  ;;  %v166_v3 = vpop.permute.xlu0 %165 }
  0x85   :  { %v223_v15 = vpop.permute.xlu1 %222  ;;  %v154_v16 = vpop.permute.xlu0 %153 }
  0x8a   :  { %v84_v27 = vpop.f32.mrf.mxu0 }
  0x8d   :  { %v107_v28 = vpop.f32.mrf.mxu1 }
  0x8e   :  { %v108_v29 = vadd.f32 %v107_v28, %v84_v27  ;;  %v391_v27 = vpop.permute.xlu0 %390  ;;  %v355_v28 = vpop.permute.xlu2 %354 }
  0x90   :  { %v111_v30 = vsel %vm94_vm2, %v108_v29, 0.0  ;;  %v119_v31 = vmul.f32 %v108_v29, %v108_v29 }
  0x91   :  { %v112_v32 = vrot.slane %v111_v30, 4 }
  0x92   :  { %v120_v33 = vsel %vm94_vm2, %v119_v31, 0.0  ;;  %v86_v36 = vpop.f32.mrf.mxu0 }
  0x93   :  { %v113_v34 = vadd.f32 %v112_v32, %v111_v30  ;;  %v121_v35 = vrot.slane %v120_v33, 4 }
  0x95   :  { %v114_v37 = vrot.slane %v113_v34, 2  ;;  %v122_v38 = vadd.f32 %v121_v35, %v120_v33  ;;  %v109_v39 = vpop.f32.mrf.mxu1 }
  0x97   :  { %v115_v40 = vadd.f32 %v114_v37, %v113_v34  ;;  %v123_v41 = vrot.slane %v122_v38, 2 }
  0x99   :  { %v116_v42 = vrot.slane %v115_v40, 1  ;;  %v124_v43 = vadd.f32 %v123_v41, %v122_v38  ;;  %v427_v38 = vpop.permute.xlu1 %426 }
  0x9b   :  { %v117_v44 = vadd.f32 %v116_v42, %v115_v40  ;;  %v125_v45 = vrot.slane %v124_v43, 1 }
  0x9d   :  { %v118_v46 = vmul.f32 0.125, %v117_v44  ;;  %v126_v47 = vadd.f32 %v125_v45, %v124_v43 }
  0x9f   :  { %v127_v48 = vmul.f32 0.125, %v126_v47  ;;  %v128_v49 = vmul.f32 %v118_v46, %v118_v46  ;;  %v131_v5 = vsub.f32 %v108_v29, %v118_v46 }
  0xa1   :  { %v129_v53 = vsub.f32 %v127_v48, %v128_v49 }
  0xa3   :  { %v130_v55 = vmax.f32 %v129_v53, 0.0 }
  0xa5   :  { %v132_v59 = vadd.f32 1e-05, %v130_v55 }
  0xa7   :  { %584 = vrsqrt.f32 %v132_v59  ;;  %vm139_vm4 = vweird.f32 %v132_v59 }
  0xad   :  { %v585_v61 = vpop.eup %584 }
  0xae   :  { %v134_v62 = vmul.f32 %v585_v61, %v132_v59  ;;  %vm140_vm3 = vweird.f32 %v585_v61 }
  0xaf   :  { %vm141_vm5 = vmor %vm139_vm4, %vm140_vm3 }
  0xb0   :  { %v135_v63 = vmul.f32 %v585_v61, %v134_v62 }
  0xb2   :  { %v136_v0 = vmul.f32 0.5, %v135_v63 }
  0xb4   :  { %v137_v1 = vsub.f32 1.5, %v136_v0 }
  0xb6   :  { %v138_v4 = vmul.f32 %v585_v61, %v137_v1 }
  0xb8   :  { %v142_v7 = vsel %vm141_vm5, %v585_v61, %v138_v4 }
  0xb9   :  { %v143_v8 = vmul.f32 %v142_v7, %v131_v5 }
  0xbb   :  { %v144_v9 = vmax.f32 %v143_v8, 0.0 }
  0xbd   :  { %v217_v10 = vrot.slane %v144_v9, 7  ;;  %v160_v11 = vrot.slane %v144_v9, 6  ;;  %v146_v12 = vrot.slane %v144_v9, 5  ;;  %v385_v25 = vrot.slane %v144_v9, 2 }
  0xbe   :  { %v317_v26 = vrot.slane %v144_v9, 1  ;;  %v289_v29 = vmul.f32 %v287_v2, %v144_v9  ;;  %v421_v37 = vrot.slane %v144_v9, 3 }
  0xbf   :  { %v257_v13 = vmul.f32 %v255_v6, %v217_v10  ;;  %v168_v14 = vmul.f32 %v166_v3, %v160_v11  ;;  %v225_v17 = vmul.f32 %v223_v15, %v217_v10  ;;  %v156_v18 = vmul.f32 %v154_v16, %v146_v12 }
  0xc0   :  { %v393_v30 = vmul.f32 %v391_v27, %v385_v25  ;;  %v325_v31 = vmul.f32 %v323_v21, %v317_v26  ;;  %v357_v32 = vmul.f32 %v355_v28, %v317_v26  ;;  %v290_v33 = vpack.c.bf16 %v289_v29, %v289_v29 }
  0xc1   :  { %v258_v19 = vpack.c.bf16 %v257_v13, %v257_v13  ;;  %v169_v20 = vpack.c.bf16 %v168_v14, %v168_v14  ;;  %v226_v23 = vpack.c.bf16 %v225_v17, %v225_v17  ;;  %v157_v24 = vpack.c.bf16 %v156_v18, %v156_v18 }
  0xc2   :  { %v394_v34 = vpack.c.bf16 %v393_v30, %v393_v30  ;;  %v326_v35 = vpack.c.bf16 %v325_v31, %v325_v31  ;;  %v358_v36 = vpack.c.bf16 %v357_v32, %v357_v32  ;;  %v429_v39 = vmul.f32 %v427_v38, %v421_v37 }
  0xc3   :  { %496 = vmatmul.msk.bf16.vlgmr.msra.gmra.mxu2 %vm94_vm2, %v169_v20  ;;  %515 = vmatmul.msk.bf16.vlgmr.msrb.gmra.mxu1 %vm94_vm2, %v258_v19 }
  0xc4   :  { %501 = vmatmul.msk.bf16.vlgmr.msra.gmra.mxu3 %vm94_vm2, %v157_v24  ;;  %508 = vmatmul.msk.bf16.vlgmr.msrb.gmra.mxu0 %vm94_vm2, %v226_v23  ;;  %v430_v40 = vpack.c.bf16 %v429_v39, %v429_v39 }
  0xc5   :  { %450 = vmatpush.bf16.msra.mxu2 %v560_v22 }
  0xd3   :  { %522 = vmatmul.msk.bf16.vlgmr.msrb.gmra.mxu2 %vm94_vm2, %v290_v33  ;;  %543 = vmatmul.msk.bf16.vlgmr.msra.gmra.mxu1 %vm94_vm2, %v394_v34 }
  0xd4   :  { %529 = vmatmul.msk.bf16.vlgmr.msrb.gmra.mxu3 %vm94_vm2, %v326_v35  ;;  %536 = vmatmul.msk.bf16.vlgmr.msra.gmra.mxu0 %vm94_vm2, %v358_v36 }
  0xe3   :  { %550 = vmatmul.msk.bf16.vlgmr.msra.gmra.mxu2 %vm94_vm2, %v430_v40 }
 0x140   :  { %v280_v41 = vpop.f32.mrf.mxu1 }
 0x141   :  { %v248_v42 = vpop.f32.mrf.mxu0 }
 0x146   :  { %v191_v43 = vpop.f32.mrf.mxu2 }
 0x147   :  { %v213_v44 = vpop.f32.mrf.mxu3 }
 0x148   :  { %v282_v45 = vpop.f32.mrf.mxu1  ;;  %v214_v48 = vadd.f32 %v213_v44, %v191_v43 }
 0x149   :  { %v250_v46 = vpop.f32.mrf.mxu0 }
 0x14a   :  { %v252_v52 = vadd.f32 %v248_v42, %v214_v48 }
 0x14c   :  { %v284_v54 = vadd.f32 %v280_v41, %v252_v52 }
 0x14e   :  { %v193_v47 = vpop.f32.mrf.mxu2 }
 0x14f   :  { %v215_v49 = vpop.f32.mrf.mxu3 }
 0x150   :  { %v416_v50 = vpop.f32.mrf.mxu1 }
 0x151   :  { %v380_v51 = vpop.f32.mrf.mxu0 }
 0x156   :  { %v312_v53 = vpop.f32.mrf.mxu2 }
 0x157   :  { %v348_v55 = vpop.f32.mrf.mxu3  ;;  %v316_v57 = vadd.f32 %v312_v53, %v284_v54 }
 0x158   :  { %v418_v56 = vpop.f32.mrf.mxu1 }
 0x159   :  { %v382_v58 = vpop.f32.mrf.mxu0  ;;  %v352_v59 = vadd.f32 %v348_v55, %v316_v57 }
 0x15b   :  { %v384_v62 = vadd.f32 %v380_v51, %v352_v59 }
 0x15d   :  { %v420_v63 = vadd.f32 %v416_v50, %v384_v62 }
 0x15e   :  { %v314_v60 = vpop.f32.mrf.mxu2 }
 0x15f   :  { %v350_v61 = vpop.f32.mrf.mxu3 }
 0x166   :  { %v452_v0 = vpop.f32.mrf.mxu2 }
 0x167   :  { %v456_v1 = vadd.f32 %v452_v0, %v420_v63 }
 0x169   :  { %457 = vst.msk [vmem:[%s741_s10] sm:$0xff] %vm67_vm1, %v456_v1  ;;  %v458_v2 = vsel %vm67_vm1, %v456_v1, 0.0  ;;  %v465_v3 = vmul.f32 %v456_v1, %v456_v1 }
 0x16a   :  { %v459_v4 = vrot.slane %v458_v2, 4 }
 0x16b   :  { %v466_v5 = vsel %vm67_vm1, %v465_v3, 0.0 }
 0x16c   :  { %v460_v6 = vadd.f32 %v459_v4, %v458_v2  ;;  %v467_v7 = vrot.slane %v466_v5, 4 }
 0x16e   :  { %v461_v8 = vrot.slane %v460_v6, 2  ;;  %v468_v9 = vadd.f32 %v467_v7, %v466_v5  ;;  %v454_v10 = vpop.f32.mrf.mxu2 }
 0x170   :  { %v462_v11 = vadd.f32 %v461_v8, %v460_v6  ;;  %v469_v12 = vrot.slane %v468_v9, 2 }
 0x172   :  { %v463_v13 = vrot.slane %v462_v11, 1  ;;  %v470_v14 = vadd.f32 %v469_v12, %v468_v9 }
 0x174   :  { %v471_v15 = vrot.slane %v470_v14, 1  ;;  %v464_v16 = vadd.f32 %v463_v13, %v462_v11 }
 0x176   :  { %v472_v17 = vadd.f32 %v471_v15, %v470_v14 }
 0x178   :  { %v473_v18 = vsel %vm219_vm6, %v464_v16, %v472_v17 }
 0x179   :  { %475 = vst.msk [vmem:[%s742_s11] sm:$0x3] %vm474_vm7, %v473_v18 }

// kernel: densenet_forward.15
= control target key start
LH: loop header
LB: loop body
LE: loop exit
PB: predicated region body
PF: predicated region fallthrough
CT: control target
= control target key end

     0   :  { %vm74_vm0 = vcmask 64512   ;;  %vm98_vm1 = vcmask 130048   ;;  %vm187_vm2 = vcmask 48128   ;;  %s330_s11 = inlined_call_operand.vmem [shape: f32[8,6], index: 11, kind: input, shape index: {}]   ;;  %s331_s2 = inlined_call_operand.vmem [shape: f32[8,8], index: 2, kind: input, shape index: {}]   ;;  %s332_s5 = inlined_call_operand.vmem [shape: f32[1,8], index: 5, kind: input, shape index: {}]   ;;  %s333_s8 = inlined_call_operand.vmem [shape: f32[1,8], index: 8, kind: input, shape index: {}]   ;;  %s334_s9 = inlined_call_operand.vmem [shape: f32[16,6], index: 9, kind: input, shape index: {}]   ;;  %s335_s10 = inlined_call_operand.vmem [shape: f32[8,6], index: 10, kind: input, shape index: {}]   ;;  %s336_s1 = inlined_call_operand.vmem [shape: f32[8,8], index: 1, kind: input, shape index: {}]   ;;  %s337_s4 = inlined_call_operand.vmem [shape: f32[1,8], index: 4, kind: input, shape index: {}]   ;;  %s338_s7 = inlined_call_operand.vmem [shape: f32[1,8], index: 7, kind: input, shape index: {}]   ;;  %s339_s0 = inlined_call_operand.vmem [shape: f32[8,16], index: 0, kind: input, shape index: {}]   ;;  %s340_s3 = inlined_call_operand.vmem [shape: f32[1,16], index: 3, kind: input, shape index: {}]   ;;  %s341_s6 = inlined_call_operand.vmem [shape: f32[1,16], index: 6, kind: input, shape index: {}]   ;;  %s342_s13 = inlined_call_operand.vmem [shape: f32[1,6], index: 13, kind: input, shape index: {}]   ;;  %s343_s12 = inlined_call_operand.vmem [shape: f32[8,8], index: 12, kind: input, shape index: {}]   ;;  %s344_s14 = inlined_call_operand.vmem [shape: f32[8,6], index: 14, kind: output, shape index: {}]  }
   0x1   :  { %v134_v0 = vld [vmem:[%s330_s11] sm:$0xff]  ;;  %v60_v4 = vld [vmem:[%s334_s9 + $0x8] sm:$0xff] }
   0x2   :  { %v122_v1 = vld [vmem:[%s331_s2] sm:$0xff]  ;;  %153 = vmatpush.msra.mxu2 %v134_v0  ;;  %116 = vmatpush.msra.mxu1 %v60_v4 }
   0x3   :  { %v197_v2 = vld [vmem:[%s332_s5] ss:$0 sm:$0xff] }
   0x4   :  { %v198_v3 = vld [vmem:[%s333_s8] ss:$0 sm:$0xff]  ;;  %v127_v7 = vmul.f32 %v197_v2, %v122_v1 }
   0x5   :  { %v73_v5 = vld [vmem:[%s335_s10] sm:$0xff] }
   0x6   :  { %v59_v6 = vld [vmem:[%s334_s9] sm:$0xff]  ;;  %93 = vmatpush.msra.mxu0 %v73_v5  ;;  %v132_v12 = vadd.f32 %v198_v3, %v127_v7 }
   0x7   :  { %v61_v8 = vld [vmem:[%s336_s1] sm:$0xff]  ;;  %117 = vmatpush.msra.mxu1 %v59_v6 }
   0x8   :  { %v199_v9 = vld [vmem:[%s337_s4] ss:$0 sm:$0xff]  ;;  %v133_v16 = vmax.f32 %v132_v12, 0.0 }
   0x9   :  { %v200_v10 = vld [vmem:[%s338_s7] ss:$0 sm:$0xff]  ;;  %v66_v13 = vmul.f32 %v199_v9, %v61_v8 }
   0xa   :  { %v47_v11 = vld [vmem:[%s339_s0] sm:$0xff]  ;;  %195 = vmatmul.msk.f32.vlgmr.msra.gmra.mxu2 %vm74_vm0, %v133_v16 }
   0xb   :  { %v201_v14 = vld [vmem:[%s340_s3] ss:$0 sm:$0xff]  ;;  %v71_v17 = vadd.f32 %v200_v10, %v66_v13 }
   0xc   :  { %v202_v15 = vld [vmem:[%s341_s6] ss:$0 sm:$0xff]  ;;  %v52_v18 = vmul.f32 %v201_v14, %v47_v11 }
   0xd   :  { %v72_v19 = vmax.f32 %v71_v17, 0.0  ;;  %v159_v27 = vld [vmem:[%s343_s12] sm:$0xff] }
   0xe   :  { %v57_v20 = vadd.f32 %v202_v15, %v52_v18  ;;  %v203_v28 = vld [vmem:[%s342_s13] ss:$0 sm:$0xff] }
   0xf   :  { %193 = vmatmul.msk.f32.vlgmr.msra.gmra.mxu0 %vm74_vm0, %v72_v19 }
  0x10   :  { %v58_v21 = vmax.f32 %v57_v20, 0.0 }
  0x12   :  { %194 = vmatmul.msk.f32.vlgmr.msra.gmra.mxu1 %vm98_vm1, %v58_v21 }
  0x8c   :  { %v95_v22 = vpop.f32.mrf.mxu0 }
  0x8d   :  { %v155_v25 = vpop.f32.mrf.mxu2 }
  0x8f   :  { %v119_v23 = vpop.f32.mrf.mxu1 }
  0x90   :  { %v120_v24 = vadd.f32 %v119_v23, %v95_v22 }
  0x92   :  { %v158_v26 = vadd.f32 %v155_v25, %v120_v24 }
  0x94   :  { %182 = vmatpush.msra.mxu3 %v158_v26 }
  0x95   :  { %196 = vmatmul.msk.f32.vlgmr.msra.gmra.mxu3 %vm74_vm0, %v159_v27 }
 0x118   :  { %v184_v29 = vpop.f32.mrf.mxu3 }
 0x119   :  { %v185_v30 = vadd.f32 %v203_v28, %v184_v29 }
 0x11b   :  { %188 = vst.msk [vmem:[%s344_s14] sm:$0xff] %vm187_vm2, %v185_v30 }

</bundles_post_ra>
